<compile_context>
chip_gen: v7x
topology: tpu7x:2x2x1
jax: 0.10.0
libtpu: 0.0.40
codegen_flags: <defaults>
</compile_context>

<pallas_src>
import numpy as np
import jax
import jax.numpy as jnp
from jax import lax
from jax.experimental import pallas as pl
from jax.experimental.pallas import tpu as pltpu


def _round_up(x, m):
    return -(-x // m) * m


# ----------------------------- Pallas kernels ------------------------------ #

def _conv_bn_relu_kernel(p_ref, w_ref, b_ref, o_ref):
    # p_ref: (TM, K_pad) bf16 im2col patches
    # w_ref: (K_pad, Cout_pad) bf16 weights with BN scale folded in
    # b_ref: (1, Cout_pad) f32 folded BN bias
    # o_ref: (TM, Cout_pad) f32 or bf16
    acc = jnp.dot(p_ref[...], w_ref[...], preferred_element_type=jnp.float32)
    o_ref[...] = jnp.maximum(acc + b_ref[...], 0.0).astype(o_ref.dtype)


def _maxpool_kernel(t0_ref, t1_ref, t2_ref, o_ref):
    # t{0,1,2}_ref: (3, 1, 1, Wo, C) -> the 3 W-taps of input rows 2r, 2r+1, 2r+2
    # o_ref: (1, 1, Wo, C)
    m = jnp.maximum(jnp.maximum(t0_ref[...], t1_ref[...]), t2_ref[...])
    o_ref[...] = jnp.maximum(jnp.maximum(m[0], m[1]), m[2])


# ------------------------------ JAX glue ----------------------------------- #

def _extract_patches(x, kh, kw, stride, padding):
    """x: NHWC. Returns (N, Ho, Wo, kh*kw*C) with (kh, kw, c) flattening order."""
    n, h, w, c = x.shape
    if padding:
        x = jnp.pad(x, ((0, 0), (padding, padding), (padding, padding), (0, 0)))
        h += 2 * padding
        w += 2 * padding
    ho = (h - kh) // stride + 1
    wo = (w - kw) // stride + 1
    taps = []
    for i in range(kh):
        for j in range(kw):
            taps.append(
                x[:, i:i + stride * (ho - 1) + 1:stride,
                     j:j + stride * (wo - 1) + 1:stride, :])
    patches = jnp.stack(taps, axis=3)            # (N, Ho, Wo, kh*kw, C)
    return patches.reshape(n, ho, wo, kh * kw * c), ho, wo


def conv_bn_relu(x_nhwc, *, w, gamma, beta, mean, var,
                 stride=1, padding=0, eps=1e-3, out_dtype=jnp.float32):
    """BasicConv2d: conv (no bias) + BatchNorm(eps=0.001, eval) + ReLU."""
    kh, kw, cin, cout = w.shape
    n = x_nhwc.shape[0]

    # Fold BN scale into the conv weights (trace time); bias stays separate.
    inv_std = lax.rsqrt(var + eps)
    scale = gamma * inv_std                                    # (cout,)
    bias = beta - mean * scale                                 # (cout,)
    w_folded = w * scale[None, None, None, :]                  # f32 fold, then bf16

    # im2col in bf16 (halves HBM traffic for the patch matrix).
    patches, ho, wo = _extract_patches(
        x_nhwc.astype(jnp.bfloat16), kh, kw, stride, padding)

    m = n * ho * wo
    k = kh * kw * cin
    k_pad = _round_up(k, 128)
    cout_pad = _round_up(cout, 128)
    tm = 256 if m >= 256 else _round_up(m, 16)
    m_pad = pl.cdiv(m, tm) * tm

    p2 = jnp.pad(patches.reshape(m, k), ((0, m_pad - m), (0, k_pad - k)))
    w2 = jnp.pad(w_folded.reshape(k, cout).astype(jnp.bfloat16),
                 ((0, k_pad - k), (0, cout_pad - cout)))
    b2 = jnp.pad(bias, (0, cout_pad - cout)).reshape(1, cout_pad)
    b2 = b2.astype(jnp.float32)

    out_itemsize = jnp.dtype(out_dtype).itemsize
    cost = pl.CostEstimate(
        flops=2 * m_pad * k_pad * cout_pad,
        transcendentals=0,
        bytes_accessed=p2.size * 2 + w2.size * 2 + b2.size * 4
                       + m_pad * cout_pad * out_itemsize,
    )

    out = pl.pallas_call(
        _conv_bn_relu_kernel,
        out_shape=jax.ShapeDtypeStruct((m_pad, cout_pad), out_dtype),
        grid=(m_pad // tm,),
        in_specs=[
            pl.BlockSpec((tm, k_pad), lambda i: (i, 0)),          # patches tile
            pl.BlockSpec((k_pad, cout_pad), lambda i: (0, 0)),    # resident weights
            pl.BlockSpec((1, cout_pad), lambda i: (0, 0)),        # resident bias
        ],
        out_specs=pl.BlockSpec((tm, cout_pad), lambda i: (i, 0)),
        compiler_params=pltpu.CompilerParams(
            dimension_semantics=("parallel",),
            vmem_limit_bytes=32 * 1024 * 1024,
        ),
        cost_estimate=cost,
    )(p2, w2, b2)

    return out[:m, :cout].reshape(n, ho, wo, cout)


def maxpool3x3_s2(x_nhwc):
    """F.max_pool2d(kernel_size=3, stride=2), no padding."""
    n, h, w, c = x_nhwc.shape
    ho = (h - 3) // 2 + 1
    wo = (w - 3) // 2 + 1

    # Pre-reduce the W direction to 3 taps (separable pool): (3, N, H, Wo, C).
    taps = jnp.stack(
        [x_nhwc[:, :, j:j + 2 * (wo - 1) + 1:2, :] for j in range(3)], axis=0)

    def tap_spec(k):
        return pl.BlockSpec((3, 1, 1, wo, c),
                            lambda b, r, k=k: (0, b, 2 * r + k, 0, 0))

    out = pl.pallas_call(
        _maxpool_kernel,
        out_shape=jax.ShapeDtypeStruct((n, ho, wo, c), x_nhwc.dtype),
        grid=(n, ho),
        in_specs=[tap_spec(0), tap_spec(1), tap_spec(2)],
        out_specs=pl.BlockSpec((1, 1, wo, c), lambda b, r: (b, r, 0, 0)),
        compiler_params=pltpu.CompilerParams(
            dimension_semantics=("parallel", "parallel")),
    )(taps, taps, taps)
    return out


# ------------------------- InceptionB parameters --------------------------- #

def init_inception_b_params(key, in_channels):
    def conv_bn(k, cin, cout, ksz):
        k1, k2, k3, k4, k5 = jax.random.split(k, 5)
        wstd = 1.0 / np.sqrt(ksz * ksz * cin)
        return dict(
            w=jax.random.normal(k1, (ksz, ksz, cin, cout), jnp.float32) * wstd,
            gamma=1.0 + 0.1 * jax.random.normal(k2, (cout,), jnp.float32),
            beta=0.1 * jax.random.normal(k3, (cout,), jnp.float32),
            mean=0.1 * jax.random.normal(k4, (cout,), jnp.float32),
            var=jnp.abs(jax.random.normal(k5, (cout,), jnp.float32)) + 0.5,
        )
    ks = jax.random.split(key, 4)
    return dict(
        branch3x3=conv_bn(ks[0], in_channels, 384, 3),
        dbl1=conv_bn(ks[1], in_channels, 64, 1),
        dbl2=conv_bn(ks[2], 64, 96, 3),
        dbl3=conv_bn(ks[3], 96, 96, 3),
    )


def inception_b_forward(params, x_nchw):
    x = jnp.transpose(x_nchw, (0, 2, 3, 1))                      # -> NHWC
    # Branch outputs that feed the concat are f32; intermediates of the
    # double-3x3 branch stay bf16 (their consumers re-cast to bf16 anyway).
    b3 = conv_bn_relu(x, **params['branch3x3'], stride=2, padding=0,
                      out_dtype=jnp.float32)
    d = conv_bn_relu(x, **params['dbl1'], stride=1, padding=0,
                     out_dtype=jnp.bfloat16)
    d = conv_bn_relu(d, **params['dbl2'], stride=1, padding=1,
                     out_dtype=jnp.bfloat16)
    d = conv_bn_relu(d, **params['dbl3'], stride=2, padding=0,
                     out_dtype=jnp.float32)
    bp = maxpool3x3_s2(x)
    out = jnp.concatenate([b3, d, bp], axis=-1)                  # torch.cat dim=1 order
    return jnp.transpose(out, (0, 3, 1, 2))                      # -> NCHW


# ------------------------------ Reference ---------------------------------- #

def _ref_conv_bn_relu(x_nhwc, *, w, gamma, beta, mean, var,
                      stride=1, padding=0, eps=1e-3):
    y = lax.conv_general_dilated(
        x_nhwc, w, window_strides=(stride, stride),
        padding=[(padding, padding), (padding, padding)],
        dimension_numbers=('NHWC', 'HWIO', 'NHWC'))
    inv_std = 1.0 / jnp.sqrt(var + eps)
    return jnp.maximum((y - mean) * (gamma * inv_std) + beta, 0.0)


def _ref_forward(params, x_nchw):
    x = jnp.transpose(x_nchw, (0, 2, 3, 1))
    b3 = _ref_conv_bn_relu(x, **params['branch3x3'], stride=2, padding=0)
    d = _ref_conv_bn_relu(x, **params['dbl1'], stride=1, padding=0)
    d = _ref_conv_bn_relu(d, **params['dbl2'], stride=1, padding=1)
    d = _ref_conv_bn_relu(d, **params['dbl3'], stride=2, padding=0)
    bp = lax.reduce_window(x, -jnp.inf, lax.max,
                           (1, 3, 3, 1), (1, 2, 2, 1), 'VALID')
    out = jnp.concatenate([b3, d, bp], axis=-1)
    return jnp.transpose(out, (0, 3, 1, 2))


# --------------------------------- Main ------------------------------------ #

if __name__ == "__main__":
    key = jax.random.PRNGKey(0)
    k_param, k_x = jax.random.split(key)

    batch, in_channels, spatial = 2, 4, 16
    x = jax.random.normal(k_x, (batch, in_channels, spatial, spatial), jnp.float32)
    params = init_inception_b_params(k_param, in_channels)

    out = jax.jit(inception_b_forward)(params, x)
    out = jax.block_until_ready(out)

    ref = jax.block_until_ready(_ref_forward(params, x))
    assert out.shape == (batch, 384 + 96 + in_channels, 7, 7), out.shape
    # bf16 matmul inputs / intermediates with f32 accumulation -> within 2e-2.
    np.testing.assert_allclose(np.asarray(out), np.asarray(ref),
                               rtol=2e-2, atol=2e-2)

    print("KERNEL_OK")
</pallas_src>

<mosaic_0001>
module attributes {stable_mosaic.version = 11 : i64} {
  func.func @_maxpool_kernel(%arg0: i32, %arg1: i32, %arg2: memref<3x1x1x7x4xf32, #tpu.memory_space<vmem>>, %arg3: memref<3x1x1x7x4xf32, #tpu.memory_space<vmem>>, %arg4: memref<3x1x1x7x4xf32, #tpu.memory_space<vmem>>, %arg5: memref<1x1x7x4xf32, #tpu.memory_space<vmem>>) attributes {dimension_semantics = [#tpu.dimension_semantics<parallel>, #tpu.dimension_semantics<parallel>], iteration_bounds = array<i64: 2, 7>, scalar_prefetch = 0 : i64, scratch_operands = 0 : i64, tpu.core_type = #tpu.core_type<tc>, window_params = [{transform_indices = @transform_0, window_bounds = array<i64: 3, 1, 1, 7, 4>}, {transform_indices = @transform_1, window_bounds = array<i64: 3, 1, 1, 7, 4>}, {transform_indices = @transform_2, window_bounds = array<i64: 3, 1, 1, 7, 4>}, {transform_indices = @transform_3, window_bounds = array<i64: 1, 1, 7, 4>}]} {
    %c0 = arith.constant 0 : index
    %c0_0 = arith.constant 0 : index
    %c0_1 = arith.constant 0 : index
    %c0_2 = arith.constant 0 : index
    %c0_3 = arith.constant 0 : index
    %0 = vector.load %arg2[%c0, %c0_0, %c0_1, %c0_2, %c0_3] : memref<3x1x1x7x4xf32, #tpu.memory_space<vmem>>, vector<3x1x1x7x4xf32>
    %c0_4 = arith.constant 0 : index
    %c0_5 = arith.constant 0 : index
    %c0_6 = arith.constant 0 : index
    %c0_7 = arith.constant 0 : index
    %c0_8 = arith.constant 0 : index
    %1 = vector.load %arg3[%c0_4, %c0_5, %c0_6, %c0_7, %c0_8] : memref<3x1x1x7x4xf32, #tpu.memory_space<vmem>>, vector<3x1x1x7x4xf32>
    %2 = arith.maximumf %0, %1 : vector<3x1x1x7x4xf32>
    %c0_9 = arith.constant 0 : index
    %c0_10 = arith.constant 0 : index
    %c0_11 = arith.constant 0 : index
    %c0_12 = arith.constant 0 : index
    %c0_13 = arith.constant 0 : index
    %3 = vector.load %arg4[%c0_9, %c0_10, %c0_11, %c0_12, %c0_13] : memref<3x1x1x7x4xf32, #tpu.memory_space<vmem>>, vector<3x1x1x7x4xf32>
    %4 = arith.maximumf %2, %3 : vector<3x1x1x7x4xf32>
    %5 = vector.extract_strided_slice %4 {offsets = [0, 0, 0, 0, 0], sizes = [1, 1, 1, 7, 4], strides = [1, 1, 1, 1, 1]} : vector<3x1x1x7x4xf32> to vector<1x1x1x7x4xf32>
    %6 = vector.shape_cast %5 : vector<1x1x1x7x4xf32> to vector<1x1x7x4xf32>
    %7 = vector.extract_strided_slice %4 {offsets = [1, 0, 0, 0, 0], sizes = [1, 1, 1, 7, 4], strides = [1, 1, 1, 1, 1]} : vector<3x1x1x7x4xf32> to vector<1x1x1x7x4xf32>
    %8 = vector.shape_cast %7 : vector<1x1x1x7x4xf32> to vector<1x1x7x4xf32>
    %9 = arith.maximumf %6, %8 : vector<1x1x7x4xf32>
    %10 = vector.extract_strided_slice %4 {offsets = [2, 0, 0, 0, 0], sizes = [1, 1, 1, 7, 4], strides = [1, 1, 1, 1, 1]} : vector<3x1x1x7x4xf32> to vector<1x1x1x7x4xf32>
    %11 = vector.shape_cast %10 : vector<1x1x1x7x4xf32> to vector<1x1x7x4xf32>
    %12 = arith.maximumf %9, %11 : vector<1x1x7x4xf32>
    %c0_14 = arith.constant 0 : index
    %c0_15 = arith.constant 0 : index
    %c0_16 = arith.constant 0 : index
    %c0_17 = arith.constant 0 : index
    %13 = vector.load %arg5[%c0_14, %c0_15, %c0_16, %c0_17] : memref<1x1x7x4xf32, #tpu.memory_space<vmem>>, vector<1x1x7x4xf32>
    tpu.vector_store %arg5[%c0_14, %c0_15, %c0_16, %c0_17], %12 {strides = array<i32>} : memref<1x1x7x4xf32, #tpu.memory_space<vmem>>, vector<1x1x7x4xf32>,
    return
  }
  func.func @transform_0(%arg0: i32, %arg1: i32) -> (i32, i32, i32, i32, i32) {
    %c2_i32 = arith.constant 2 : i32
    %0 = arith.muli %c2_i32, %arg1 : i32
    %c0_i32 = arith.constant 0 : i32
    %1 = arith.addi %0, %c0_i32 : i32
    %c0_i32_0 = arith.constant 0 : i32
    %c0_i32_1 = arith.constant 0 : i32
    %c0_i32_2 = arith.constant 0 : i32
    %c0_i32_3 = arith.constant 0 : i32
    return %c0_i32_0, %arg0, %1, %c0_i32_1, %c0_i32_2 : i32, i32, i32, i32, i32
  }
  func.func @transform_1(%arg0: i32, %arg1: i32) -> (i32, i32, i32, i32, i32) {
    %c2_i32 = arith.constant 2 : i32
    %0 = arith.muli %c2_i32, %arg1 : i32
    %c1_i32 = arith.constant 1 : i32
    %1 = arith.addi %0, %c1_i32 : i32
    %c0_i32 = arith.constant 0 : i32
    %c0_i32_0 = arith.constant 0 : i32
    %c0_i32_1 = arith.constant 0 : i32
    %c0_i32_2 = arith.constant 0 : i32
    return %c0_i32, %arg0, %1, %c0_i32_0, %c0_i32_1 : i32, i32, i32, i32, i32
  }
  func.func @transform_2(%arg0: i32, %arg1: i32) -> (i32, i32, i32, i32, i32) {
    %c2_i32 = arith.constant 2 : i32
    %0 = arith.muli %c2_i32, %arg1 : i32
    %c2_i32_0 = arith.constant 2 : i32
    %1 = arith.addi %0, %c2_i32_0 : i32
    %c0_i32 = arith.constant 0 : i32
    %c0_i32_1 = arith.constant 0 : i32
    %c0_i32_2 = arith.constant 0 : i32
    %c0_i32_3 = arith.constant 0 : i32
    return %c0_i32, %arg0, %1, %c0_i32_1, %c0_i32_2 : i32, i32, i32, i32, i32
  }
  func.func @transform_3(%arg0: i32, %arg1: i32) -> (i32, i32, i32, i32) {
    %c0_i32 = arith.constant 0 : i32
    %c0_i32_0 = arith.constant 0 : i32
    %c0_i32_1 = arith.constant 0 : i32
    return %arg0, %arg1, %c0_i32, %c0_i32_0 : i32, i32, i32, i32
  }
}

module attributes {stable_mosaic.version = 11 : i64} {
  func.func @_conv_bn_relu_kernel(%arg0: i32, %arg1: memref<256x128xbf16, #tpu.memory_space<vmem>>, %arg2: memref<128x128xbf16, #tpu.memory_space<vmem>>, %arg3: memref<1x128xf32, #tpu.memory_space<vmem>>, %arg4: memref<256x128xbf16, #tpu.memory_space<vmem>>) attributes {dimension_semantics = [#tpu.dimension_semantics<parallel>], iteration_bounds = array<i64: 2>, scalar_prefetch = 0 : i64, scratch_operands = 0 : i64, tpu.core_type = #tpu.core_type<tc>, window_params = [{transform_indices = @transform_0, window_bounds = array<i64: 256, 128>}, {pipeline_mode = #tpu.pipeline_mode<synchronous>, transform_indices = @transform_1, window_bounds = array<i64: 128, 128>}, {pipeline_mode = #tpu.pipeline_mode<synchronous>, transform_indices = @transform_2, window_bounds = array<i64: 1, 128>}, {transform_indices = @transform_3, window_bounds = array<i64: 256, 128>}]} {
    %c0 = arith.constant 0 : index
    %c0_0 = arith.constant 0 : index
    %0 = vector.load %arg1[%c0, %c0_0] : memref<256x128xbf16, #tpu.memory_space<vmem>>, vector<256x128xbf16>
    %c0_1 = arith.constant 0 : index
    %c0_2 = arith.constant 0 : index
    %1 = vector.load %arg2[%c0_1, %c0_2] : memref<128x128xbf16, #tpu.memory_space<vmem>>, vector<128x128xbf16>
    %cst = arith.constant dense<0.000000e+00> : vector<256x128xf32>
    %2 = tpu.matmul %0, %1, %cst {dimension_numbers = #tpu.dot_dimension_numbers<[1], [0], [0], [1], [0, 0, 1, 1], [], []>} : vector<256x128xbf16>, vector<128x128xbf16>, vector<256x128xf32> -> vector<256x128xf32>
    %c0_3 = arith.constant 0 : index
    %c0_4 = arith.constant 0 : index
    %3 = vector.load %arg3[%c0_3, %c0_4] : memref<1x128xf32, #tpu.memory_space<vmem>>, vector<1x128xf32>
    %4 = vector.broadcast %3 : vector<1x128xf32> to vector<256x128xf32>
    %5 = arith.addf %2, %4 : vector<256x128xf32>
    %cst_5 = arith.constant 0.000000e+00 : f32
    %6 = vector.broadcast %cst_5 : f32 to vector<256x128xf32>
    %7 = arith.maximumf %5, %6 : vector<256x128xf32>
    %8 = arith.truncf %7 : vector<256x128xf32> to vector<256x128xbf16>
    %c0_6 = arith.constant 0 : index
    %c0_7 = arith.constant 0 : index
    %9 = vector.load %arg4[%c0_6, %c0_7] : memref<256x128xbf16, #tpu.memory_space<vmem>>, vector<256x128xbf16>
    tpu.vector_store %arg4[%c0_6, %c0_7], %8 {strides = array<i32>} : memref<256x128xbf16, #tpu.memory_space<vmem>>, vector<256x128xbf16>,
    return
  }
  func.func @transform_0(%arg0: i32) -> (i32, i32) {
    %c0_i32 = arith.constant 0 : i32
    %c0_i32_0 = arith.constant 0 : i32
    return %arg0, %c0_i32 : i32, i32
  }
  func.func @transform_1(%arg0: i32) -> (i32, i32) {
    %c0_i32 = arith.constant 0 : i32
    %c0_i32_0 = arith.constant 0 : i32
    %c0_i32_1 = arith.constant 0 : i32
    return %c0_i32, %c0_i32_0 : i32, i32
  }
  func.func @transform_2(%arg0: i32) -> (i32, i32) {
    %c0_i32 = arith.constant 0 : i32
    %c0_i32_0 = arith.constant 0 : i32
    %c0_i32_1 = arith.constant 0 : i32
    return %c0_i32, %c0_i32_0 : i32, i32
  }
  func.func @transform_3(%arg0: i32) -> (i32, i32) {
    %c0_i32 = arith.constant 0 : i32
    %c0_i32_0 = arith.constant 0 : i32
    return %arg0, %c0_i32 : i32, i32
  }
}

module attributes {stable_mosaic.version = 11 : i64} {
  func.func @_conv_bn_relu_kernel(%arg0: i32, %arg1: memref<256x640xbf16, #tpu.memory_space<vmem>>, %arg2: memref<640x128xbf16, #tpu.memory_space<vmem>>, %arg3: memref<1x128xf32, #tpu.memory_space<vmem>>, %arg4: memref<256x128xbf16, #tpu.memory_space<vmem>>) attributes {dimension_semantics = [#tpu.dimension_semantics<parallel>], iteration_bounds = array<i64: 2>, scalar_prefetch = 0 : i64, scratch_operands = 0 : i64, tpu.core_type = #tpu.core_type<tc>, window_params = [{transform_indices = @transform_0, window_bounds = array<i64: 256, 640>}, {pipeline_mode = #tpu.pipeline_mode<synchronous>, transform_indices = @transform_1, window_bounds = array<i64: 640, 128>}, {pipeline_mode = #tpu.pipeline_mode<synchronous>, transform_indices = @transform_2, window_bounds = array<i64: 1, 128>}, {transform_indices = @transform_3, window_bounds = array<i64: 256, 128>}]} {
    %c0 = arith.constant 0 : index
    %c0_0 = arith.constant 0 : index
    %0 = vector.load %arg1[%c0, %c0_0] : memref<256x640xbf16, #tpu.memory_space<vmem>>, vector<256x640xbf16>
    %c0_1 = arith.constant 0 : index
    %c0_2 = arith.constant 0 : index
    %1 = vector.load %arg2[%c0_1, %c0_2] : memref<640x128xbf16, #tpu.memory_space<vmem>>, vector<640x128xbf16>
    %cst = arith.constant dense<0.000000e+00> : vector<256x128xf32>
    %2 = tpu.matmul %0, %1, %cst {dimension_numbers = #tpu.dot_dimension_numbers<[1], [0], [0], [1], [0, 0, 1, 1], [], []>} : vector<256x640xbf16>, vector<640x128xbf16>, vector<256x128xf32> -> vector<256x128xf32>
    %c0_3 = arith.constant 0 : index
    %c0_4 = arith.constant 0 : index
    %3 = vector.load %arg3[%c0_3, %c0_4] : memref<1x128xf32, #tpu.memory_space<vmem>>, vector<1x128xf32>
    %4 = vector.broadcast %3 : vector<1x128xf32> to vector<256x128xf32>
    %5 = arith.addf %2, %4 : vector<256x128xf32>
    %cst_5 = arith.constant 0.000000e+00 : f32
    %6 = vector.broadcast %cst_5 : f32 to vector<256x128xf32>
    %7 = arith.maximumf %5, %6 : vector<256x128xf32>
    %8 = arith.truncf %7 : vector<256x128xf32> to vector<256x128xbf16>
    %c0_6 = arith.constant 0 : index
    %c0_7 = arith.constant 0 : index
    %9 = vector.load %arg4[%c0_6, %c0_7] : memref<256x128xbf16, #tpu.memory_space<vmem>>, vector<256x128xbf16>
    tpu.vector_store %arg4[%c0_6, %c0_7], %8 {strides = array<i32>} : memref<256x128xbf16, #tpu.memory_space<vmem>>, vector<256x128xbf16>,
    return
  }
  func.func @transform_0(%arg0: i32) -> (i32, i32) {
    %c0_i32 = arith.constant 0 : i32
    %c0_i32_0 = arith.constant 0 : i32
    return %arg0, %c0_i32 : i32, i32
  }
  func.func @transform_1(%arg0: i32) -> (i32, i32) {
    %c0_i32 = arith.constant 0 : i32
    %c0_i32_0 = arith.constant 0 : i32
    %c0_i32_1 = arith.constant 0 : i32
    return %c0_i32, %c0_i32_0 : i32, i32
  }
  func.func @transform_2(%arg0: i32) -> (i32, i32) {
    %c0_i32 = arith.constant 0 : i32
    %c0_i32_0 = arith.constant 0 : i32
    %c0_i32_1 = arith.constant 0 : i32
    return %c0_i32, %c0_i32_0 : i32, i32
  }
  func.func @transform_3(%arg0: i32) -> (i32, i32) {
    %c0_i32 = arith.constant 0 : i32
    %c0_i32_0 = arith.constant 0 : i32
    return %arg0, %c0_i32 : i32, i32
  }
}

module attributes {stable_mosaic.version = 11 : i64} {
  func.func @_conv_bn_relu_kernel(%arg0: i32, %arg1: memref<112x896xbf16, #tpu.memory_space<vmem>>, %arg2: memref<896x128xbf16, #tpu.memory_space<vmem>>, %arg3: memref<1x128xf32, #tpu.memory_space<vmem>>, %arg4: memref<112x128xf32, #tpu.memory_space<vmem>>) attributes {dimension_semantics = [#tpu.dimension_semantics<parallel>], iteration_bounds = array<i64: 1>, scalar_prefetch = 0 : i64, scratch_operands = 0 : i64, tpu.core_type = #tpu.core_type<tc>, window_params = [{transform_indices = @transform_0, window_bounds = array<i64: 112, 896>}, {pipeline_mode = #tpu.pipeline_mode<synchronous>, transform_indices = @transform_1, window_bounds = array<i64: 896, 128>}, {pipeline_mode = #tpu.pipeline_mode<synchronous>, transform_indices = @transform_2, window_bounds = array<i64: 1, 128>}, {transform_indices = @transform_3, window_bounds = array<i64: 112, 128>}]} {
    %c0 = arith.constant 0 : index
    %c0_0 = arith.constant 0 : index
    %0 = vector.load %arg1[%c0, %c0_0] : memref<112x896xbf16, #tpu.memory_space<vmem>>, vector<112x896xbf16>
    %c0_1 = arith.constant 0 : index
    %c0_2 = arith.constant 0 : index
    %1 = vector.load %arg2[%c0_1, %c0_2] : memref<896x128xbf16, #tpu.memory_space<vmem>>, vector<896x128xbf16>
    %cst = arith.constant dense<0.000000e+00> : vector<112x128xf32>
    %2 = tpu.matmul %0, %1, %cst {dimension_numbers = #tpu.dot_dimension_numbers<[1], [0], [0], [1], [0, 0, 1, 1], [], []>} : vector<112x896xbf16>, vector<896x128xbf16>, vector<112x128xf32> -> vector<112x128xf32>
    %c0_3 = arith.constant 0 : index
    %c0_4 = arith.constant 0 : index
    %3 = vector.load %arg3[%c0_3, %c0_4] : memref<1x128xf32, #tpu.memory_space<vmem>>, vector<1x128xf32>
    %4 = vector.broadcast %3 : vector<1x128xf32> to vector<112x128xf32>
    %5 = arith.addf %2, %4 : vector<112x128xf32>
    %cst_5 = arith.constant 0.000000e+00 : f32
    %6 = vector.broadcast %cst_5 : f32 to vector<112x128xf32>
    %7 = arith.maximumf %5, %6 : vector<112x128xf32>
    %c0_6 = arith.constant 0 : index
    %c0_7 = arith.constant 0 : index
    %8 = vector.load %arg4[%c0_6, %c0_7] : memref<112x128xf32, #tpu.memory_space<vmem>>, vector<112x128xf32>
    tpu.vector_store %arg4[%c0_6, %c0_7], %7 {strides = array<i32>} : memref<112x128xf32, #tpu.memory_space<vmem>>, vector<112x128xf32>,
    return
  }
  func.func @transform_0(%arg0: i32) -> (i32, i32) {
    %c0_i32 = arith.constant 0 : i32
    %c0_i32_0 = arith.constant 0 : i32
    return %arg0, %c0_i32 : i32, i32
  }
  func.func @transform_1(%arg0: i32) -> (i32, i32) {
    %c0_i32 = arith.constant 0 : i32
    %c0_i32_0 = arith.constant 0 : i32
    %c0_i32_1 = arith.constant 0 : i32
    return %c0_i32, %c0_i32_0 : i32, i32
  }
  func.func @transform_2(%arg0: i32) -> (i32, i32) {
    %c0_i32 = arith.constant 0 : i32
    %c0_i32_0 = arith.constant 0 : i32
    %c0_i32_1 = arith.constant 0 : i32
    return %c0_i32, %c0_i32_0 : i32, i32
  }
  func.func @transform_3(%arg0: i32) -> (i32, i32) {
    %c0_i32 = arith.constant 0 : i32
    %c0_i32_0 = arith.constant 0 : i32
    return %arg0, %c0_i32 : i32, i32
  }
}

module attributes {stable_mosaic.version = 11 : i64} {
  func.func @_conv_bn_relu_kernel(%arg0: i32, %arg1: memref<112x128xbf16, #tpu.memory_space<vmem>>, %arg2: memref<128x384xbf16, #tpu.memory_space<vmem>>, %arg3: memref<1x384xf32, #tpu.memory_space<vmem>>, %arg4: memref<112x384xf32, #tpu.memory_space<vmem>>) attributes {dimension_semantics = [#tpu.dimension_semantics<parallel>], iteration_bounds = array<i64: 1>, scalar_prefetch = 0 : i64, scratch_operands = 0 : i64, tpu.core_type = #tpu.core_type<tc>, window_params = [{transform_indices = @transform_0, window_bounds = array<i64: 112, 128>}, {pipeline_mode = #tpu.pipeline_mode<synchronous>, transform_indices = @transform_1, window_bounds = array<i64: 128, 384>}, {pipeline_mode = #tpu.pipeline_mode<synchronous>, transform_indices = @transform_2, window_bounds = array<i64: 1, 384>}, {transform_indices = @transform_3, window_bounds = array<i64: 112, 384>}]} {
    %c0 = arith.constant 0 : index
    %c0_0 = arith.constant 0 : index
    %0 = vector.load %arg1[%c0, %c0_0] : memref<112x128xbf16, #tpu.memory_space<vmem>>, vector<112x128xbf16>
    %c0_1 = arith.constant 0 : index
    %c0_2 = arith.constant 0 : index
    %1 = vector.load %arg2[%c0_1, %c0_2] : memref<128x384xbf16, #tpu.memory_space<vmem>>, vector<128x384xbf16>
    %cst = arith.constant dense<0.000000e+00> : vector<112x384xf32>
    %2 = tpu.matmul %0, %1, %cst {dimension_numbers = #tpu.dot_dimension_numbers<[1], [0], [0], [1], [0, 0, 1, 1], [], []>} : vector<112x128xbf16>, vector<128x384xbf16>, vector<112x384xf32> -> vector<112x384xf32>
    %c0_3 = arith.constant 0 : index
    %c0_4 = arith.constant 0 : index
    %3 = vector.load %arg3[%c0_3, %c0_4] : memref<1x384xf32, #tpu.memory_space<vmem>>, vector<1x384xf32>
    %4 = vector.broadcast %3 : vector<1x384xf32> to vector<112x384xf32>
    %5 = arith.addf %2, %4 : vector<112x384xf32>
    %cst_5 = arith.constant 0.000000e+00 : f32
    %6 = vector.broadcast %cst_5 : f32 to vector<112x384xf32>
    %7 = arith.maximumf %5, %6 : vector<112x384xf32>
    %c0_6 = arith.constant 0 : index
    %c0_7 = arith.constant 0 : index
    %8 = vector.load %arg4[%c0_6, %c0_7] : memref<112x384xf32, #tpu.memory_space<vmem>>, vector<112x384xf32>
    tpu.vector_store %arg4[%c0_6, %c0_7], %7 {strides = array<i32>} : memref<112x384xf32, #tpu.memory_space<vmem>>, vector<112x384xf32>,
    return
  }
  func.func @transform_0(%arg0: i32) -> (i32, i32) {
    %c0_i32 = arith.constant 0 : i32
    %c0_i32_0 = arith.constant 0 : i32
    return %arg0, %c0_i32 : i32, i32
  }
  func.func @transform_1(%arg0: i32) -> (i32, i32) {
    %c0_i32 = arith.constant 0 : i32
    %c0_i32_0 = arith.constant 0 : i32
    %c0_i32_1 = arith.constant 0 : i32
    return %c0_i32, %c0_i32_0 : i32, i32
  }
  func.func @transform_2(%arg0: i32) -> (i32, i32) {
    %c0_i32 = arith.constant 0 : i32
    %c0_i32_0 = arith.constant 0 : i32
    %c0_i32_1 = arith.constant 0 : i32
    return %c0_i32, %c0_i32_0 : i32, i32
  }
  func.func @transform_3(%arg0: i32) -> (i32, i32) {
    %c0_i32 = arith.constant 0 : i32
    %c0_i32_0 = arith.constant 0 : i32
    return %arg0, %c0_i32 : i32, i32
  }
}

</mosaic_0001>

<bundles_post_ra>
// kernel: inception_b_forward.9
= control target key start
LH: loop header
LB: loop body
LE: loop exit
PB: predicated region body
PF: predicated region fallthrough
CT: control target
= control target key end

     0   :  { %s951_s0 = inlined_call_operand.vmem [shape: f32[3,2,16,7,4], index: 0, kind: input, shape index: {}, may-alias: {0,1,2}]   ;;  %s952_s1 = inlined_call_operand.vmem [shape: f32[3,2,16,7,4], index: 1, kind: input, shape index: {}, may-alias: {0,1,2}]   ;;  %s953_s2 = inlined_call_operand.vmem [shape: f32[3,2,16,7,4], index: 2, kind: input, shape index: {}, may-alias: {0,1,2}]   ;;  %s954_s3 = inlined_call_operand.vmem [shape: f32[2,7,7,4], index: 3, kind: output, shape index: {}]  }
   0x1   :  { %958 = sst [smem:[#allocation8_spill]] %s954_s3 }
   0x2   :  { %s773_s12 = smov 0   ;;  %s775_s13 = smov 0  }
   0x3   :  { %s777_s14 = smov 0   ;;  %s779_s15 = smov 0  }
   0x4   :  { %s781_s16 = smov 0   ;;  %s783_s17 = smov 0  }
   0x5   :  { %s785_s18 = smov 0   ;;  %s787_s19 = smov 0  }
   0x6   :  { %s789_s20 = smov 0   ;;  %s791_s21 = smov 0  }
   0x7   :  { %s793_s22 = smov 0  }
   0x8 LB: > { %959 = sst [smem:[#allocation5_spill]] %s743_s20  ;;  %s22_s23 = sadd.s32 1, %s743_s20  ;;  %s751_s22 = sphi %s793_s22, %s13_s22   ;;  %s747_s21 = sphi %s791_s21, %s976_s21   ;;  %s743_s20 = sphi %s789_s20, %s967_s20   ;;  %s739_s19 = sphi %s787_s19, %s975_s19   ;;  %s735_s18 = sphi %s785_s18, %s966_s18   ;;  %s731_s17 = sphi %s783_s17, %s974_s17   ;;  %s727_s16 = sphi %s781_s16, %s973_s16   ;;  %s723_s15 = sphi %s779_s15, %s972_s15   ;;  %s719_s14 = sphi %s777_s14, %s971_s14   ;;  %s715_s13 = sphi %s775_s13, %s970_s13   ;;  %s711_s12 = sphi %s773_s12, %s969_s12  }
   0x9   : > { %s25_s24 = sadd.s32 1, %s747_s21  ;;  %p23_p0 = scmp.ge.s32.totalorder %s22_s23, 7 }
   0xa   : > { %s831_s25 = sshll.u32 %s743_s20, 1  ;;  %s36_s26 = sadd.s32 1, %s731_s17 }
   0xb   : > { %p43_p1 = scmp.ne.s32.totalorder %s731_s17, %s727_s16  ;;  %s978_s23 = smov (%p23_p0, %s22_s23), 0 }
   0xc   : > { %960 = sst [smem:[#allocation6_spill]] %s978_s23  ;;  %s980_s24 = smov (!%p23_p0, %s25_s24), %s747_s21 }
   0xd   : > { %s544_s27 = sshll.u32 %s978_s23, 1  ;;  %p44_p2 = scmp.eq.s32.totalorder %s751_s22, 0 }
   0xe   : > { %p27_p3 = scmp.ge.s32.totalorder %s980_s24, 2  ;;  %s32_s28 = ssub.s32 %s831_s25, %s544_s27 }
   0xf   : > { %p844_p4 = por %p44_p2, %p43_p1  ;;  %s60_s30 = sadd.s32 1, %s831_s25 }
  0x10   : > { %s982_s24 = smov (%p27_p3, %s980_s24), 0  ;;  %s62_s4 = sadd.s32 1, %s544_s27 }
  0x11   : > { %962 = sst [smem:[#allocation7_spill]] %s982_s24  ;;  %s68_s5 = sadd.s32 1, %s723_s15 }
  0x12   : > { %s31_s6 = ssub.s32 %s747_s21, %s982_s24  ;;  %s64_s7 = ssub.s32 %s60_s30, %s62_s4 }
  0x13   : > { %s33_s8 = sor.u32 %s32_s28, %s31_s6  ;;  %s65_s9 = sor.u32 %s64_s7, %s31_s6 }
  0x14   : > { %p34_p5 = scmp.eq.s32.totalorder %s33_s8, 0  ;;  %p66_p6 = scmp.eq.s32.totalorder %s65_s9, 0 }
  0x15   : > { %p75_p7 = scmp.ne.s32.totalorder %s723_s15, %s719_s14  ;;  %s92_s10 = sadd.s32 2, %s831_s25 }
  0x16   : > { %s858_s11 = scalar_select %p34_p5, %s731_s17, %s36_s26  }
  0x17   : > { %s861_s23 = scalar_select %p66_p6, %s723_s15, %s68_s5  }
  0x18   : > { %p865_p8 = por %p75_p7, %p44_p2  ;;  %s94_s3 = sadd.s32 2, %s544_s27 }
  0x19   : > { %s96_s24 = ssub.s32 %s92_s10, %s94_s3  ;;  %s100_s30 = sadd.s32 1, %s715_s13 }
  0x1a   : > { %s97_s4 = sor.u32 %s96_s24, %s31_s6  ;;  %p107_p9 = scmp.ne.s32.totalorder %s715_s13, %s711_s12 }
  0x1b   : > { %p98_p10 = scmp.eq.s32.totalorder %s97_s4, 0  ;;  %p550_p12 = scmp.ge.s32.totalorder %s751_s22, 14 }
  0x1c   : > { %p874_p11 = por %p107_p9, %p44_p2 }
  0x1d   : > { %s879_s26 = scalar_select %p98_p10, %s715_s13, %s100_s30  }
  0x1e   : > { %161 = sbr.rel (%p550_p12) target bundleno = 64 (0x40), region = 16 }
  0x25   : > { %164 = sbr.rel (!%p844_p4) target bundleno = 46 (0x2e), region = 20  ;;  %s166_s3 = sand.u32 (%p844_p4), 1, %s731_s17  }
  0x26   : > { %s552_s24 = sshll.u32 (%p844_p4), %s747_s21, 4  ;;  %s570_s27 = smul.u32 (%p844_p4), 24, %s166_s3 }
  0x27   : > { %s171_s5 = sadd.s32 (%p844_p4), %s552_s24, %s831_s25 }
  0x28   : > { %s553_s6 = sshll.u32 (%p844_p4), %s171_s5, 3  ;;  %s168_s10 = scalar_lea.vmem (%p844_p4), [#allocation2], %s570_s27 }
  0x29   : > { %s173_s9 = scalar_lea.vmem (%p844_p4), %s951_s0, %s553_s6 }
  0x2a   : > { %v205_v0 = vld [vmem:[%s173_s9] sm:$0xff] (%p844_p4) }
  0x2b   : > { %v207_v1 = vld [vmem:[%s173_s9 + $0x100] sm:$0xff] (%p844_p4)  ;;  %206 = vst [vmem:[%s168_s10] sm:$0xff] (%p844_p4), %v205_v0 }
  0x2c   : > { %v209_v2 = vld [vmem:[%s173_s9 + $0x200] sm:$0xff]  ;;  %208 = vst [vmem:[%s168_s10 + $0x8] sm:$0xff] %v207_v1 }
  0x2d   : > { %210 = vst [vmem:[%s168_s10 + $0x10] sm:$0xff] %v209_v2 }
  0x2e PF: > { %216 = sbr.rel (!%p865_p8) target bundleno = 55 (0x37), region = 58  ;;  %s218_s29 = sand.u32 (%p865_p8), 1, %s723_s15  }
  0x2f   : > { %s555_s30 = sshll.u32 (%p865_p8), %s747_s21, 4  ;;  %s571_s4 = smul.u32 (%p865_p8), 24, %s218_s29 }
  0x30   : > { %s446_s3 = sadd.s32 (%p865_p8), %s555_s30, %s831_s25 }
  0x31   : > { %s556_s24 = sshll.u32 (%p865_p8), %s446_s3, 3  ;;  %s220_s27 = scalar_lea.vmem (%p865_p8), [#allocation3], %s571_s4 }
  0x32   : > { %s448_s7 = scalar_lea.vmem (%p865_p8), %s952_s1, %s556_s24 }
  0x33   : > { %v557_v3 = vld [vmem:[%s448_s7 + $0x8] sm:$0xff] (%p865_p8) }
  0x34   : > { %v558_v4 = vld [vmem:[%s448_s7 + $0x108] sm:$0xff] (%p865_p8)  ;;  %259 = vst [vmem:[%s220_s27] sm:$0xff] (%p865_p8), %v557_v3 }
  0x35   : > { %v559_v5 = vld [vmem:[%s448_s7 + $0x208] sm:$0xff]  ;;  %261 = vst [vmem:[%s220_s27 + $0x8] sm:$0xff] %v558_v4 }
  0x36   : > { %263 = vst [vmem:[%s220_s27 + $0x10] sm:$0xff] %v559_v5 }
  0x37 PF: > { %269 = sbr.rel (!%p874_p11) target bundleno = 64 (0x40), region = 96  ;;  %s271_s20 = sand.u32 (%p874_p11), 1, %s715_s13  }
  0x38   : > { %s561_s8 = sshll.u32 (%p874_p11), %s747_s21, 4  ;;  %s572_s9 = smul.u32 (%p874_p11), 24, %s271_s20 }
  0x39   : > { %s454_s10 = sadd.s32 (%p874_p11), %s561_s8, %s831_s25 }
  0x3a   : > { %s562_s29 = sshll.u32 (%p874_p11), %s454_s10, 3  ;;  %s273_s4 = scalar_lea.vmem (%p874_p11), [#allocation4], %s572_s9 }
  0x3b   : > { %s456_s24 = scalar_lea.vmem (%p874_p11), %s953_s2, %s562_s29 }
  0x3c   : > { %v563_v6 = vld [vmem:[%s456_s24 + $0x10] sm:$0xff] (%p874_p11) }
  0x3d   : > { %v564_v7 = vld [vmem:[%s456_s24 + $0x110] sm:$0xff] (%p874_p11)  ;;  %312 = vst [vmem:[%s273_s4] sm:$0xff] (%p874_p11), %v563_v6 }
  0x3e   : > { %v565_v8 = vld [vmem:[%s456_s24 + $0x210] sm:$0xff]  ;;  %314 = vst [vmem:[%s273_s4 + $0x8] sm:$0xff] %v564_v7 }
  0x3f   : > { %316 = vst [vmem:[%s273_s4 + $0x10] sm:$0xff] %v565_v8 }
  0x40 PF: > { %p566_p13 = scmp.ge.s32.totalorder %s751_s22, 1  ;;  %p321_p0 = scmp.lt.s32.totalorder %s751_s22, 15 }
  0x42   : > { %p322_p1 = pnand %p566_p13, %p321_p0 }
  0x43   : > { %s328_s25 = sand.u32 (!%p322_p1), 1, %s727_s16   ;;  %s335_s28 = sand.u32 (!%p322_p1), 1, %s719_s14   ;;  %vm406_vm0 = vcmask (!%p322_p1), 30720  }
  0x44   : > { %325 = sbr.rel (%p322_p1) target bundleno = 84 (0x54), region = 134  ;;  %s342_s6 = sand.u32 (!%p322_p1), 1, %s711_s12  }
  0x45   : > { %s573_s5 = smul.u32 (!%p322_p1), 24, %s328_s25  ;;  %p381_p2 = scmp.lt.s32.totalorder (!%p322_p1), %s739_s19, 1 }
  0x46   : > { %s574_s7 = smul.u32 (!%p322_p1), 24, %s335_s28  ;;  %p383_p3 = scmp.lt.s32.totalorder (!%p322_p1), %s735_s18, 6 }
  0x47   : > { %s575_s27 = smul.u32 (!%p322_p1), 24, %s342_s6  ;;  %s330_s20 = scalar_lea.vmem (!%p322_p1), [#allocation2], %s573_s5 }
  0x48   : > { %v389_v9 = vld [vmem:[%s330_s20] sm:$0x7f] (!%p322_p1)  ;;  %v390_v10 = vld [vmem:[%s330_s20 + $0x8] sm:$0x7f] (!%p322_p1)  ;;  %v391_v11 = vld [vmem:[%s330_s20 + $0x10] sm:$0x7f] (!%p322_p1) }
  0x49   : > { %s337_s8 = scalar_lea.vmem (!%p322_p1), [#allocation3], %s574_s7  ;;  %s344_s14 = scalar_lea.vmem (!%p322_p1), [#allocation4], %s575_s27 }
  0x4a   : > { %v392_v12 = vld [vmem:[%s337_s8] sm:$0x7f] (!%p322_p1)  ;;  %v393_v13 = vld [vmem:[%s337_s8 + $0x8] sm:$0x7f] (!%p322_p1)  ;;  %v394_v14 = vld [vmem:[%s337_s8 + $0x10] sm:$0x7f] (!%p322_p1) }
  0x4b   : > { %s984_s19 = smov (!%p381_p2, %s739_s19), 1  ;;  %v395_v15 = vmax.f32 %v389_v9, %v392_v12  ;;  %s986_s18 = smov (!%p383_p3, %s735_s18), 6  ;;  %v396_v16 = vmax.f32 %v390_v10, %v393_v13  ;;  %v397_v17 = vmax.f32 %v391_v11, %v394_v14  ;;  %v398_v18 = vld [vmem:[%s344_s14] sm:$0x7f]  ;;  %v399_v19 = vld [vmem:[%s344_s14 + $0x8] sm:$0x7f] }
  0x4c   : > { %s576_s12 = smul.u32 7, %s984_s19  ;;  %v400_v20 = vld [vmem:[%s344_s14 + $0x10] sm:$0x7f]  ;;  %s965_s30 = sld [smem:[#allocation8_spill]] }
  0x4d   : > { %v401_v21 = vmax.f32 %v395_v15, %v398_v18  ;;  %v402_v22 = vmax.f32 %v396_v16, %v399_v19  ;;  %v403_v23 = vmax.f32 %v397_v17, %v400_v20 }
  0x4e   : > { %s386_s16 = sadd.s32 %s576_s12, %s986_s18 }
  0x4f   : > { %s567_s9 = sshll.u32 %s386_s16, 3  ;;  %v404_v24 = vmax.f32 %v401_v21, %v402_v22 }
  0x51   : > { %v405_v25 = vmax.f32 %v404_v24, %v403_v23 }
  0x52   : > { %s388_s3 = scalar_lea.vmem %s965_s30, %s567_s9 }
  0x53   : > { %407 = vst.msk [vmem:[%s388_s3] sm:$0x7f] %vm406_vm0, %v405_v25 }
  0x54 PF: > { %s13_s22 = sadd.s32 1, %s751_s22   ;;  %s966_s18 = sld [smem:[#allocation5_spill]] }
  0x55   : > { %p10_p4 = scmp.ge.s32.totalorder %s13_s22, 16   ;;  %s967_s20 = sld [smem:[#allocation6_spill]] }
  0x56   : > { %s968_s24 = sld [smem:[#allocation7_spill]]  ;;  %s969_s12 = smov %s715_s13 }
  0x57   : > { %s970_s13 = smov %s879_s26  ;;  %s971_s14 = smov %s723_s15 }
  0x58   : > { %s972_s15 = smov %s861_s23  ;;  %s973_s16 = smov %s731_s17 }
  0x59   : > { %s974_s17 = smov %s858_s11  ;;  %s975_s19 = smov %s747_s21 }
  0x5a   :  { %12 = sbr.rel (!%p10_p4) target bundleno = 8 (0x8), region = 197 }
  0x5c   : > { %s976_s21 = smov %s968_s24 }

// kernel: inception_b_forward.6
= control target key start
LH: loop header
LB: loop body
LE: loop exit
PB: predicated region body
PF: predicated region fallthrough
CT: control target
= control target key end

     0   :  { %s1126_s12 = smov 0   ;;  %s1247_s0 = inlined_call_operand.vmem [shape: bf16[512,128], index: 0, kind: input, shape index: {}]   ;;  %s1248_s1 = inlined_call_operand.vmem [shape: bf16[128,128], index: 1, kind: input, shape index: {}]   ;;  %s1249_s2 = inlined_call_operand.vmem [shape: f32[1,128], index: 2, kind: input, shape index: {}]   ;;  %s1250_s3 = inlined_call_operand.vmem [shape: bf16[512,128], index: 3, kind: output, shape index: {}]  }
   0x1 LB: > { %s783_s13 = sadd.s32 4294967295, %s1104_s12   ;;  %p787_p0 = scmp.ge.s32.totalorder %s1104_s12, 1  ;;  %s1104_s12 = sphi %s1126_s12, %s13_s12  }
   0x2   : > { %p138_p1 = scmp.lt.s32.totalorder %s1104_s12, 3 }
   0x4   : > { %p139_p2 = pnand %p787_p0, %p138_p1 }
   0x5   : > { %v1074_v0 = vld [vmem:[%s1248_s1] sm:$0xff] (!%p139_p2)   ;;  %s788_s16 = sshll.u32 (!%p139_p2), %s783_s13, 5  ;;  %v1075_v1 = vld [vmem:[%s1248_s1 + $0x8] sm:$0xff] (!%p139_p2)   ;;  %v1076_v2 = vld [vmem:[%s1248_s1 + $0x10] sm:$0xff] (!%p139_p2)  }
   0x6   : > { %142 = sbr.rel (%p139_p2) target bundleno = 284 (0x11c), region = 32  ;;  %p163_p3 = scmp.lt.s32.totalorder (!%p139_p2), %s788_s16, 63  ;;  %1002 = vmatprep.subr.bf16.mxu0 (!%p139_p2), %v1074_v0  ;;  %1050 = vmatprep.subr.bf16.mxu1 (!%p139_p2), %v1074_v0  ;;  %v1077_v3 = vld [vmem:[%s1248_s1 + $0x18] sm:$0xff] (!%p139_p2)   ;;  %v1078_v6 = vld [vmem:[%s1248_s1 + $0x20] sm:$0xff] (!%p139_p2)   ;;  %v1079_v7 = vld [vmem:[%s1248_s1 + $0x28] sm:$0xff] (!%p139_p2)  }
   0x7   : > { %1003 = vmatpush3.bf16.msra.mxu0 (!%p139_p2), %v1074_v0  ;;  %1058 = vmatpush3.bf16.msra.mxu1 (!%p139_p2), %v1074_v0  ;;  %v1080_v8 = vld [vmem:[%s1248_s1 + $0x30] sm:$0xff] (!%p139_p2)   ;;  %v1081_v9 = vld [vmem:[%s1248_s1 + $0x38] sm:$0xff] (!%p139_p2)   ;;  %v1187_v24 = vld [vmem:[%s1249_s2] ss:$0 sm:$0xff] (!%p139_p2) }
   0x8   : > { %1004 = vmatprep.subr.bf16.mxu0 (!%p139_p2), %v1075_v1  ;;  %1051 = vmatprep.subr.bf16.mxu1 (!%p139_p2), %v1075_v1 }
   0xb   : > { %1005 = vmatpush3.bf16.msra.mxu0 (!%p139_p2), %v1075_v1  ;;  %1059 = vmatpush3.bf16.msra.mxu1 (!%p139_p2), %v1075_v1 }
   0xc   : > { %1006 = vmatprep.subr.bf16.mxu0 (!%p139_p2), %v1076_v2  ;;  %1052 = vmatprep.subr.bf16.mxu1 (!%p139_p2), %v1076_v2 }
   0xd   : > { %s1252_s16 = smov (!%p163_p3, %s788_s16), 63 }
   0xe   : > { %s789_s21 = sshll.u32 %s1252_s16, 2 }
   0xf   : > { %s1151_s24 = scalar_lea.vmem %s1247_s0, %s789_s21  ;;  %1007 = vmatpush3.bf16.msra.mxu0 %v1076_v2  ;;  %1060 = vmatpush3.bf16.msra.mxu1 %v1076_v2  ;;  %s1202_s13 = scalar_lea.vmem %s1250_s3, %s789_s21 }
  0x10   : > { %v1082_v4 = vld [vmem:[%s1151_s24] sm:$0xff]   ;;  %1008 = vmatprep.subr.bf16.mxu0 %v1077_v3  ;;  %1053 = vmatprep.subr.bf16.mxu1 %v1077_v3  ;;  %v1084_v10 = vld [vmem:[%s1151_s24 + $0x8] sm:$0xff]   ;;  %v1086_v12 = vld [vmem:[%s1151_s24 + $0x10] sm:$0xff]  }
  0x11   : > { %v1083_v5 = vld [vmem:[%s1151_s24 + $0x40] sm:$0xff]   ;;  %1018 = vmatprep.mubr.bf16.mxu0 %v1082_v4  ;;  %v1085_v11 = vld [vmem:[%s1151_s24 + $0x48] sm:$0xff]   ;;  %v1087_v13 = vld [vmem:[%s1151_s24 + $0x50] sm:$0xff]  }
  0x12   : > { %1034 = vmatprep.mubr.bf16.mxu1 %v1083_v5  ;;  %v1088_v14 = vld [vmem:[%s1151_s24 + $0x18] sm:$0xff]   ;;  %v1090_v16 = vld [vmem:[%s1151_s24 + $0x20] sm:$0xff]   ;;  %v1092_v18 = vld [vmem:[%s1151_s24 + $0x28] sm:$0xff]  }
  0x13   : > { %1009 = vmatpush3.bf16.msra.mxu0 %v1077_v3  ;;  %1061 = vmatpush3.bf16.msra.mxu1 %v1077_v3  ;;  %v1089_v15 = vld [vmem:[%s1151_s24 + $0x58] sm:$0xff]   ;;  %v1091_v17 = vld [vmem:[%s1151_s24 + $0x60] sm:$0xff]   ;;  %v1093_v19 = vld [vmem:[%s1151_s24 + $0x68] sm:$0xff]  }
  0x14   : > { %1010 = vmatprep.subr.bf16.mxu0 %v1078_v6  ;;  %1054 = vmatprep.subr.bf16.mxu1 %v1078_v6  ;;  %v1094_v20 = vld [vmem:[%s1151_s24 + $0x30] sm:$0xff]   ;;  %v1096_v22 = vld [vmem:[%s1151_s24 + $0x38] sm:$0xff]  }
  0x15   : > { %v1095_v21 = vld [vmem:[%s1151_s24 + $0x70] sm:$0xff]   ;;  %v1097_v23 = vld [vmem:[%s1151_s24 + $0x78] sm:$0xff]  }
  0x17   : > { %1011 = vmatpush3.bf16.msra.mxu0 %v1078_v6  ;;  %1062 = vmatpush3.bf16.msra.mxu1 %v1078_v6 }
  0x18   : > { %1012 = vmatprep.subr.bf16.mxu0 %v1079_v7  ;;  %1055 = vmatprep.subr.bf16.mxu1 %v1079_v7 }
  0x1b   : > { %1013 = vmatpush3.bf16.msra.mxu0 %v1079_v7  ;;  %1063 = vmatpush3.bf16.msra.mxu1 %v1079_v7 }
  0x1c   : > { %1014 = vmatprep.subr.bf16.mxu0 %v1080_v8  ;;  %1056 = vmatprep.subr.bf16.mxu1 %v1080_v8 }
  0x1f   : > { %1015 = vmatpush3.bf16.msra.mxu0 %v1080_v8  ;;  %1064 = vmatpush3.bf16.msra.mxu1 %v1080_v8 }
  0x20   : > { %1016 = vmatprep.subr.bf16.mxu0 %v1081_v9  ;;  %1057 = vmatprep.subr.bf16.mxu1 %v1081_v9 }
  0x23   : > { %1017 = vmatpush3.bf16.msra.mxu0 %v1081_v9  ;;  %1065 = vmatpush3.bf16.msra.mxu1 %v1081_v9 }
  0x26   : > { %1019 = vmatmul.mubr.bf16.vlgmr.msra.gmra.mrb[0].mxu0 %v1084_v10  ;;  %1035 = vmatmul.mubr.bf16.vlgmr.msra.gmra.mrb[0].mxu1 %v1085_v11 }
  0x27   : > { %1022 = vmatprep.mubr.bf16.mxu0 %v1086_v12  ;;  %1038 = vmatprep.mubr.bf16.mxu1 %v1087_v13 }
  0x2e   : > { %1023 = vmatmul.mubr.bf16.gmra.mrb[4].mxu0 %v1088_v14  ;;  %1039 = vmatmul.mubr.bf16.gmra.mrb[4].mxu1 %v1089_v15 }
  0x2f   : > { %1026 = vmatprep.mubr.bf16.mxu0 %v1090_v16  ;;  %1042 = vmatprep.mubr.bf16.mxu1 %v1091_v17 }
  0x36   : > { %1027 = vmatmul.mubr.bf16.gmra.mrb[8].mxu0 %v1092_v18  ;;  %1043 = vmatmul.mubr.bf16.gmra.mrb[8].mxu1 %v1093_v19 }
  0x37   : > { %1030 = vmatprep.mubr.bf16.mxu0 %v1094_v20  ;;  %1046 = vmatprep.mubr.bf16.mxu1 %v1095_v21 }
  0x3e   : > { %1031 = vmatmul.mubr.bf16.gmra.mrb[12].mxu0 %v1096_v22  ;;  %1047 = vmatmul.mubr.bf16.gmra.mrb[12].mxu1 %v1097_v23 }
  0xf9   : > { %v1020_v25 = vpop.f32.mrb[0].mxu0  ;;  %v1036_v26 = vpop.f32.mrb[0].mxu1 }
  0xfa   : > { %v417_v27 = vadd.f32 %v1020_v25, %v1187_v24  ;;  %v481_v28 = vadd.f32 %v1036_v26, %v1187_v24  ;;  %v408_v29 = vpop.f32.mrb[1].mxu0  ;;  %v472_v30 = vpop.f32.mrb[1].mxu1 }
  0xfb   : > { %v409_v31 = vadd.f32 %v1187_v24, %v408_v29  ;;  %v473_v32 = vadd.f32 %v1187_v24, %v472_v30  ;;  %v1021_v33 = vpop.f32.mrb[2].mxu0  ;;  %v1037_v34 = vpop.f32.mrb[2].mxu1 }
  0xfc   : > { %v420_v35 = vadd.f32 %v1021_v33, %v1187_v24  ;;  %v484_v36 = vadd.f32 %v1037_v34, %v1187_v24  ;;  %v411_v37 = vpop.f32.mrb[3].mxu0  ;;  %v475_v38 = vpop.f32.mrb[3].mxu1  ;;  %v537_v41 = vmax.f32 %v417_v27, 0.0  ;;  %v553_v42 = vmax.f32 %v481_v28, 0.0 }
  0xfd   : > { %v412_v39 = vadd.f32 %v1187_v24, %v411_v37  ;;  %v476_v40 = vadd.f32 %v1187_v24, %v475_v38  ;;  %v535_v45 = vmax.f32 %v409_v31, 0.0  ;;  %v551_v46 = vmax.f32 %v473_v32, 0.0 }
  0xfe   : > { %v538_v43 = vmax.f32 %v420_v35, 0.0  ;;  %v554_v44 = vmax.f32 %v484_v36, 0.0 }
  0xff   : > { %v536_v47 = vmax.f32 %v412_v39, 0.0  ;;  %v552_v48 = vmax.f32 %v476_v40, 0.0 }
 0x100   : > { %v891_v49 = vpack.c.bf16 %v538_v43, %v537_v41  ;;  %v931_v50 = vpack.c.bf16 %v554_v44, %v553_v42 }
 0x101   : > { %v886_v51 = vpack.c.bf16 %v536_v47, %v535_v45  ;;  %v926_v52 = vpack.c.bf16 %v552_v48, %v551_v46  ;;  %v1024_v53 = vpop.f32.mrb[4].mxu0  ;;  %v1040_v54 = vpop.f32.mrb[4].mxu1 }
 0x102   : > { %963 = vst [vmem:[%s1202_s13 + $0x8] sm:$0xff] %v891_v49   ;;  %971 = vst [vmem:[%s1202_s13 + $0x48] sm:$0xff] %v931_v50   ;;  %v433_v55 = vadd.f32 %v1024_v53, %v1187_v24  ;;  %v497_v56 = vadd.f32 %v1040_v54, %v1187_v24  ;;  %v424_v57 = vpop.f32.mrb[5].mxu0  ;;  %v488_v58 = vpop.f32.mrb[5].mxu1 }
 0x103   : > { %887 = vst [vmem:[%s1202_s13] sm:$0xff] %v886_v51   ;;  %970 = vst [vmem:[%s1202_s13 + $0x40] sm:$0xff] %v926_v52   ;;  %v425_v59 = vadd.f32 %v1187_v24, %v424_v57  ;;  %v489_v60 = vadd.f32 %v1187_v24, %v488_v58  ;;  %v1025_v61 = vpop.f32.mrb[6].mxu0  ;;  %v1041_v62 = vpop.f32.mrb[6].mxu1 }
 0x104   : > { %v436_v63 = vadd.f32 %v1025_v61, %v1187_v24  ;;  %v500_v0 = vadd.f32 %v1041_v62, %v1187_v24  ;;  %v427_v1 = vpop.f32.mrb[7].mxu0  ;;  %v491_v2 = vpop.f32.mrb[7].mxu1  ;;  %v541_v5 = vmax.f32 %v433_v55, 0.0  ;;  %v557_v6 = vmax.f32 %v497_v56, 0.0 }
 0x105   : > { %v428_v3 = vadd.f32 %v1187_v24, %v427_v1  ;;  %v492_v4 = vadd.f32 %v1187_v24, %v491_v2  ;;  %v539_v9 = vmax.f32 %v425_v59, 0.0  ;;  %v555_v10 = vmax.f32 %v489_v60, 0.0 }
 0x106   : > { %v542_v7 = vmax.f32 %v436_v63, 0.0  ;;  %v558_v8 = vmax.f32 %v500_v0, 0.0 }
 0x107   : > { %v540_v11 = vmax.f32 %v428_v3, 0.0  ;;  %v556_v12 = vmax.f32 %v492_v4, 0.0 }
 0x108   : > { %v901_v13 = vpack.c.bf16 %v542_v7, %v541_v5  ;;  %v941_v14 = vpack.c.bf16 %v558_v8, %v557_v6 }
 0x109   : > { %v896_v15 = vpack.c.bf16 %v540_v11, %v539_v9  ;;  %v936_v16 = vpack.c.bf16 %v556_v12, %v555_v10  ;;  %v1028_v17 = vpop.f32.mrb[8].mxu0  ;;  %v1044_v18 = vpop.f32.mrb[8].mxu1 }
 0x10a   : > { %965 = vst [vmem:[%s1202_s13 + $0x18] sm:$0xff] %v901_v13   ;;  %973 = vst [vmem:[%s1202_s13 + $0x58] sm:$0xff] %v941_v14   ;;  %v449_v19 = vadd.f32 %v1028_v17, %v1187_v24  ;;  %v513_v20 = vadd.f32 %v1044_v18, %v1187_v24  ;;  %v440_v21 = vpop.f32.mrb[9].mxu0  ;;  %v504_v22 = vpop.f32.mrb[9].mxu1 }
 0x10b   : > { %964 = vst [vmem:[%s1202_s13 + $0x10] sm:$0xff] %v896_v15   ;;  %972 = vst [vmem:[%s1202_s13 + $0x50] sm:$0xff] %v936_v16   ;;  %v441_v23 = vadd.f32 %v1187_v24, %v440_v21  ;;  %v505_v25 = vadd.f32 %v1187_v24, %v504_v22  ;;  %v1029_v26 = vpop.f32.mrb[10].mxu0  ;;  %v1045_v27 = vpop.f32.mrb[10].mxu1 }
 0x10c   : > { %v452_v28 = vadd.f32 %v1029_v26, %v1187_v24  ;;  %v516_v29 = vadd.f32 %v1045_v27, %v1187_v24  ;;  %v443_v30 = vpop.f32.mrb[11].mxu0  ;;  %v507_v31 = vpop.f32.mrb[11].mxu1  ;;  %v545_v34 = vmax.f32 %v449_v19, 0.0  ;;  %v561_v35 = vmax.f32 %v513_v20, 0.0 }
 0x10d   : > { %v444_v32 = vadd.f32 %v1187_v24, %v443_v30  ;;  %v508_v33 = vadd.f32 %v1187_v24, %v507_v31  ;;  %v543_v38 = vmax.f32 %v441_v23, 0.0  ;;  %v559_v39 = vmax.f32 %v505_v25, 0.0 }
 0x10e   : > { %v546_v36 = vmax.f32 %v452_v28, 0.0  ;;  %v562_v37 = vmax.f32 %v516_v29, 0.0 }
 0x10f   : > { %v544_v40 = vmax.f32 %v444_v32, 0.0  ;;  %v560_v41 = vmax.f32 %v508_v33, 0.0 }
 0x110   : > { %v911_v42 = vpack.c.bf16 %v546_v36, %v545_v34  ;;  %v951_v43 = vpack.c.bf16 %v562_v37, %v561_v35 }
 0x111   : > { %v906_v44 = vpack.c.bf16 %v544_v40, %v543_v38  ;;  %v946_v45 = vpack.c.bf16 %v560_v41, %v559_v39  ;;  %v1032_v46 = vpop.f32.mrb[12].mxu0  ;;  %v1048_v47 = vpop.f32.mrb[12].mxu1 }
 0x112   : > { %967 = vst [vmem:[%s1202_s13 + $0x28] sm:$0xff] %v911_v42   ;;  %975 = vst [vmem:[%s1202_s13 + $0x68] sm:$0xff] %v951_v43   ;;  %v465_v48 = vadd.f32 %v1032_v46, %v1187_v24  ;;  %v529_v49 = vadd.f32 %v1048_v47, %v1187_v24  ;;  %v456_v50 = vpop.f32.mrb[13].mxu0  ;;  %v520_v51 = vpop.f32.mrb[13].mxu1 }
 0x113   : > { %966 = vst [vmem:[%s1202_s13 + $0x20] sm:$0xff] %v906_v44   ;;  %974 = vst [vmem:[%s1202_s13 + $0x60] sm:$0xff] %v946_v45   ;;  %v457_v52 = vadd.f32 %v1187_v24, %v456_v50  ;;  %v521_v53 = vadd.f32 %v1187_v24, %v520_v51  ;;  %v1033_v54 = vpop.f32.mrb[14].mxu0  ;;  %v1049_v55 = vpop.f32.mrb[14].mxu1 }
 0x114   : > { %v468_v56 = vadd.f32 %v1033_v54, %v1187_v24  ;;  %v532_v57 = vadd.f32 %v1049_v55, %v1187_v24  ;;  %v459_v58 = vpop.f32.mrb[15].mxu0  ;;  %v523_v59 = vpop.f32.mrb[15].mxu1  ;;  %v549_v62 = vmax.f32 %v465_v48, 0.0  ;;  %v565_v63 = vmax.f32 %v529_v49, 0.0 }
 0x115   : > { %v460_v60 = vadd.f32 %v1187_v24, %v459_v58  ;;  %v524_v61 = vadd.f32 %v1187_v24, %v523_v59  ;;  %v547_v2 = vmax.f32 %v457_v52, 0.0  ;;  %v563_v3 = vmax.f32 %v521_v53, 0.0 }
 0x116   : > { %v550_v0 = vmax.f32 %v468_v56, 0.0  ;;  %v566_v1 = vmax.f32 %v532_v57, 0.0 }
 0x117   : > { %v548_v4 = vmax.f32 %v460_v60, 0.0  ;;  %v564_v5 = vmax.f32 %v524_v61, 0.0 }
 0x118   : > { %v921_v6 = vpack.c.bf16 %v550_v0, %v549_v62  ;;  %v961_v7 = vpack.c.bf16 %v566_v1, %v565_v63 }
 0x119   : > { %v916_v8 = vpack.c.bf16 %v548_v4, %v547_v2  ;;  %v956_v9 = vpack.c.bf16 %v564_v5, %v563_v3 }
 0x11a   : > { %969 = vst [vmem:[%s1202_s13 + $0x38] sm:$0xff] %v921_v6   ;;  %977 = vst [vmem:[%s1202_s13 + $0x78] sm:$0xff] %v961_v7  }
 0x11b   : > { %968 = vst [vmem:[%s1202_s13 + $0x30] sm:$0xff] %v916_v8   ;;  %976 = vst [vmem:[%s1202_s13 + $0x70] sm:$0xff] %v956_v9  }
 0x11c PF: > { %s13_s12 = sadd.s32 1, %s1104_s12  }
 0x11d   : > { %p10_p4 = scmp.ge.s32.totalorder %s13_s12, 4  }
 0x11f   :  { %12 = sbr.rel (!%p10_p4) target bundleno = 1 (0x1), region = 62 }

// kernel: inception_b_forward.7
= control target key start
LH: loop header
LB: loop body
LE: loop exit
PB: predicated region body
PF: predicated region fallthrough
CT: control target
= control target key end

     0   :  { %s2540_s12 = smov 0   ;;  %s2929_s0 = inlined_call_operand.vmem [shape: bf16[512,640], index: 0, kind: input, shape index: {}]   ;;  %s2930_s1 = inlined_call_operand.vmem [shape: bf16[640,128], index: 1, kind: input, shape index: {}]   ;;  %s2931_s2 = inlined_call_operand.vmem [shape: f32[1,128], index: 2, kind: input, shape index: {}]   ;;  %s2932_s3 = inlined_call_operand.vmem [shape: bf16[512,128], index: 3, kind: output, shape index: {}]  }
   0x1 LB: > { %s1748_s13 = sadd.s32 4294967295, %s2518_s12   ;;  %p1752_p0 = scmp.ge.s32.totalorder %s2518_s12, 1  ;;  %s2518_s12 = sphi %s2540_s12, %s13_s12  }
   0x2   : > { %p139_p1 = scmp.lt.s32.totalorder %s2518_s12, 3 }
   0x4   : > { %p140_p2 = pnand %p1752_p0, %p139_p1 }
   0x5   : > { %v2360_v0 = vld [vmem:[%s2930_s1 + $0x40] sm:$0xff] (!%p140_p2)   ;;  %s1753_s16 = sshll.u32 (!%p140_p2), %s1748_s13, 5  ;;  %v2362_v2 = vld [vmem:[%s2930_s1 + $0x48] sm:$0xff] (!%p140_p2)   ;;  %v2364_v4 = vld [vmem:[%s2930_s1 + $0x50] sm:$0xff] (!%p140_p2)  }
   0x6   : > { %143 = sbr.rel (%p140_p2) target bundleno = 416 (0x1a0), region = 32  ;;  %v2361_v1 = vld [vmem:[%s2930_s1] sm:$0xff] (!%p140_p2)   ;;  %2039 = vmatprep.subr.bf16.mxu0 (!%p140_p2), %v2360_v0  ;;  %2335 = vmatprep.subr.bf16.mxu1 (!%p140_p2), %v2360_v0  ;;  %p165_p3 = scmp.lt.s32.totalorder (!%p140_p2), %s1753_s16, 63  ;;  %v2363_v3 = vld [vmem:[%s2930_s1 + $0x8] sm:$0xff] (!%p140_p2)   ;;  %v2365_v5 = vld [vmem:[%s2930_s1 + $0x10] sm:$0xff] (!%p140_p2)  }
   0x7   : > { %2040 = vmatpush3.bf16.msra.mxu0 (!%p140_p2), %v2361_v1  ;;  %2343 = vmatpush3.bf16.msra.mxu1 (!%p140_p2), %v2361_v1  ;;  %v2366_v6 = vld [vmem:[%s2930_s1 + $0x58] sm:$0xff] (!%p140_p2)   ;;  %v2368_v8 = vld [vmem:[%s2930_s1 + $0x60] sm:$0xff] (!%p140_p2)   ;;  %v2370_v10 = vld [vmem:[%s2930_s1 + $0x68] sm:$0xff] (!%p140_p2)  }
   0x8   : > { %2041 = vmatprep.subr.bf16.mxu0 (!%p140_p2), %v2362_v2  ;;  %2336 = vmatprep.subr.bf16.mxu1 (!%p140_p2), %v2362_v2  ;;  %v2367_v7 = vld [vmem:[%s2930_s1 + $0x18] sm:$0xff] (!%p140_p2)   ;;  %v2369_v9 = vld [vmem:[%s2930_s1 + $0x20] sm:$0xff] (!%p140_p2)   ;;  %v2371_v13 = vld [vmem:[%s2930_s1 + $0x28] sm:$0xff] (!%p140_p2)  }
   0x9   : > { %v2372_v14 = vld [vmem:[%s2930_s1 + $0x70] sm:$0xff] (!%p140_p2)   ;;  %v2374_v16 = vld [vmem:[%s2930_s1 + $0x78] sm:$0xff] (!%p140_p2)   ;;  %v2382_v18 = vld [vmem:[%s2930_s1 + $0xc0] sm:$0xff] (!%p140_p2)  }
   0xa   : > { %v2373_v15 = vld [vmem:[%s2930_s1 + $0x30] sm:$0xff] (!%p140_p2)   ;;  %v2375_v17 = vld [vmem:[%s2930_s1 + $0x38] sm:$0xff] (!%p140_p2)   ;;  %v2385_v19 = vld [vmem:[%s2930_s1 + $0x100] sm:$0xff] (!%p140_p2)  }
   0xb   : > { %2042 = vmatpush3.bf16.msra.mxu0 (!%p140_p2), %v2363_v3  ;;  %2344 = vmatpush3.bf16.msra.mxu1 (!%p140_p2), %v2363_v3  ;;  %v2383_v22 = vld [vmem:[%s2930_s1 + $0x80] sm:$0xff] (!%p140_p2)   ;;  %v2384_v23 = vld [vmem:[%s2930_s1 + $0xc8] sm:$0xff] (!%p140_p2)   ;;  %v2393_v29 = vld [vmem:[%s2930_s1 + $0xd0] sm:$0xff] (!%p140_p2)  }
   0xc   : > { %2043 = vmatprep.subr.bf16.mxu0 (!%p140_p2), %v2364_v4  ;;  %2337 = vmatprep.subr.bf16.mxu1 (!%p140_p2), %v2364_v4  ;;  %v2404_v26 = vld [vmem:[%s2930_s1 + $0x108] sm:$0xff] (!%p140_p2)   ;;  %v2394_v31 = vld [vmem:[%s2930_s1 + $0x90] sm:$0xff] (!%p140_p2)   ;;  %v2395_v33 = vld [vmem:[%s2930_s1 + $0xd8] sm:$0xff] (!%p140_p2)  }
   0xd   : > { %s2934_s16 = smov (!%p165_p3, %s1753_s16), 63  ;;  %v2386_v27 = vld [vmem:[%s2930_s1 + $0x88] sm:$0xff]   ;;  %v2396_v35 = vld [vmem:[%s2930_s1 + $0x98] sm:$0xff]   ;;  %v2403_v36 = vld [vmem:[%s2930_s1 + $0xe0] sm:$0xff]  }
   0xe   : > { %s2351_s29 = smul.u32 20, %s2934_s16  ;;  %v2417_v38 = vld [vmem:[%s2930_s1 + $0x110] sm:$0xff]   ;;  %v2405_v40 = vld [vmem:[%s2930_s1 + $0xa0] sm:$0xff]   ;;  %v2406_v41 = vld [vmem:[%s2930_s1 + $0xe8] sm:$0xff]   ;;  %s1756_s27 = sshll.u32 %s2934_s16, 2 }
   0xf   : > { %2044 = vmatpush3.bf16.msra.mxu0 %v2365_v5  ;;  %2345 = vmatpush3.bf16.msra.mxu1 %v2365_v5  ;;  %v2407_v44 = vld [vmem:[%s2930_s1 + $0xa8] sm:$0xff]   ;;  %v2431_v45 = vld [vmem:[%s2930_s1 + $0x118] sm:$0xff]   ;;  %v2414_v48 = vld [vmem:[%s2930_s1 + $0xf0] sm:$0xff]   ;;  %s2852_s30 = scalar_lea.vmem %s2932_s3, %s1756_s27 }
  0x10   : > { %2045 = vmatprep.subr.bf16.mxu0 %v2366_v6  ;;  %2338 = vmatprep.subr.bf16.mxu1 %v2366_v6  ;;  %s2581_s9 = scalar_lea.vmem %s2929_s0, %s2351_s29  ;;  %v2415_v49 = vld [vmem:[%s2930_s1 + $0xb0] sm:$0xff]   ;;  %v2416_v50 = vld [vmem:[%s2930_s1 + $0xf8] sm:$0xff]   ;;  %v2438_v52 = vld [vmem:[%s2930_s1 + $0x120] sm:$0xff]  }
  0x11   : > { %v2378_v11 = vld [vmem:[%s2581_s9 + $0x4] ss:$20 sps:$4 sm:$0xff]   ;;  %v2376_v20 = vld [vmem:[%s2581_s9] ss:$20 sps:$4 sm:$0xff]   ;;  %v2391_v28 = vld [vmem:[%s2581_s9 + $0x28] ss:$20 sps:$4 sm:$0xff]  }
  0x12   : > { %v2381_v12 = vld [vmem:[%s2581_s9 + $0x1e4] ss:$20 sps:$4 sm:$0xff]   ;;  %1049 = vmatprep.mubr.bf16.mxu0 %v2378_v11  ;;  %v2379_v21 = vld [vmem:[%s2581_s9 + $0x1e0] ss:$20 sps:$4 sm:$0xff]   ;;  %v2392_v30 = vld [vmem:[%s2581_s9 + $0x208] ss:$20 sps:$4 sm:$0xff]  }
  0x13   : > { %2046 = vmatpush3.bf16.msra.mxu0 %v2367_v7  ;;  %2346 = vmatpush3.bf16.msra.mxu1 %v2367_v7  ;;  %v2387_v24 = vld [vmem:[%s2581_s9 + $0x2c] ss:$20 sps:$4 sm:$0xff]   ;;  %v2397_v32 = vld [vmem:[%s2581_s9 + $0x54] ss:$20 sps:$4 sm:$0xff]   ;;  %v2401_v37 = vld [vmem:[%s2581_s9 + $0x50] ss:$20 sps:$4 sm:$0xff]  }
  0x14   : > { %2047 = vmatprep.subr.bf16.mxu0 %v2368_v8  ;;  %2339 = vmatprep.subr.bf16.mxu1 %v2368_v8  ;;  %v2389_v25 = vld [vmem:[%s2581_s9 + $0x20c] ss:$20 sps:$4 sm:$0xff]   ;;  %v2399_v34 = vld [vmem:[%s2581_s9 + $0x234] ss:$20 sps:$4 sm:$0xff]   ;;  %v2402_v39 = vld [vmem:[%s2581_s9 + $0x230] ss:$20 sps:$4 sm:$0xff]  }
  0x15   : > { %1145 = vmatprep.mubr.bf16.mxu1 %v2381_v12  ;;  %v2408_v42 = vld [vmem:[%s2581_s9 + $0x7c] ss:$20 sps:$4 sm:$0xff]   ;;  %v2412_v46 = vld [vmem:[%s2581_s9 + $0x78] ss:$20 sps:$4 sm:$0xff]   ;;  %v2424_v56 = vld [vmem:[%s2581_s9 + $0xa0] ss:$20 sps:$4 sm:$0xff]  }
  0x16   : > { %v2410_v43 = vld [vmem:[%s2581_s9 + $0x25c] ss:$20 sps:$4 sm:$0xff]   ;;  %v2413_v47 = vld [vmem:[%s2581_s9 + $0x258] ss:$20 sps:$4 sm:$0xff]   ;;  %v2427_v59 = vld [vmem:[%s2581_s9 + $0x34] ss:$20 sps:$4 sm:$0xff]  }
  0x17   : > { %2048 = vmatpush3.bf16.msra.mxu0 %v2369_v9  ;;  %2347 = vmatpush3.bf16.msra.mxu1 %v2369_v9  ;;  %v2419_v51 = vld [vmem:[%s2581_s9 + $0xa4] ss:$20 sps:$4 sm:$0xff]   ;;  %v2423_v53 = vld [vmem:[%s2581_s9 + $0xc] ss:$20 sps:$4 sm:$0xff]   ;;  %v2421_v55 = vld [vmem:[%s2581_s9 + $0x8] ss:$20 sps:$4 sm:$0xff]  }
  0x18   : > { %2049 = vmatprep.subr.bf16.mxu0 %v2370_v10  ;;  %2340 = vmatprep.subr.bf16.mxu1 %v2370_v10  ;;  %v2418_v54 = vld [vmem:[%s2930_s1 + $0xb8] sm:$0xff]   ;;  %v2451_v57 = vld [vmem:[%s2930_s1 + $0x128] sm:$0xff]   ;;  %v2458_v60 = vld [vmem:[%s2930_s1 + $0x130] sm:$0xff]  }
  0x19   : > { %v2425_v58 = vld [vmem:[%s2581_s9 + $0xcc] ss:$20 sps:$4 sm:$0xff]   ;;  %v2429_v61 = vld [vmem:[%s2581_s9 + $0xc8] ss:$20 sps:$4 sm:$0xff]   ;;  %v2430_v62 = vld [vmem:[%s2581_s9 + $0x30] ss:$20 sps:$4 sm:$0xff]  }
  0x1a   : > { %v2432_v63 = vld [vmem:[%s2581_s9 + $0xf4] ss:$20 sps:$4 sm:$0xff]   ;;  %v2434_v0 = vld [vmem:[%s2581_s9 + $0x5c] ss:$20 sps:$4 sm:$0xff]   ;;  %v2437_v3 = vld [vmem:[%s2581_s9 + $0x58] ss:$20 sps:$4 sm:$0xff]  }
  0x1b   : > { %2050 = vmatpush3.bf16.msra.mxu0 %v2371_v13  ;;  %2348 = vmatpush3.bf16.msra.mxu1 %v2371_v13  ;;  %v2471_v1 = vld [vmem:[%s2930_s1 + $0x138] sm:$0xff]   ;;  %v2436_v2 = vld [vmem:[%s2581_s9 + $0xf0] ss:$20 sps:$4 sm:$0xff]   ;;  %v2444_v7 = vld [vmem:[%s2581_s9 + $0x80] ss:$20 sps:$4 sm:$0xff]  }
  0x1c   : > { %2051 = vmatprep.subr.bf16.mxu0 %v2372_v14  ;;  %2341 = vmatprep.subr.bf16.mxu1 %v2372_v14  ;;  %v2439_v4 = vld [vmem:[%s2581_s9 + $0x11c] ss:$20 sps:$4 sm:$0xff]   ;;  %v2441_v5 = vld [vmem:[%s2581_s9 + $0x84] ss:$20 sps:$4 sm:$0xff]   ;;  %v2447_v9 = vld [vmem:[%s2581_s9 + $0xac] ss:$20 sps:$4 sm:$0xff]  }
  0x1d   : > { %v2443_v6 = vld [vmem:[%s2581_s9 + $0x118] ss:$20 sps:$4 sm:$0xff]   ;;  %v2449_v10 = vld [vmem:[%s2581_s9 + $0x140] ss:$20 sps:$4 sm:$0xff]   ;;  %v2450_v11 = vld [vmem:[%s2581_s9 + $0xa8] ss:$20 sps:$4 sm:$0xff]  }
  0x1e   : > { %v2445_v8 = vld [vmem:[%s2581_s9 + $0x144] ss:$20 sps:$4 sm:$0xff]   ;;  %v2452_v12 = vld [vmem:[%s2581_s9 + $0x16c] ss:$20 sps:$4 sm:$0xff]   ;;  %v2454_v13 = vld [vmem:[%s2581_s9 + $0xd4] ss:$20 sps:$4 sm:$0xff]  }
  0x1f   : > { %2052 = vmatpush3.bf16.msra.mxu0 %v2373_v15  ;;  %2349 = vmatpush3.bf16.msra.mxu1 %v2373_v15  ;;  %v2456_v14 = vld [vmem:[%s2581_s9 + $0x168] ss:$20 sps:$4 sm:$0xff]   ;;  %v2457_v15 = vld [vmem:[%s2581_s9 + $0xd0] ss:$20 sps:$4 sm:$0xff]  }
  0x20   : > { %2053 = vmatprep.subr.bf16.mxu0 %v2374_v16  ;;  %2342 = vmatprep.subr.bf16.mxu1 %v2374_v16  ;;  %v2459_v16 = vld [vmem:[%s2581_s9 + $0x194] ss:$20 sps:$4 sm:$0xff]  }
  0x23   : > { %2054 = vmatpush3.bf16.msra.mxu0 %v2375_v17  ;;  %2350 = vmatpush3.bf16.msra.mxu1 %v2375_v17  ;;  %v2461_v17 = vld [vmem:[%s2581_s9 + $0xfc] ss:$20 sps:$4 sm:$0xff]  }
  0x24   : > { %2151 = vmatprep.subr.bf16.mxu1 %v2382_v18  ;;  %2287 = vmatprep.subr.bf16.mxu0 %v2385_v19  ;;  %v2463_v18 = vld [vmem:[%s2581_s9 + $0x190] ss:$20 sps:$4 sm:$0xff]  }
  0x26   : > { %1050 = vmatmul.mubr.bf16.vlgmr.msra.gmra.mrb[0].mxu0 %v2376_v20  ;;  %1146 = vmatmul.mubr.bf16.vlgmr.msra.gmra.mrb[0].mxu1 %v2379_v21  ;;  %v2465_v20 = vld [vmem:[%s2581_s9 + $0x1bc] ss:$20 sps:$4 sm:$0xff]   ;;  %v2467_v21 = vld [vmem:[%s2581_s9 + $0x124] ss:$20 sps:$4 sm:$0xff]  }
  0x27   : > { %2152 = vmatpush3.bf16.msra.mxu1 %v2383_v22  ;;  %2288 = vmatpush3.bf16.msra.mxu0 %v2385_v19  ;;  %v2464_v19 = vld [vmem:[%s2581_s9 + $0xf8] ss:$20 sps:$4 sm:$0xff]  }
  0x28   : > { %2153 = vmatprep.subr.bf16.mxu1 %v2384_v23  ;;  %1057 = vmatprep.mubr.bf16.mxu0 %v2387_v24  ;;  %v2469_v22 = vld [vmem:[%s2581_s9 + $0x1b8] ss:$20 sps:$4 sm:$0xff]   ;;  %v2470_v23 = vld [vmem:[%s2581_s9 + $0x120] ss:$20 sps:$4 sm:$0xff]  }
  0x29   : > { %1153 = vmatprep.mubr.bf16.mxu1 %v2389_v25  ;;  %2289 = vmatprep.subr.bf16.mxu0 %v2404_v26  ;;  %v2472_v24 = vld [vmem:[%s2581_s9 + $0x14c] ss:$20 sps:$4 sm:$0xff]   ;;  %v2474_v25 = vld [vmem:[%s2581_s9 + $0x10] ss:$20 sps:$4 sm:$0xff]  }
  0x2b   : > { %2154 = vmatpush3.bf16.msra.mxu1 %v2386_v27  ;;  %2290 = vmatpush3.bf16.msra.mxu0 %v2404_v26  ;;  %v2475_v26 = vld [vmem:[%s2581_s9 + $0x148] ss:$20 sps:$4 sm:$0xff]   ;;  %v2476_v27 = vld [vmem:[%s2581_s9 + $0x38] ss:$20 sps:$4 sm:$0xff]  }
  0x2c   : > { %2155 = vmatprep.subr.bf16.mxu1 %v2393_v29  ;;  %2291 = vmatprep.subr.bf16.mxu0 %v2417_v38  ;;  %v2479_v29 = vld [vmem:[%s2581_s9 + $0x60] ss:$20 sps:$4 sm:$0xff]  }
  0x2e   : > { %1058 = vmatmul.mubr.bf16.gmra.mrb[4].mxu0 %v2391_v28  ;;  %1154 = vmatmul.mubr.bf16.gmra.mrb[4].mxu1 %v2392_v30  ;;  %v2477_v28 = vld [vmem:[%s2581_s9 + $0x174] ss:$20 sps:$4 sm:$0xff]   ;;  %v2480_v30 = vld [vmem:[%s2581_s9 + $0x170] ss:$20 sps:$4 sm:$0xff]  }
  0x2f   : > { %2156 = vmatpush3.bf16.msra.mxu1 %v2394_v31  ;;  %1065 = vmatprep.mubr.bf16.mxu0 %v2397_v32  ;;  %v2481_v31 = vld [vmem:[%s2581_s9 + $0x88] ss:$20 sps:$4 sm:$0xff]  }
  0x30   : > { %2157 = vmatprep.subr.bf16.mxu1 %v2395_v33  ;;  %1161 = vmatprep.mubr.bf16.mxu1 %v2399_v34  ;;  %v2482_v32 = vld [vmem:[%s2581_s9 + $0x19c] ss:$20 sps:$4 sm:$0xff]   ;;  %v2485_v34 = vld [vmem:[%s2581_s9 + $0x198] ss:$20 sps:$4 sm:$0xff]  }
  0x31   : > { %2292 = vmatpush3.bf16.msra.mxu0 %v2417_v38  ;;  %v2484_v33 = vld [vmem:[%s2581_s9 + $0xb0] ss:$20 sps:$4 sm:$0xff]   ;;  %v2490_v38 = vld [vmem:[%s2581_s9 + $0x1c0] ss:$20 sps:$4 sm:$0xff]  }
  0x32   : > { %2293 = vmatprep.subr.bf16.mxu0 %v2431_v45 }
  0x33   : > { %2158 = vmatpush3.bf16.msra.mxu1 %v2396_v35  ;;  %v2486_v35 = vld [vmem:[%s2581_s9 + $0xd8] ss:$20 sps:$4 sm:$0xff]  }
  0x34   : > { %2159 = vmatprep.subr.bf16.mxu1 %v2403_v36  ;;  %v2487_v36 = vld [vmem:[%s2581_s9 + $0x1c4] ss:$20 sps:$4 sm:$0xff]  }
  0x35   : > { %2294 = vmatpush3.bf16.msra.mxu0 %v2431_v45  ;;  %v2499_v45 = vld [vmem:[%s2581_s9 + $0x1a0] ss:$20 sps:$4 sm:$0xff]  }
  0x36   : > { %1066 = vmatmul.mubr.bf16.gmra.mrb[8].mxu0 %v2401_v37  ;;  %1162 = vmatmul.mubr.bf16.gmra.mrb[8].mxu1 %v2402_v39  ;;  %v2489_v37 = vld [vmem:[%s2581_s9 + $0x100] ss:$20 sps:$4 sm:$0xff]   ;;  %v2491_v39 = vld [vmem:[%s2581_s9 + $0x128] ss:$20 sps:$4 sm:$0xff]  }
  0x37   : > { %2160 = vmatpush3.bf16.msra.mxu1 %v2405_v40  ;;  %1073 = vmatprep.mubr.bf16.mxu0 %v2408_v42  ;;  %v2492_v40 = vld [vmem:[%s2581_s9 + $0x1ec] ss:$20 sps:$4 sm:$0xff]   ;;  %v2495_v42 = vld [vmem:[%s2581_s9 + $0x1e8] ss:$20 sps:$4 sm:$0xff]  }
  0x38   : > { %2161 = vmatprep.subr.bf16.mxu1 %v2406_v41  ;;  %1169 = vmatprep.mubr.bf16.mxu1 %v2410_v43  ;;  %v2494_v41 = vld [vmem:[%s2581_s9 + $0x150] ss:$20 sps:$4 sm:$0xff]   ;;  %v2496_v43 = vld [vmem:[%s2581_s9 + $0x178] ss:$20 sps:$4 sm:$0xff]  }
  0x39   : > { %2295 = vmatprep.subr.bf16.mxu0 %v2438_v52 }
  0x3a   : > { %2296 = vmatpush3.bf16.msra.mxu0 %v2438_v52  ;;  %v2507_v52 = vld [vmem:[%s2581_s9 + $0x264] ss:$20 sps:$4 sm:$0xff]  }
  0x3b   : > { %2162 = vmatpush3.bf16.msra.mxu1 %v2407_v44  ;;  %2297 = vmatprep.subr.bf16.mxu0 %v2451_v57  ;;  %v2497_v44 = vld [vmem:[%s2581_s9 + $0x214] ss:$20 sps:$4 sm:$0xff]  }
  0x3c   : > { %2163 = vmatprep.subr.bf16.mxu1 %v2414_v48  ;;  %v2502_v48 = vld [vmem:[%s2581_s9 + $0x23c] ss:$20 sps:$4 sm:$0xff]  }
  0x3e   : > { %1074 = vmatmul.mubr.bf16.gmra.mrb[12].mxu0 %v2412_v46  ;;  %1170 = vmatmul.mubr.bf16.gmra.mrb[12].mxu1 %v2413_v47  ;;  %v2500_v46 = vld [vmem:[%s2581_s9 + $0x210] ss:$20 sps:$4 sm:$0xff]   ;;  %v2501_v47 = vld [vmem:[%s2581_s9 + $0x1c8] ss:$20 sps:$4 sm:$0xff]  }
  0x3f   : > { %2164 = vmatpush3.bf16.msra.mxu1 %v2415_v49  ;;  %1081 = vmatprep.mubr.bf16.mxu0 %v2419_v51  ;;  %v2504_v49 = vld [vmem:[%s2581_s9 + $0x1f0] ss:$20 sps:$4 sm:$0xff]   ;;  %v2506_v51 = vld [vmem:[%s2581_s9 + $0x218] ss:$20 sps:$4 sm:$0xff]  }
  0x40   : > { %2165 = vmatprep.subr.bf16.mxu1 %v2416_v50  ;;  %1210 = vmatprep.mubr.bf16.mxu1 %v2423_v53  ;;  %v2505_v50 = vld [vmem:[%s2581_s9 + $0x238] ss:$20 sps:$4 sm:$0xff]   ;;  %v2509_v53 = vld [vmem:[%s2581_s9 + $0x240] ss:$20 sps:$4 sm:$0xff]  }
  0x41   : > { %2298 = vmatpush3.bf16.msra.mxu0 %v2451_v57 }
  0x42   : > { %2299 = vmatprep.subr.bf16.mxu0 %v2458_v60 }
  0x43   : > { %2166 = vmatpush3.bf16.msra.mxu1 %v2418_v54  ;;  %v2510_v54 = vld [vmem:[%s2581_s9 + $0x260] ss:$20 sps:$4 sm:$0xff]  }
  0x45   : > { %2300 = vmatpush3.bf16.msra.mxu0 %v2458_v60 }
  0x46   : > { %1082 = vmatmul.mubr.bf16.gmra.mrb[16].mxu0 %v2424_v56  ;;  %1211 = vmatmul.mubr.bf16.vlgmr.msra.gmra.mrb[16].mxu1 %v2421_v55  ;;  %v2511_v55 = vld [vmem:[%s2581_s9 + $0x268] ss:$20 sps:$4 sm:$0xff]  }
  0x47   : > { %1089 = vmatprep.mubr.bf16.mxu0 %v2425_v58  ;;  %1218 = vmatprep.mubr.bf16.mxu1 %v2427_v59 }
  0x48   : > { %2301 = vmatprep.subr.bf16.mxu0 %v2471_v1 }
  0x49   : > { %2302 = vmatpush3.bf16.msra.mxu0 %v2471_v1 }
  0x4e   : > { %1090 = vmatmul.mubr.bf16.gmra.mrb[20].mxu0 %v2429_v61  ;;  %1219 = vmatmul.mubr.bf16.gmra.mrb[20].mxu1 %v2430_v62 }
  0x4f   : > { %1097 = vmatprep.mubr.bf16.mxu0 %v2432_v63  ;;  %1226 = vmatprep.mubr.bf16.mxu1 %v2434_v0 }
  0x56   : > { %1098 = vmatmul.mubr.bf16.gmra.mrb[24].mxu0 %v2436_v2  ;;  %1227 = vmatmul.mubr.bf16.gmra.mrb[24].mxu1 %v2437_v3 }
  0x57   : > { %1105 = vmatprep.mubr.bf16.mxu0 %v2439_v4  ;;  %1234 = vmatprep.mubr.bf16.mxu1 %v2441_v5 }
  0x5e   : > { %1106 = vmatmul.mubr.bf16.gmra.mrb[28].mxu0 %v2443_v6  ;;  %1235 = vmatmul.mubr.bf16.gmra.mrb[28].mxu1 %v2444_v7 }
  0x5f   : > { %1113 = vmatprep.mubr.bf16.mxu0 %v2445_v8  ;;  %1242 = vmatprep.mubr.bf16.mxu1 %v2447_v9 }
  0x66   : > { %1114 = vmatmul.mubr.bf16.gmra.mrb[32].mxu0 %v2449_v10  ;;  %1243 = vmatmul.mubr.bf16.gmra.mrb[32].mxu1 %v2450_v11 }
  0x67   : > { %1121 = vmatprep.mubr.bf16.mxu0 %v2452_v12  ;;  %1250 = vmatprep.mubr.bf16.mxu1 %v2454_v13 }
  0x6e   : > { %1122 = vmatmul.mubr.bf16.gmra.mrb[36].mxu0 %v2456_v14  ;;  %1251 = vmatmul.mubr.bf16.gmra.mrb[36].mxu1 %v2457_v15 }
  0x6f   : > { %1129 = vmatprep.mubr.bf16.mxu0 %v2459_v16  ;;  %1258 = vmatprep.mubr.bf16.mxu1 %v2461_v17 }
  0x76   : > { %1130 = vmatmul.mubr.bf16.gmra.mrb[40].mxu0 %v2463_v18  ;;  %1259 = vmatmul.mubr.bf16.gmra.mrb[40].mxu1 %v2464_v19 }
  0x77   : > { %1137 = vmatprep.mubr.bf16.mxu0 %v2465_v20  ;;  %1266 = vmatprep.mubr.bf16.mxu1 %v2467_v21 }
  0x7e   : > { %1138 = vmatmul.mubr.bf16.gmra.mrb[44].mxu0 %v2469_v22  ;;  %1267 = vmatmul.mubr.bf16.gmra.mrb[44].mxu1 %v2470_v23 }
  0x7f   : > { %1274 = vmatprep.mubr.bf16.mxu1 %v2472_v24  ;;  %2303 = vmatprep.mubr.bf16.mxu0 %v2474_v25 }
  0x86   : > { %1275 = vmatmul.mubr.bf16.gmra.mrb[48].mxu1 %v2475_v26  ;;  %2304 = vmatmul.mubr.bf16.vlgmr.msra.gmra.mrb[48].mxu0 %v2476_v27 }
  0x87   : > { %1282 = vmatprep.mubr.bf16.mxu1 %v2477_v28  ;;  %2307 = vmatprep.mubr.bf16.mxu0 %v2479_v29 }
  0x8e   : > { %1283 = vmatmul.mubr.bf16.gmra.mrb[52].mxu1 %v2480_v30  ;;  %2308 = vmatmul.mubr.bf16.gmra.mrb[52].mxu0 %v2481_v31 }
  0x8f   : > { %1290 = vmatprep.mubr.bf16.mxu1 %v2482_v32  ;;  %2311 = vmatprep.mubr.bf16.mxu0 %v2484_v33 }
  0x96   : > { %1291 = vmatmul.mubr.bf16.gmra.mrb[56].mxu1 %v2485_v34  ;;  %2312 = vmatmul.mubr.bf16.gmra.mrb[56].mxu0 %v2486_v35 }
  0x97   : > { %1298 = vmatprep.mubr.bf16.mxu1 %v2487_v36  ;;  %2315 = vmatprep.mubr.bf16.mxu0 %v2489_v37 }
  0x9e   : > { %1299 = vmatmul.mubr.bf16.gmra.mrb[60].mxu1 %v2490_v38  ;;  %2316 = vmatmul.mubr.bf16.gmra.mrb[60].mxu0 %v2491_v39 }
  0x9f   : > { %1306 = vmatprep.mubr.bf16.mxu1 %v2492_v40  ;;  %2319 = vmatprep.mubr.bf16.mxu0 %v2494_v41 }
  0xa6   : > { %1307 = vmatmul.mubr.bf16.gmra.mrb[64].mxu1 %v2495_v42  ;;  %2320 = vmatmul.mubr.bf16.gmra.mrb[64].mxu0 %v2496_v43  ;;  %v2775_v42 = vld [vmem:[%s2931_s2] ss:$0 sm:$0xff] }
  0xa7   : > { %1314 = vmatprep.mubr.bf16.mxu1 %v2497_v44  ;;  %2323 = vmatprep.mubr.bf16.mxu0 %v2499_v45 }
  0xae   : > { %1315 = vmatmul.mubr.bf16.gmra.mrb[68].mxu1 %v2500_v46  ;;  %2324 = vmatmul.mubr.bf16.gmra.mrb[68].mxu0 %v2501_v47 }
  0xaf   : > { %1322 = vmatprep.mubr.bf16.mxu1 %v2502_v48  ;;  %2327 = vmatprep.mubr.bf16.mxu0 %v2504_v49 }
  0xb6   : > { %1323 = vmatmul.mubr.bf16.gmra.mrb[72].mxu1 %v2505_v50  ;;  %2328 = vmatmul.mubr.bf16.gmra.mrb[72].mxu0 %v2506_v51 }
  0xb7   : > { %1330 = vmatprep.mubr.bf16.mxu1 %v2507_v52  ;;  %2331 = vmatprep.mubr.bf16.mxu0 %v2509_v53 }
  0xbe   : > { %1331 = vmatmul.mubr.bf16.gmra.mrb[76].mxu1 %v2510_v54  ;;  %2332 = vmatmul.mubr.bf16.gmra.mrb[76].mxu0 %v2511_v55 }
  0xf9   : > { %v2127_v56 = vpop.f32.mrb[0].mxu1  ;;  %v2055_v57 = vpop.f32.mrb[0].mxu0 }
  0xfa   : > { %v2128_v58 = vpop.f32.mrb[1].mxu1  ;;  %v2056_v59 = vpop.f32.mrb[1].mxu0 }
  0xfb   : > { %v2756_v60 = vadd.f32 %v2128_v58, %v2127_v56  ;;  %v2130_v61 = vpop.f32.mrb[2].mxu1  ;;  %v2057_v62 = vadd.f32 %v2056_v59, %v2055_v57  ;;  %v2058_v63 = vpop.f32.mrb[2].mxu0 }
  0xfc   : > { %v2131_v0 = vpop.f32.mrb[3].mxu1  ;;  %v2059_v1 = vpop.f32.mrb[3].mxu0 }
  0xfd   : > { %v2758_v2 = vadd.f32 %v2131_v0, %v2130_v61  ;;  %v2060_v3 = vadd.f32 %v2059_v1, %v2058_v63  ;;  %v1052_v45 = vadd.f32 %v2057_v62, %v2775_v42 }
  0xff   : > { %v1055_v52 = vadd.f32 %v2060_v3, %v2775_v42 }
 0x101   : > { %v2133_v4 = vpop.f32.mrb[4].mxu1  ;;  %v2061_v5 = vpop.f32.mrb[4].mxu0 }
 0x102   : > { %v2134_v6 = vpop.f32.mrb[5].mxu1  ;;  %v2062_v7 = vpop.f32.mrb[5].mxu0 }
 0x103   : > { %v2760_v8 = vadd.f32 %v2134_v6, %v2133_v4  ;;  %v2136_v9 = vpop.f32.mrb[6].mxu1  ;;  %v2063_v10 = vadd.f32 %v2062_v7, %v2061_v5  ;;  %v2064_v11 = vpop.f32.mrb[6].mxu0 }
 0x104   : > { %v2137_v12 = vpop.f32.mrb[7].mxu1  ;;  %v2065_v13 = vpop.f32.mrb[7].mxu0 }
 0x105   : > { %v2762_v14 = vadd.f32 %v2137_v12, %v2136_v9  ;;  %v2066_v15 = vadd.f32 %v2065_v13, %v2064_v11  ;;  %v1060_v62 = vadd.f32 %v2063_v10, %v2775_v42 }
 0x107   : > { %v1063_v3 = vadd.f32 %v2066_v15, %v2775_v42 }
 0x109   : > { %v2139_v16 = vpop.f32.mrb[8].mxu1  ;;  %v2067_v17 = vpop.f32.mrb[8].mxu0 }
 0x10a   : > { %v2140_v18 = vpop.f32.mrb[9].mxu1  ;;  %v2068_v19 = vpop.f32.mrb[9].mxu0 }
 0x10b   : > { %v2764_v20 = vadd.f32 %v2140_v18, %v2139_v16  ;;  %v2142_v21 = vpop.f32.mrb[10].mxu1  ;;  %v2069_v22 = vadd.f32 %v2068_v19, %v2067_v17  ;;  %v2070_v23 = vpop.f32.mrb[10].mxu0 }
 0x10c   : > { %v2143_v24 = vpop.f32.mrb[11].mxu1  ;;  %v2071_v25 = vpop.f32.mrb[11].mxu0 }
 0x10d   : > { %v2766_v26 = vadd.f32 %v2143_v24, %v2142_v21  ;;  %v2072_v27 = vadd.f32 %v2071_v25, %v2070_v23  ;;  %v1068_v10 = vadd.f32 %v2069_v22, %v2775_v42 }
 0x10f   : > { %v1071_v15 = vadd.f32 %v2072_v27, %v2775_v42 }
 0x111   : > { %v2145_v28 = vpop.f32.mrb[12].mxu1  ;;  %v2073_v29 = vpop.f32.mrb[12].mxu0 }
 0x112   : > { %v2146_v30 = vpop.f32.mrb[13].mxu1  ;;  %v2074_v31 = vpop.f32.mrb[13].mxu0 }
 0x113   : > { %v2768_v32 = vadd.f32 %v2146_v30, %v2145_v28  ;;  %v2148_v33 = vpop.f32.mrb[14].mxu1  ;;  %v2075_v34 = vadd.f32 %v2074_v31, %v2073_v29  ;;  %v2076_v35 = vpop.f32.mrb[14].mxu0 }
 0x114   : > { %v2149_v36 = vpop.f32.mrb[15].mxu1  ;;  %v2077_v37 = vpop.f32.mrb[15].mxu0 }
 0x115   : > { %v2770_v38 = vadd.f32 %v2149_v36, %v2148_v33  ;;  %v2078_v39 = vadd.f32 %v2077_v37, %v2076_v35  ;;  %v1076_v22 = vadd.f32 %v2075_v34, %v2775_v42 }
 0x117   : > { %v1079_v27 = vadd.f32 %v2078_v39, %v2775_v42 }
 0x119   : > { %v2167_v40 = vpop.f32.mrb[16].mxu1  ;;  %v2079_v41 = vpop.f32.mrb[16].mxu0 }
 0x11a   : > { %v2168_v43 = vpop.f32.mrb[17].mxu1  ;;  %v2080_v44 = vpop.f32.mrb[17].mxu0 }
 0x11b   : > { %v2169_v46 = vadd.f32 %v2168_v43, %v2167_v40  ;;  %v2170_v47 = vpop.f32.mrb[18].mxu1  ;;  %v2081_v48 = vadd.f32 %v2080_v44, %v2079_v41  ;;  %v2082_v49 = vpop.f32.mrb[18].mxu0 }
 0x11c   : > { %v2171_v50 = vpop.f32.mrb[19].mxu1  ;;  %v2083_v51 = vpop.f32.mrb[19].mxu0 }
 0x11d   : > { %v2172_v53 = vadd.f32 %v2171_v50, %v2170_v47  ;;  %v2084_v54 = vadd.f32 %v2083_v51, %v2082_v49  ;;  %v2779_v55 = vadd.f32 %v2169_v46, %v1052_v45  ;;  %v1084_v34 = vadd.f32 %v2081_v48, %v2775_v42 }
 0x11f   : > { %v2781_v56 = vadd.f32 %v2172_v53, %v1055_v52  ;;  %v1087_v39 = vadd.f32 %v2084_v54, %v2775_v42 }
 0x121   : > { %v2173_v57 = vpop.f32.mrb[20].mxu1  ;;  %v2085_v58 = vpop.f32.mrb[20].mxu0 }
 0x122   : > { %v2174_v59 = vpop.f32.mrb[21].mxu1  ;;  %v2086_v61 = vpop.f32.mrb[21].mxu0 }
 0x123   : > { %v2175_v63 = vadd.f32 %v2174_v59, %v2173_v57  ;;  %v2176_v0 = vpop.f32.mrb[22].mxu1  ;;  %v2087_v1 = vadd.f32 %v2086_v61, %v2085_v58  ;;  %v2088_v4 = vpop.f32.mrb[22].mxu0 }
 0x124   : > { %v2177_v5 = vpop.f32.mrb[23].mxu1  ;;  %v2089_v6 = vpop.f32.mrb[23].mxu0 }
 0x125   : > { %v2178_v7 = vadd.f32 %v2177_v5, %v2176_v0  ;;  %v2090_v9 = vadd.f32 %v2089_v6, %v2088_v4  ;;  %v2785_v11 = vadd.f32 %v2175_v63, %v1060_v62  ;;  %v1092_v48 = vadd.f32 %v2087_v1, %v2775_v42 }
 0x127   : > { %v2787_v12 = vadd.f32 %v2178_v7, %v1063_v3 }
 0x129   : > { %v2179_v13 = vpop.f32.mrb[24].mxu1  ;;  %v2091_v16 = vpop.f32.mrb[24].mxu0 }
 0x12a   : > { %v2180_v17 = vpop.f32.mrb[25].mxu1  ;;  %v2092_v18 = vpop.f32.mrb[25].mxu0 }
 0x12b   : > { %v2181_v19 = vadd.f32 %v2180_v17, %v2179_v13  ;;  %v2182_v21 = vpop.f32.mrb[26].mxu1  ;;  %v2093_v23 = vadd.f32 %v2092_v18, %v2091_v16  ;;  %v2094_v24 = vpop.f32.mrb[26].mxu0 }
 0x12c   : > { %v2183_v25 = vpop.f32.mrb[27].mxu1  ;;  %v2095_v28 = vpop.f32.mrb[27].mxu0 }
 0x12d   : > { %v2184_v29 = vadd.f32 %v2183_v25, %v2182_v21  ;;  %v2096_v30 = vadd.f32 %v2095_v28, %v2094_v24  ;;  %v2791_v31 = vadd.f32 %v2181_v19, %v1068_v10 }
 0x12f   : > { %v2793_v33 = vadd.f32 %v2184_v29, %v1071_v15  ;;  %v1095_v15 = vadd.f32 %v2090_v9, %v2775_v42 }
 0x131   : > { %v2185_v35 = vpop.f32.mrb[28].mxu1  ;;  %v2097_v36 = vpop.f32.mrb[28].mxu0 }
 0x132   : > { %v2186_v37 = vpop.f32.mrb[29].mxu1  ;;  %v2098_v40 = vpop.f32.mrb[29].mxu0 }
 0x133   : > { %v2187_v41 = vadd.f32 %v2186_v37, %v2185_v35  ;;  %v2188_v43 = vpop.f32.mrb[30].mxu1  ;;  %v2099_v44 = vadd.f32 %v2098_v40, %v2097_v36  ;;  %v2100_v45 = vpop.f32.mrb[30].mxu0 }
 0x134   : > { %v2189_v46 = vpop.f32.mrb[31].mxu1  ;;  %v2101_v47 = vpop.f32.mrb[31].mxu0 }
 0x135   : > { %v2190_v49 = vadd.f32 %v2189_v46, %v2188_v43  ;;  %v2102_v50 = vadd.f32 %v2101_v47, %v2100_v45  ;;  %v2797_v51 = vadd.f32 %v2187_v41, %v1076_v22  ;;  %v1100_v43 = vadd.f32 %v2093_v23, %v2775_v42 }
 0x137   : > { %v2799_v52 = vadd.f32 %v2190_v49, %v1079_v27 }
 0x139   : > { %v2191_v53 = vpop.f32.mrb[32].mxu1  ;;  %v2103_v57 = vpop.f32.mrb[32].mxu0 }
 0x13a   : > { %v2192_v58 = vpop.f32.mrb[33].mxu1  ;;  %v2104_v59 = vpop.f32.mrb[33].mxu0 }
 0x13b   : > { %v2193_v61 = vadd.f32 %v2192_v58, %v2191_v53  ;;  %v2194_v62 = vpop.f32.mrb[34].mxu1  ;;  %v2105_v63 = vadd.f32 %v2104_v59, %v2103_v57  ;;  %v2106_v0 = vpop.f32.mrb[34].mxu0  ;;  %v1103_v53 = vadd.f32 %v2096_v30, %v2775_v42 }
 0x13c   : > { %v2195_v4 = vpop.f32.mrb[35].mxu1  ;;  %v2107_v5 = vpop.f32.mrb[35].mxu0 }
 0x13d   : > { %v2196_v6 = vadd.f32 %v2195_v4, %v2194_v62  ;;  %v2803_v3 = vadd.f32 %v2107_v5, %v2106_v0  ;;  %v2805_v7 = vadd.f32 %v2193_v61, %v1084_v34  ;;  %v1108_v4 = vadd.f32 %v2099_v44, %v2775_v42 }
 0x13f   : > { %v2807_v13 = vadd.f32 %v2196_v6, %v1087_v39 }
 0x141   : > { %v2197_v16 = vpop.f32.mrb[36].mxu1  ;;  %v2109_v17 = vpop.f32.mrb[36].mxu0 }
 0x142   : > { %v2198_v18 = vpop.f32.mrb[37].mxu1  ;;  %v2110_v10 = vpop.f32.mrb[37].mxu0 }
 0x143   : > { %v2199_v19 = vadd.f32 %v2198_v18, %v2197_v16  ;;  %v2200_v21 = vpop.f32.mrb[38].mxu1  ;;  %v2810_v24 = vadd.f32 %v2110_v10, %v2109_v17  ;;  %v2112_v25 = vpop.f32.mrb[38].mxu0  ;;  %v1111_v18 = vadd.f32 %v2102_v50, %v2775_v42 }
 0x144   : > { %v2201_v28 = vpop.f32.mrb[39].mxu1  ;;  %v2113_v54 = vpop.f32.mrb[39].mxu0 }
 0x145   : > { %v2202_v29 = vadd.f32 %v2201_v28, %v2200_v21  ;;  %v2813_v35 = vadd.f32 %v2113_v54, %v2112_v25  ;;  %v2815_v36 = vadd.f32 %v2199_v19, %v1092_v48 }
 0x147   : > { %v2817_v37 = vadd.f32 %v2202_v29, %v1095_v15  ;;  %v1116_v29 = vadd.f32 %v2105_v63, %v2775_v42 }
 0x149   : > { %v2203_v40 = vpop.f32.mrb[40].mxu1  ;;  %v2115_v22 = vpop.f32.mrb[40].mxu0 }
 0x14a   : > { %v2204_v41 = vpop.f32.mrb[41].mxu1  ;;  %v2116_v1 = vpop.f32.mrb[41].mxu0 }
 0x14b   : > { %v2205_v45 = vadd.f32 %v2204_v41, %v2203_v40  ;;  %v2206_v46 = vpop.f32.mrb[42].mxu1  ;;  %v2820_v47 = vadd.f32 %v2116_v1, %v2115_v22  ;;  %v2118_v27 = vpop.f32.mrb[42].mxu0 }
 0x14c   : > { %v2207_v49 = vpop.f32.mrb[43].mxu1  ;;  %v2119_v9 = vpop.f32.mrb[43].mxu0 }
 0x14d   : > { %v2208_v57 = vadd.f32 %v2207_v49, %v2206_v46  ;;  %v2823_v58 = vadd.f32 %v2119_v9, %v2118_v27  ;;  %v2825_v59 = vadd.f32 %v2205_v45, %v1100_v43  ;;  %v1119_v46 = vadd.f32 %v2803_v3, %v2775_v42 }
 0x14f   : > { %v2827_v34 = vadd.f32 %v2208_v57, %v1103_v53 }
 0x151   : > { %v2209_v61 = vpop.f32.mrb[44].mxu1  ;;  %v2121_v62 = vpop.f32.mrb[44].mxu0 }
 0x152   : > { %v2210_v0 = vpop.f32.mrb[45].mxu1  ;;  %v2122_v23 = vpop.f32.mrb[45].mxu0 }
 0x153   : > { %v2211_v5 = vadd.f32 %v2210_v0, %v2209_v61  ;;  %v2212_v39 = vpop.f32.mrb[46].mxu1  ;;  %v2830_v6 = vadd.f32 %v2122_v23, %v2121_v62  ;;  %v2124_v16 = vpop.f32.mrb[46].mxu0 }
 0x154   : > { %v2213_v17 = vpop.f32.mrb[47].mxu1  ;;  %v2125_v30 = vpop.f32.mrb[47].mxu0 }
 0x155   : > { %v2214_v10 = vadd.f32 %v2213_v17, %v2212_v39  ;;  %v2833_v48 = vadd.f32 %v2125_v30, %v2124_v16  ;;  %v2835_v19 = vadd.f32 %v2211_v5, %v1108_v4  ;;  %v1124_v4 = vadd.f32 %v2810_v24, %v2775_v42 }
 0x157   : > { %v2837_v21 = vadd.f32 %v2214_v10, %v1111_v18 }
 0x159   : > { %v2215_v25 = vpop.f32.mrb[48].mxu1  ;;  %v2305_v28 = vpop.f32.mrb[48].mxu0 }
 0x15a   : > { %v1382_v44 = vadd.f32 %v2305_v28, %v2785_v11  ;;  %v2216_v54 = vpop.f32.mrb[49].mxu1  ;;  %v1373_v15 = vpop.f32.mrb[49].mxu0 }
 0x15b   : > { %v2217_v40 = vadd.f32 %v2216_v54, %v2215_v25  ;;  %v1374_v22 = vadd.f32 %v1373_v15, %v2779_v55  ;;  %v2218_v41 = vpop.f32.mrb[50].mxu1  ;;  %v2306_v50 = vpop.f32.mrb[50].mxu0  ;;  %v1127_v25 = vadd.f32 %v2813_v35, %v2775_v42 }
 0x15c   : > { %v1385_v1 = vadd.f32 %v2306_v50, %v2787_v12  ;;  %v2219_v43 = vpop.f32.mrb[51].mxu1  ;;  %v1376_v45 = vpop.f32.mrb[51].mxu0  ;;  %v1502_v9 = vmax.f32 %v1382_v44, 0.0 }
 0x15d   : > { %v2220_v27 = vadd.f32 %v2219_v43, %v2218_v41  ;;  %v1377_v11 = vadd.f32 %v1376_v45, %v2781_v56  ;;  %v2847_v49 = vadd.f32 %v2217_v40, %v1116_v29  ;;  %v1500_v53 = vmax.f32 %v1374_v22, 0.0 }
 0x15e   : > { %v1503_v63 = vmax.f32 %v1385_v1, 0.0 }
 0x15f   : > { %v1501_v55 = vmax.f32 %v1377_v11, 0.0  ;;  %v2854_v12 = vadd.f32 %v2220_v27, %v1119_v46 }
 0x160   : > { %v1952_v57 = vpack.c.bf16 %v1503_v63, %v1502_v9 }
 0x161   : > { %v1947_v3 = vpack.c.bf16 %v1501_v55, %v1500_v53  ;;  %v2221_v61 = vpop.f32.mrb[52].mxu1  ;;  %v2309_v62 = vpop.f32.mrb[52].mxu0  ;;  %v1135_v53 = vadd.f32 %v2823_v58, %v2775_v42 }
 0x162   : > { %2024 = vst [vmem:[%s2852_s30 + $0x8] sm:$0xff] %v1952_v57   ;;  %v1398_v56 = vadd.f32 %v2309_v62, %v2797_v51  ;;  %v2222_v0 = vpop.f32.mrb[53].mxu1  ;;  %v1389_v23 = vpop.f32.mrb[53].mxu0 }
 0x163   : > { %1948 = vst [vmem:[%s2852_s30] sm:$0xff] %v1947_v3   ;;  %v2223_v5 = vadd.f32 %v2222_v0, %v2221_v61  ;;  %v1390_v39 = vadd.f32 %v1389_v23, %v2791_v31  ;;  %v2224_v16 = vpop.f32.mrb[54].mxu1  ;;  %v2310_v17 = vpop.f32.mrb[54].mxu0 }
 0x164   : > { %v1401_v30 = vadd.f32 %v2310_v17, %v2799_v52  ;;  %v2225_v18 = vpop.f32.mrb[55].mxu1  ;;  %v1392_v10 = vpop.f32.mrb[55].mxu0  ;;  %v1506_v24 = vmax.f32 %v1398_v56, 0.0 }
 0x165   : > { %v2226_v51 = vadd.f32 %v2225_v18, %v2224_v16  ;;  %v1393_v28 = vadd.f32 %v1392_v10, %v2793_v33  ;;  %v2866_v44 = vadd.f32 %v2223_v5, %v1124_v4  ;;  %v1504_v15 = vmax.f32 %v1390_v39, 0.0 }
 0x166   : > { %v1507_v54 = vmax.f32 %v1401_v30, 0.0  ;;  %v1132_v33 = vadd.f32 %v2820_v47, %v2775_v42 }
 0x167   : > { %v1505_v31 = vmax.f32 %v1393_v28, 0.0  ;;  %v2868_v29 = vadd.f32 %v2226_v51, %v1127_v25  ;;  %v1143_v51 = vadd.f32 %v2833_v48, %v2775_v42  ;;  %v1148_v48 = vadd.f32 %v2756_v60, %v2775_v42 }
 0x168   : > { %v1962_v40 = vpack.c.bf16 %v1507_v54, %v1506_v24 }
 0x169   : > { %v1957_v52 = vpack.c.bf16 %v1505_v31, %v1504_v15  ;;  %v2227_v22 = vpop.f32.mrb[56].mxu1  ;;  %v2313_v41 = vpop.f32.mrb[56].mxu0 }
 0x16a   : > { %2026 = vst [vmem:[%s2852_s30 + $0x18] sm:$0xff] %v1962_v40   ;;  %v1414_v50 = vadd.f32 %v2313_v41, %v2815_v36  ;;  %v2228_v35 = vpop.f32.mrb[57].mxu1  ;;  %v1405_v1 = vpop.f32.mrb[57].mxu0 }
 0x16b   : > { %2025 = vst [vmem:[%s2852_s30 + $0x10] sm:$0xff] %v1957_v52   ;;  %v2229_v43 = vadd.f32 %v2228_v35, %v2227_v22  ;;  %v1406_v45 = vadd.f32 %v1405_v1, %v2805_v7  ;;  %v2230_v46 = vpop.f32.mrb[58].mxu1  ;;  %v2314_v27 = vpop.f32.mrb[58].mxu0 }
 0x16c   : > { %v1417_v11 = vadd.f32 %v2314_v27, %v2817_v37  ;;  %v2231_v9 = vpop.f32.mrb[59].mxu1  ;;  %v1408_v63 = vpop.f32.mrb[59].mxu0  ;;  %v1510_v47 = vmax.f32 %v1414_v50, 0.0 }
 0x16d   : > { %v2232_v36 = vadd.f32 %v2231_v9, %v2230_v46  ;;  %v1409_v55 = vadd.f32 %v1408_v63, %v2807_v13  ;;  %v2880_v57 = vadd.f32 %v2229_v43, %v1132_v33  ;;  %v1508_v61 = vmax.f32 %v1406_v45, 0.0 }
 0x16e   : > { %v1511_v3 = vmax.f32 %v1417_v11, 0.0  ;;  %v1140_v13 = vadd.f32 %v2830_v6, %v2775_v42  ;;  %v1151_v11 = vadd.f32 %v2758_v2, %v2775_v42  ;;  %v1156_v2 = vadd.f32 %v2760_v8, %v2775_v42 }
 0x16f   : > { %v1509_v7 = vmax.f32 %v1409_v55, 0.0  ;;  %v2882_v62 = vadd.f32 %v2232_v36, %v1135_v53 }
 0x170   : > { %v1972_v56 = vpack.c.bf16 %v1511_v3, %v1510_v47 }
 0x171   : > { %v1967_v37 = vpack.c.bf16 %v1509_v7, %v1508_v61  ;;  %v2233_v0 = vpop.f32.mrb[60].mxu1  ;;  %v2317_v23 = vpop.f32.mrb[60].mxu0 }
 0x172   : > { %2028 = vst [vmem:[%s2852_s30 + $0x28] sm:$0xff] %v1972_v56   ;;  %v1430_v4 = vadd.f32 %v2317_v23, %v2835_v19  ;;  %v2234_v58 = vpop.f32.mrb[61].mxu1  ;;  %v1421_v5 = vpop.f32.mrb[61].mxu0 }
 0x173   : > { %2027 = vst [vmem:[%s2852_s30 + $0x20] sm:$0xff] %v1967_v37   ;;  %v2235_v39 = vadd.f32 %v2234_v58, %v2233_v0  ;;  %v1422_v16 = vadd.f32 %v1421_v5, %v2825_v59  ;;  %v2236_v17 = vpop.f32.mrb[62].mxu1  ;;  %v2318_v30 = vpop.f32.mrb[62].mxu0 }
 0x174   : > { %v1433_v18 = vadd.f32 %v2318_v30, %v2837_v21  ;;  %v2237_v10 = vpop.f32.mrb[63].mxu1  ;;  %v1424_v25 = vpop.f32.mrb[63].mxu0  ;;  %v1514_v6 = vmax.f32 %v1430_v4, 0.0 }
 0x175   : > { %v2238_v19 = vadd.f32 %v2237_v10, %v2236_v17  ;;  %v1425_v28 = vadd.f32 %v1424_v25, %v2827_v34  ;;  %v1301_v24 = vadd.f32 %v2235_v39, %v1140_v13  ;;  %v1512_v15 = vmax.f32 %v1422_v16, 0.0 }
 0x176   : > { %v1515_v54 = vmax.f32 %v1433_v18, 0.0  ;;  %v1159_v39 = vadd.f32 %v2762_v14, %v2775_v42  ;;  %v1164_v14 = vadd.f32 %v2764_v20, %v2775_v42 }
 0x177   : > { %v1513_v31 = vmax.f32 %v1425_v28, 0.0  ;;  %v1304_v59 = vadd.f32 %v2238_v19, %v1143_v51 }
 0x178   : > { %v1982_v40 = vpack.c.bf16 %v1515_v54, %v1514_v6 }
 0x179   : > { %v1977_v52 = vpack.c.bf16 %v1513_v31, %v1512_v15  ;;  %v2239_v22 = vpop.f32.mrb[64].mxu1  ;;  %v2321_v21 = vpop.f32.mrb[64].mxu0 }
 0x17a   : > { %2030 = vst [vmem:[%s2852_s30 + $0x38] sm:$0xff] %v1982_v40   ;;  %v1446_v41 = vadd.f32 %v2321_v21, %v2866_v44  ;;  %v2240_v50 = vpop.f32.mrb[65].mxu1  ;;  %v1437_v35 = vpop.f32.mrb[65].mxu0 }
 0x17b   : > { %2029 = vst [vmem:[%s2852_s30 + $0x30] sm:$0xff] %v1977_v52   ;;  %v2241_v34 = vadd.f32 %v2240_v50, %v2239_v22  ;;  %v1438_v1 = vadd.f32 %v1437_v35, %v2847_v49  ;;  %v2242_v33 = vpop.f32.mrb[66].mxu1  ;;  %v2322_v43 = vpop.f32.mrb[66].mxu0 }
 0x17c   : > { %v1449_v45 = vadd.f32 %v2322_v43, %v2868_v29  ;;  %v2243_v46 = vpop.f32.mrb[67].mxu1  ;;  %v1440_v27 = vpop.f32.mrb[67].mxu0  ;;  %v1518_v60 = vmax.f32 %v1446_v41, 0.0  ;;  %v1167_v41 = vadd.f32 %v2766_v26, %v2775_v42 }
 0x17d   : > { %v2244_v44 = vadd.f32 %v2243_v46, %v2242_v33  ;;  %v1441_v9 = vadd.f32 %v1440_v27, %v2854_v12  ;;  %v1309_v63 = vadd.f32 %v2241_v34, %v1148_v48  ;;  %v1516_v36 = vmax.f32 %v1438_v1, 0.0 }
 0x17e   : > { %v1519_v53 = vmax.f32 %v1449_v45, 0.0 }
 0x17f   : > { %v1517_v55 = vmax.f32 %v1441_v9, 0.0  ;;  %v1312_v49 = vadd.f32 %v2244_v44, %v1151_v11 }
 0x180   : > { %v1992_v47 = vpack.c.bf16 %v1519_v53, %v1518_v60 }
 0x181   : > { %v1987_v3 = vpack.c.bf16 %v1517_v55, %v1516_v36  ;;  %v2245_v61 = vpop.f32.mrb[68].mxu1  ;;  %v2325_v29 = vpop.f32.mrb[68].mxu0 }
 0x182   : > { %2032 = vst [vmem:[%s2852_s30 + $0x48] sm:$0xff] %v1992_v47   ;;  %v1462_v7 = vadd.f32 %v2325_v29, %v1301_v24  ;;  %v2246_v56 = vpop.f32.mrb[69].mxu1  ;;  %v1453_v37 = vpop.f32.mrb[69].mxu0  ;;  %v1175_v47 = vadd.f32 %v2770_v38, %v2775_v42 }
 0x183   : > { %2031 = vst [vmem:[%s2852_s30 + $0x40] sm:$0xff] %v1987_v3   ;;  %v2247_v12 = vadd.f32 %v2246_v56, %v2245_v61  ;;  %v1454_v0 = vadd.f32 %v1453_v37, %v2880_v57  ;;  %v2248_v23 = vpop.f32.mrb[70].mxu1  ;;  %v2326_v4 = vpop.f32.mrb[70].mxu0 }
 0x184   : > { %v1465_v58 = vadd.f32 %v2326_v4, %v1304_v59  ;;  %v2249_v5 = vpop.f32.mrb[71].mxu1  ;;  %v1456_v13 = vpop.f32.mrb[71].mxu0  ;;  %v1522_v18 = vmax.f32 %v1462_v7, 0.0 }
 0x185   : > { %v2250_v16 = vadd.f32 %v2249_v5, %v2248_v23  ;;  %v1457_v17 = vadd.f32 %v1456_v13, %v2882_v62  ;;  %v1317_v30 = vadd.f32 %v2247_v12, %v1156_v2  ;;  %v1520_v10 = vmax.f32 %v1454_v0, 0.0 }
 0x186   : > { %v1523_v8 = vmax.f32 %v1465_v58, 0.0 }
 0x187   : > { %v1521_v25 = vmax.f32 %v1457_v17, 0.0  ;;  %v1320_v51 = vadd.f32 %v2250_v16, %v1159_v39 }
 0x188   : > { %v2002_v57 = vpack.c.bf16 %v1523_v8, %v1522_v18 }
 0x189   : > { %v1997_v19 = vpack.c.bf16 %v1521_v25, %v1520_v10  ;;  %v2251_v28 = vpop.f32.mrb[72].mxu1  ;;  %v2329_v24 = vpop.f32.mrb[72].mxu0 }
 0x18a   : > { %2034 = vst [vmem:[%s2852_s30 + $0x58] sm:$0xff] %v2002_v57   ;;  %v1478_v6 = vadd.f32 %v2329_v24, %v1317_v30  ;;  %v2252_v54 = vpop.f32.mrb[73].mxu1  ;;  %v1469_v15 = vpop.f32.mrb[73].mxu0 }
 0x18b   : > { %2033 = vst [vmem:[%s2852_s30 + $0x50] sm:$0xff] %v1997_v19   ;;  %v2253_v62 = vadd.f32 %v2252_v54, %v2251_v28  ;;  %v1470_v31 = vadd.f32 %v1469_v15, %v1309_v63  ;;  %v2254_v59 = vpop.f32.mrb[74].mxu1  ;;  %v2330_v40 = vpop.f32.mrb[74].mxu0  ;;  %v1172_v63 = vadd.f32 %v2768_v32, %v2775_v42 }
 0x18c   : > { %v1481_v52 = vadd.f32 %v2330_v40, %v1320_v51  ;;  %v2255_v22 = vpop.f32.mrb[75].mxu1  ;;  %v1472_v21 = vpop.f32.mrb[75].mxu0  ;;  %v1526_v34 = vmax.f32 %v1478_v6, 0.0 }
 0x18d   : > { %v2256_v50 = vadd.f32 %v2255_v22, %v2254_v59  ;;  %v1473_v35 = vadd.f32 %v1472_v21, %v1312_v49  ;;  %v1325_v48 = vadd.f32 %v2253_v62, %v1164_v14  ;;  %v1524_v33 = vmax.f32 %v1470_v31, 0.0 }
 0x18e   : > { %v1527_v1 = vmax.f32 %v1481_v52, 0.0 }
 0x18f   : > { %v1525_v20 = vmax.f32 %v1473_v35, 0.0  ;;  %v1328_v43 = vadd.f32 %v2256_v50, %v1167_v41 }
 0x190   : > { %v2012_v45 = vpack.c.bf16 %v1527_v1, %v1526_v34 }
 0x191   : > { %v2007_v46 = vpack.c.bf16 %v1525_v20, %v1524_v33  ;;  %v2257_v27 = vpop.f32.mrb[76].mxu1  ;;  %v2333_v11 = vpop.f32.mrb[76].mxu0 }
 0x192   : > { %2036 = vst [vmem:[%s2852_s30 + $0x68] sm:$0xff] %v2012_v45   ;;  %v2258_v44 = vpop.f32.mrb[77].mxu1  ;;  %v1485_v9 = vpop.f32.mrb[77].mxu0 }
 0x193   : > { %2035 = vst [vmem:[%s2852_s30 + $0x60] sm:$0xff] %v2007_v46   ;;  %v2259_v26 = vadd.f32 %v2258_v44, %v2257_v27  ;;  %v1486_v60 = vadd.f32 %v1485_v9, %v1325_v48  ;;  %v2260_v53 = vpop.f32.mrb[78].mxu1  ;;  %v2334_v36 = vpop.f32.mrb[78].mxu0 }
 0x194   : > { %v2261_v55 = vpop.f32.mrb[79].mxu1  ;;  %v1488_v49 = vpop.f32.mrb[79].mxu0 }
 0x195   : > { %v1333_v3 = vadd.f32 %v2259_v26, %v1172_v63  ;;  %v2262_v61 = vadd.f32 %v2261_v55, %v2260_v53  ;;  %v1489_v29 = vadd.f32 %v1488_v49, %v1328_v43  ;;  %v1528_v56 = vmax.f32 %v1486_v60, 0.0 }
 0x197   : > { %v1494_v7 = vadd.f32 %v2333_v11, %v1333_v3  ;;  %v1336_v37 = vadd.f32 %v2262_v61, %v1175_v47  ;;  %v1529_v2 = vmax.f32 %v1489_v29, 0.0 }
 0x199   : > { %v1497_v32 = vadd.f32 %v2334_v36, %v1336_v37  ;;  %v2017_v12 = vpack.c.bf16 %v1529_v2, %v1528_v56  ;;  %v1530_v0 = vmax.f32 %v1494_v7, 0.0 }
 0x19b   : > { %v1531_v23 = vmax.f32 %v1497_v32, 0.0  ;;  %2037 = vst [vmem:[%s2852_s30 + $0x70] sm:$0xff] %v2017_v12  }
 0x19d   : > { %v2022_v4 = vpack.c.bf16 %v1531_v23, %v1530_v0 }
 0x19f   : > { %2038 = vst [vmem:[%s2852_s30 + $0x78] sm:$0xff] %v2022_v4  }
 0x1a0 PF: > { %s13_s12 = sadd.s32 1, %s2518_s12  }
 0x1a1   : > { %p10_p4 = scmp.ge.s32.totalorder %s13_s12, 4  }
 0x1a3   :  { %12 = sbr.rel (!%p10_p4) target bundleno = 1 (0x1), region = 62 }

// kernel: inception_b_forward.8
= control target key start
LH: loop header
LB: loop body
LE: loop exit
PB: predicated region body
PF: predicated region fallthrough
CT: control target
= control target key end

     0   :  { %v1633_v38 = vmov 0.0   ;;  %vm1634_vm0 = vmmov 0   ;;  %s2095_s1 = inlined_call_operand.vmem [shape: bf16[896,128], index: 1, kind: input, shape index: {}]   ;;  %s2096_s0 = inlined_call_operand.vmem [shape: bf16[112,896], index: 0, kind: input, shape index: {}]   ;;  %s2097_s2 = inlined_call_operand.vmem [shape: f32[1,128], index: 2, kind: input, shape index: {}]   ;;  %s2098_s3 = inlined_call_operand.vmem [shape: f32[112,128], index: 3, kind: output, shape index: {}]  }
   0x1   :  { %v1507_v0 = vld [vmem:[%s2095_s1 + $0x40] sm:$0xff]   ;;  %v1511_v4 = vld [vmem:[%s2095_s1 + $0x48] sm:$0xff]   ;;  %v1515_v8 = vld [vmem:[%s2095_s1 + $0x50] sm:$0xff]  }
   0x2   :  { %v1508_v1 = vld [vmem:[%s2095_s1] sm:$0xff]   ;;  %1272 = vmatprep.subr.bf16.mxu0 %v1507_v0  ;;  %v1512_v5 = vld [vmem:[%s2095_s1 + $0x8] sm:$0xff]   ;;  %v1516_v9 = vld [vmem:[%s2095_s1 + $0x10] sm:$0xff]  }
   0x3   :  { %v1509_v2 = vld [vmem:[%s2095_s1 + $0xc0] sm:$0xff]   ;;  %1273 = vmatpush3.bf16.msra.mxu0 %v1508_v1  ;;  %v1513_v6 = vld [vmem:[%s2095_s1 + $0xc8] sm:$0xff]   ;;  %v1517_v10 = vld [vmem:[%s2095_s1 + $0xd0] sm:$0xff]  }
   0x4   :  { %v1510_v3 = vld [vmem:[%s2095_s1 + $0x80] sm:$0xff]   ;;  %1330 = vmatprep.subr.bf16.mxu1 %v1509_v2  ;;  %1274 = vmatprep.subr.bf16.mxu0 %v1511_v4  ;;  %v1514_v7 = vld [vmem:[%s2095_s1 + $0x88] sm:$0xff]   ;;  %v1518_v11 = vld [vmem:[%s2095_s1 + $0x90] sm:$0xff]  }
   0x5   :  { %1331 = vmatpush3.bf16.msra.mxu1 %v1510_v3  ;;  %v1519_v12 = vld [vmem:[%s2095_s1 + $0x58] sm:$0xff]   ;;  %v1523_v16 = vld [vmem:[%s2095_s1 + $0x60] sm:$0xff]   ;;  %v1527_v20 = vld [vmem:[%s2095_s1 + $0x68] sm:$0xff]  }
   0x6   :  { %1332 = vmatprep.subr.bf16.mxu1 %v1513_v6  ;;  %v1520_v13 = vld [vmem:[%s2095_s1 + $0x18] sm:$0xff]   ;;  %v1524_v17 = vld [vmem:[%s2095_s1 + $0x20] sm:$0xff]   ;;  %v1528_v21 = vld [vmem:[%s2095_s1 + $0x28] sm:$0xff]  }
   0x7   :  { %1275 = vmatpush3.bf16.msra.mxu0 %v1512_v5  ;;  %v1521_v14 = vld [vmem:[%s2095_s1 + $0xd8] sm:$0xff]   ;;  %v1525_v18 = vld [vmem:[%s2095_s1 + $0xe0] sm:$0xff]   ;;  %v1529_v22 = vld [vmem:[%s2095_s1 + $0xe8] sm:$0xff]  }
   0x8   :  { %1276 = vmatprep.subr.bf16.mxu0 %v1515_v8  ;;  %v1522_v15 = vld [vmem:[%s2095_s1 + $0x98] sm:$0xff]   ;;  %v1526_v19 = vld [vmem:[%s2095_s1 + $0xa0] sm:$0xff]   ;;  %v1530_v23 = vld [vmem:[%s2095_s1 + $0xa8] sm:$0xff]  }
   0x9   :  { %1333 = vmatpush3.bf16.msra.mxu1 %v1514_v7  ;;  %v1531_v24 = vld [vmem:[%s2095_s1 + $0x70] sm:$0xff]   ;;  %v1535_v28 = vld [vmem:[%s2095_s1 + $0x78] sm:$0xff]   ;;  %v1540_v32 = vld [vmem:[%s2096_s0 + $0x4] ss:$28 sps:$4 sm:$0xff]  }
   0xa   :  { %1334 = vmatprep.subr.bf16.mxu1 %v1517_v10  ;;  %v1532_v25 = vld [vmem:[%s2095_s1 + $0x30] sm:$0xff]   ;;  %v1536_v29 = vld [vmem:[%s2095_s1 + $0x38] sm:$0xff]   ;;  %810 = vmatprep.mubr.bf16.mxu0 %v1540_v32  ;;  %v1542_v34 = vld [vmem:[%s2095_s1 + $0x140] sm:$0xff]  }
   0xb   :  { %1277 = vmatpush3.bf16.msra.mxu0 %v1516_v9  ;;  %v1533_v26 = vld [vmem:[%s2095_s1 + $0xf0] sm:$0xff]   ;;  %v1537_v30 = vld [vmem:[%s2095_s1 + $0xf8] sm:$0xff]   ;;  %v1543_v35 = vld [vmem:[%s2096_s0 + $0x8] ss:$28 sps:$4 sm:$0xff]  }
   0xc   :  { %1278 = vmatprep.subr.bf16.mxu0 %v1519_v12  ;;  %v1534_v27 = vld [vmem:[%s2095_s1 + $0xb0] sm:$0xff]   ;;  %v1538_v31 = vld [vmem:[%s2096_s0] ss:$28 sps:$4 sm:$0xff]   ;;  %v1545_v36 = vld [vmem:[%s2096_s0 + $0xc] ss:$28 sps:$4 sm:$0xff]  }
   0xd   :  { %1335 = vmatpush3.bf16.msra.mxu1 %v1518_v11  ;;  %v1541_v33 = vld [vmem:[%s2095_s1 + $0xb8] sm:$0xff]   ;;  %v1546_v37 = vld [vmem:[%s2095_s1 + $0x100] sm:$0xff]   ;;  %899 = vmatprep.mubr.bf16.mxu1 %v1545_v36  ;;  %v1550_v41 = vld [vmem:[%s2095_s1 + $0x148] sm:$0xff]  }
   0xe   :  { %1336 = vmatprep.subr.bf16.mxu1 %v1521_v14  ;;  %v1547_v39 = vld [vmem:[%s2095_s1 + $0x180] sm:$0xff]   ;;  %v1548_v40 = vld [vmem:[%s2096_s0 + $0x3c] ss:$28 sps:$4 sm:$0xff]   ;;  %v1552_v43 = vld [vmem:[%s2095_s1 + $0x108] sm:$0xff]  }
   0xf   :  { %1279 = vmatpush3.bf16.msra.mxu0 %v1520_v13  ;;  %v1551_v42 = vld [vmem:[%s2096_s0 + $0x38] ss:$28 sps:$4 sm:$0xff]   ;;  %v1553_v44 = vld [vmem:[%s2096_s0 + $0x44] ss:$28 sps:$4 sm:$0xff]   ;;  %v1556_v46 = vld [vmem:[%s2095_s1 + $0x188] sm:$0xff]  }
  0x10   :  { %1280 = vmatprep.subr.bf16.mxu0 %v1523_v16  ;;  %v1555_v45 = vld [vmem:[%s2096_s0 + $0x40] ss:$28 sps:$4 sm:$0xff]   ;;  %v1557_v47 = vld [vmem:[%s2095_s1 + $0x150] sm:$0xff]   ;;  %v1568_v56 = vld [vmem:[%s2096_s0 + $0xac] ss:$28 sps:$4 sm:$0xff]  }
  0x11   :  { %1337 = vmatpush3.bf16.msra.mxu1 %v1522_v15  ;;  %v1558_v48 = vld [vmem:[%s2096_s0 + $0x74] ss:$28 sps:$4 sm:$0xff]   ;;  %v1562_v51 = vld [vmem:[%s2096_s0 + $0x7c] ss:$28 sps:$4 sm:$0xff]   ;;  %v1570_v57 = vld [vmem:[%s2096_s0 + $0xa8] ss:$28 sps:$4 sm:$0xff]  }
  0x12   :  { %1338 = vmatprep.subr.bf16.mxu1 %v1525_v18  ;;  %v1560_v49 = vld [vmem:[%s2095_s1 + $0x110] sm:$0xff]   ;;  %v1566_v54 = vld [vmem:[%s2095_s1 + $0x158] sm:$0xff]   ;;  %v1575_v60 = vld [vmem:[%s2095_s1 + $0x160] sm:$0xff]  }
  0x13   :  { %1281 = vmatpush3.bf16.msra.mxu0 %v1524_v17  ;;  %v1561_v50 = vld [vmem:[%s2096_s0 + $0x70] ss:$28 sps:$4 sm:$0xff]   ;;  %v1564_v52 = vld [vmem:[%s2096_s0 + $0x78] ss:$28 sps:$4 sm:$0xff]   ;;  %v1576_v61 = vld [vmem:[%s2095_s1 + $0x120] sm:$0xff]  }
  0x14   :  { %1282 = vmatprep.subr.bf16.mxu0 %v1527_v20  ;;  %v1565_v53 = vld [vmem:[%s2095_s1 + $0x190] sm:$0xff]   ;;  %v1567_v55 = vld [vmem:[%s2095_s1 + $0x118] sm:$0xff]   ;;  %v1577_v62 = vld [vmem:[%s2096_s0 + $0xe4] ss:$28 sps:$4 sm:$0xff]  }
  0x15   :  { %1339 = vmatpush3.bf16.msra.mxu1 %v1526_v19  ;;  %v1571_v58 = vld [vmem:[%s2096_s0 + $0xb4] ss:$28 sps:$4 sm:$0xff]   ;;  %v1574_v59 = vld [vmem:[%s2095_s1 + $0x198] sm:$0xff]   ;;  %v1580_v0 = vld [vmem:[%s2096_s0 + $0xec] ss:$28 sps:$4 sm:$0xff]  }
  0x16   :  { %1340 = vmatprep.subr.bf16.mxu1 %v1529_v22  ;;  %v1573_v63 = vld [vmem:[%s2096_s0 + $0xb0] ss:$28 sps:$4 sm:$0xff]   ;;  %v1583_v1 = vld [vmem:[%s2095_s1 + $0x1a0] sm:$0xff]   ;;  %v1586_v6 = vld [vmem:[%s2096_s0 + $0x11c] ss:$28 sps:$4 sm:$0xff]  }
  0x17   :  { %1283 = vmatpush3.bf16.msra.mxu0 %v1528_v21  ;;  %v1584_v2 = vld [vmem:[%s2095_s1 + $0x168] sm:$0xff]   ;;  %v1579_v4 = vld [vmem:[%s2096_s0 + $0xe0] ss:$28 sps:$4 sm:$0xff]   ;;  %v1593_v9 = vld [vmem:[%s2095_s1 + $0x170] sm:$0xff]  }
  0x18   :  { %1284 = vmatprep.subr.bf16.mxu0 %v1531_v24  ;;  %v1585_v3 = vld [vmem:[%s2095_s1 + $0x128] sm:$0xff]   ;;  %v1589_v7 = vld [vmem:[%s2096_s0 + $0x124] ss:$28 sps:$4 sm:$0xff]   ;;  %v1594_v10 = vld [vmem:[%s2095_s1 + $0x130] sm:$0xff]  }
  0x19   :  { %1341 = vmatpush3.bf16.msra.mxu1 %v1530_v23  ;;  %v1582_v5 = vld [vmem:[%s2096_s0 + $0xe8] ss:$28 sps:$4 sm:$0xff]   ;;  %v1598_v11 = vld [vmem:[%s2095_s1 + $0x1b0] sm:$0xff]   ;;  %v1601_v14 = vld [vmem:[%s2095_s1 + $0x178] sm:$0xff]  }
  0x1a   :  { %1342 = vmatprep.subr.bf16.mxu1 %v1533_v26  ;;  %v1591_v8 = vld [vmem:[%s2095_s1 + $0x1a8] sm:$0xff]   ;;  %v1588_v12 = vld [vmem:[%s2096_s0 + $0x118] ss:$28 sps:$4 sm:$0xff]   ;;  %v1592_v16 = vld [vmem:[%s2096_s0 + $0x120] ss:$28 sps:$4 sm:$0xff]  }
  0x1b   :  { %1285 = vmatpush3.bf16.msra.mxu0 %v1532_v25  ;;  %v1595_v13 = vld [vmem:[%s2096_s0 + $0x154] ss:$28 sps:$4 sm:$0xff]   ;;  %v1603_v15 = vld [vmem:[%s2095_s1 + $0x138] sm:$0xff]   ;;  %v1609_v23 = vld [vmem:[%s2096_s0 + $0x4c] ss:$28 sps:$4 sm:$0xff]  }
  0x1c   :  { %1286 = vmatprep.subr.bf16.mxu0 %v1535_v28  ;;  %v1599_v17 = vld [vmem:[%s2096_s0 + $0x15c] ss:$28 sps:$4 sm:$0xff]   ;;  %v1597_v19 = vld [vmem:[%s2096_s0 + $0x150] ss:$28 sps:$4 sm:$0xff]   ;;  %v1611_v25 = vld [vmem:[%s2096_s0 + $0x48] ss:$28 sps:$4 sm:$0xff]  }
  0x1d   :  { %1343 = vmatpush3.bf16.msra.mxu1 %v1534_v27  ;;  %v1607_v18 = vld [vmem:[%s2095_s1 + $0x1b8] sm:$0xff]   ;;  %v1606_v20 = vld [vmem:[%s2096_s0 + $0x14] ss:$28 sps:$4 sm:$0xff]   ;;  %v1613_v26 = vld [vmem:[%s2096_s0 + $0x84] ss:$28 sps:$4 sm:$0xff]  }
  0x1e   :  { %1344 = vmatprep.subr.bf16.mxu1 %v1537_v30  ;;  %v1602_v21 = vld [vmem:[%s2096_s0 + $0x158] ss:$28 sps:$4 sm:$0xff]   ;;  %v1604_v22 = vld [vmem:[%s2096_s0 + $0x10] ss:$28 sps:$4 sm:$0xff]   ;;  %v1615_v28 = vld [vmem:[%s2096_s0 + $0x80] ss:$28 sps:$4 sm:$0xff]  }
  0x1f   :  { %1287 = vmatpush3.bf16.msra.mxu0 %v1536_v29  ;;  %v1608_v24 = vld [vmem:[%s2096_s0 + $0x18] ss:$28 sps:$4 sm:$0xff]   ;;  %v1612_v27 = vld [vmem:[%s2096_s0 + $0x50] ss:$28 sps:$4 sm:$0xff]   ;;  %v1616_v30 = vld [vmem:[%s2096_s0 + $0x88] ss:$28 sps:$4 sm:$0xff]  }
  0x20   :  { %1388 = vmatprep.subr.bf16.mxu0 %v1542_v34  ;;  %v1617_v29 = vld [vmem:[%s2096_s0 + $0xbc] ss:$28 sps:$4 sm:$0xff]   ;;  %v1621_v32 = vld [vmem:[%s2096_s0 + $0xf4] ss:$28 sps:$4 sm:$0xff]  }
  0x21   :  { %1345 = vmatpush3.bf16.msra.mxu1 %v1541_v33  ;;  %v1620_v33 = vld [vmem:[%s2096_s0 + $0xc0] ss:$28 sps:$4 sm:$0xff]   ;;  %v1623_v34 = vld [vmem:[%s2096_s0 + $0xf0] ss:$28 sps:$4 sm:$0xff]   ;;  %v1624_v36 = vld [vmem:[%s2096_s0 + $0xf8] ss:$28 sps:$4 sm:$0xff]  }
  0x22   :  { %811 = vmatmul.mubr.bf16.vlgmr.msra.gmra.mrb[0].mxu0 %v1538_v31  ;;  %1461 = vmatprep.subr.bf16.mxu1 %v1633_v38  ;;  %v1619_v31 = vld [vmem:[%s2096_s0 + $0xb8] ss:$28 sps:$4 sm:$0xff]  }
  0x23   :  { %1389 = vmatpush3.bf16.msra.mxu0 %v1546_v37  ;;  %818 = vmatprep.mubr.bf16.mxu0 %v1548_v40  ;;  %v1627_v37 = vld [vmem:[%s2096_s0 + $0x128] ss:$28 sps:$4 sm:$0xff]   ;;  %v1628_v40 = vld [vmem:[%s2096_s0 + $0x130] ss:$28 sps:$4 sm:$0xff]  }
  0x24   :  { %900 = vmatmul.mubr.bf16.vlgmr.msra.gmra.mrb[0].mxu1 %v1543_v35  ;;  %1390 = vmatprep.subr.bf16.mxu0 %v1550_v41  ;;  %v1625_v35 = vld [vmem:[%s2096_s0 + $0x12c] ss:$28 sps:$4 sm:$0xff]   ;;  %v1631_v41 = vld [vmem:[%s2096_s0 + $0x160] ss:$28 sps:$4 sm:$0xff]  }
  0x25   :  { %1462 = vmatpush3.bf16.msra.mxu1 %v1547_v39  ;;  %907 = vmatprep.mubr.bf16.mxu1 %v1553_v44  ;;  %v1629_v39 = vld [vmem:[%s2096_s0 + $0x164] ss:$28 sps:$4 sm:$0xff]  }
  0x26   :  { %1463 = vmatprep.subr.bf16.mxu1 %v1633_v38  ;;  %v1995_v44 = vld [vmem:[%s2097_s2] ss:$0 sm:$0xff] }
  0x27   :  { %1391 = vmatpush3.bf16.msra.mxu0 %v1552_v43 }
  0x28   :  { %1392 = vmatprep.subr.bf16.mxu0 %v1557_v47 }
  0x29   :  { %1464 = vmatpush3.bf16.msra.mxu1 %v1556_v46 }
  0x2a   :  { %819 = vmatmul.mubr.bf16.gmra.mrb[4].mxu0 %v1551_v42  ;;  %1465 = vmatprep.subr.bf16.mxu1 %v1633_v38  ;;  %v1632_v42 = vld [vmem:[%s2096_s0 + $0x168] ss:$28 sps:$4 sm:$0xff]  }
  0x2b   :  { %826 = vmatprep.mubr.bf16.mxu0 %v1558_v48  ;;  %1393 = vmatpush3.bf16.msra.mxu0 %v1560_v49 }
  0x2c   :  { %908 = vmatmul.mubr.bf16.gmra.mrb[4].mxu1 %v1555_v45  ;;  %1394 = vmatprep.subr.bf16.mxu0 %v1566_v54 }
  0x2d   :  { %915 = vmatprep.mubr.bf16.mxu1 %v1562_v51  ;;  %1466 = vmatpush3.bf16.msra.mxu1 %v1565_v53 }
  0x2e   :  { %1467 = vmatprep.subr.bf16.mxu1 %v1633_v38 }
  0x2f   :  { %1395 = vmatpush3.bf16.msra.mxu0 %v1567_v55 }
  0x30   :  { %1396 = vmatprep.subr.bf16.mxu0 %v1575_v60 }
  0x31   :  { %1468 = vmatpush3.bf16.msra.mxu1 %v1574_v59 }
  0x32   :  { %827 = vmatmul.mubr.bf16.gmra.mrb[8].mxu0 %v1561_v50  ;;  %1469 = vmatprep.subr.bf16.mxu1 %v1633_v38 }
  0x33   :  { %834 = vmatprep.mubr.bf16.mxu0 %v1568_v56  ;;  %1397 = vmatpush3.bf16.msra.mxu0 %v1576_v61 }
  0x34   :  { %916 = vmatmul.mubr.bf16.gmra.mrb[8].mxu1 %v1564_v52  ;;  %1398 = vmatprep.subr.bf16.mxu0 %v1584_v2 }
  0x35   :  { %923 = vmatprep.mubr.bf16.mxu1 %v1571_v58  ;;  %1470 = vmatpush3.bf16.msra.mxu1 %v1583_v1 }
  0x36   :  { %1471 = vmatprep.subr.bf16.mxu1 %v1633_v38 }
  0x37   :  { %1399 = vmatpush3.bf16.msra.mxu0 %v1585_v3 }
  0x38   :  { %1400 = vmatprep.subr.bf16.mxu0 %v1593_v9 }
  0x39   :  { %1472 = vmatpush3.bf16.msra.mxu1 %v1591_v8 }
  0x3a   :  { %835 = vmatmul.mubr.bf16.gmra.mrb[12].mxu0 %v1570_v57  ;;  %1473 = vmatprep.subr.bf16.mxu1 %v1633_v38 }
  0x3b   :  { %842 = vmatprep.mubr.bf16.mxu0 %v1577_v62  ;;  %1401 = vmatpush3.bf16.msra.mxu0 %v1594_v10 }
  0x3c   :  { %924 = vmatmul.mubr.bf16.gmra.mrb[12].mxu1 %v1573_v63  ;;  %1402 = vmatprep.subr.bf16.mxu0 %v1601_v14 }
  0x3d   :  { %931 = vmatprep.mubr.bf16.mxu1 %v1580_v0  ;;  %1474 = vmatpush3.bf16.msra.mxu1 %v1598_v11 }
  0x3e   :  { %1475 = vmatprep.subr.bf16.mxu1 %v1633_v38 }
  0x3f   :  { %1403 = vmatpush3.bf16.msra.mxu0 %v1603_v15 }
  0x41   :  { %1476 = vmatpush3.bf16.msra.mxu1 %v1607_v18 }
  0x42   :  { %843 = vmatmul.mubr.bf16.gmra.mrb[16].mxu0 %v1579_v4 }
  0x43   :  { %850 = vmatprep.mubr.bf16.mxu0 %v1586_v6 }
  0x44   :  { %932 = vmatmul.mubr.bf16.gmra.mrb[16].mxu1 %v1582_v5 }
  0x45   :  { %939 = vmatprep.mubr.bf16.mxu1 %v1589_v7 }
  0x4a   :  { %851 = vmatmul.mubr.bf16.gmra.mrb[20].mxu0 %v1588_v12 }
  0x4b   :  { %858 = vmatprep.mubr.bf16.mxu0 %v1595_v13 }
  0x4c   :  { %940 = vmatmul.mubr.bf16.gmra.mrb[20].mxu1 %v1592_v16 }
  0x4d   :  { %947 = vmatprep.mubr.bf16.mxu1 %v1599_v17 }
  0x52   :  { %859 = vmatmul.mubr.bf16.gmra.mrb[24].mxu0 %v1597_v19 }
  0x53   :  { %988 = vmatprep.mubr.bf16.mxu0 %v1606_v20 }
  0x54   :  { %948 = vmatmul.mubr.bf16.gmra.mrb[24].mxu1 %v1602_v21 }
  0x55   :  { %1477 = vmatprep.mubr.msk.bf16.mxu1 %vm1634_vm0, %v1633_v38 }
  0x5a   :  { %989 = vmatmul.mubr.bf16.vlgmr.msra.gmra.mrb[28].mxu0 %v1604_v22 }
  0x5b   :  { %996 = vmatprep.mubr.bf16.mxu0 %v1609_v23 }
  0x5c   :  { %1478 = vmatmul.mubr.bf16.vlgmr.msra.gmra.mrb[28].mxu1 %v1608_v24 }
  0x5d   :  { %1481 = vmatprep.mubr.msk.bf16.mxu1 %vm1634_vm0, %v1633_v38 }
  0x62   :  { %997 = vmatmul.mubr.bf16.gmra.mrb[32].mxu0 %v1611_v25 }
  0x63   :  { %1004 = vmatprep.mubr.bf16.mxu0 %v1613_v26 }
  0x64   :  { %1482 = vmatmul.mubr.bf16.gmra.mrb[32].mxu1 %v1612_v27 }
  0x65   :  { %1485 = vmatprep.mubr.msk.bf16.mxu1 %vm1634_vm0, %v1633_v38 }
  0x6a   :  { %1005 = vmatmul.mubr.bf16.gmra.mrb[36].mxu0 %v1615_v28 }
  0x6b   :  { %1012 = vmatprep.mubr.bf16.mxu0 %v1617_v29 }
  0x6c   :  { %1486 = vmatmul.mubr.bf16.gmra.mrb[36].mxu1 %v1616_v30 }
  0x6d   :  { %1489 = vmatprep.mubr.msk.bf16.mxu1 %vm1634_vm0, %v1633_v38 }
  0x72   :  { %1013 = vmatmul.mubr.bf16.gmra.mrb[40].mxu0 %v1619_v31 }
  0x73   :  { %1020 = vmatprep.mubr.bf16.mxu0 %v1621_v32 }
  0x74   :  { %1490 = vmatmul.mubr.bf16.gmra.mrb[40].mxu1 %v1620_v33 }
  0x75   :  { %1493 = vmatprep.mubr.msk.bf16.mxu1 %vm1634_vm0, %v1633_v38 }
  0x7a   :  { %1021 = vmatmul.mubr.bf16.gmra.mrb[44].mxu0 %v1623_v34 }
  0x7b   :  { %1028 = vmatprep.mubr.bf16.mxu0 %v1625_v35 }
  0x7c   :  { %1494 = vmatmul.mubr.bf16.gmra.mrb[44].mxu1 %v1624_v36 }
  0x7d   :  { %1497 = vmatprep.mubr.msk.bf16.mxu1 %vm1634_vm0, %v1633_v38 }
  0x82   :  { %1029 = vmatmul.mubr.bf16.gmra.mrb[48].mxu0 %v1627_v37 }
  0x83   :  { %1036 = vmatprep.mubr.bf16.mxu0 %v1629_v39 }
  0x84   :  { %1498 = vmatmul.mubr.bf16.gmra.mrb[48].mxu1 %v1628_v40 }
  0x85   :  { %1501 = vmatprep.mubr.msk.bf16.mxu1 %vm1634_vm0, %v1633_v38 }
  0x8a   :  { %1037 = vmatmul.mubr.bf16.gmra.mrb[52].mxu0 %v1631_v41 }
  0x8c   :  { %1502 = vmatmul.mubr.bf16.gmra.mrb[52].mxu1 %v1632_v42 }
  0xf5   :  { %v1288_v43 = vpop.f32.mrb[0].mxu0 }
  0xf6   :  { %v1289_v45 = vpop.f32.mrb[1].mxu0 }
  0xf7   :  { %v1290_v46 = vadd.f32 %v1289_v45, %v1288_v43  ;;  %v1291_v47 = vpop.f32.mrb[2].mxu0  ;;  %v1346_v48 = vpop.f32.mrb[0].mxu1 }
  0xf8   :  { %v1292_v49 = vpop.f32.mrb[3].mxu0  ;;  %v1347_v51 = vpop.f32.mrb[1].mxu1 }
  0xf9   :  { %v813_v50 = vadd.f32 %v1290_v46, %v1995_v44  ;;  %v1293_v38 = vadd.f32 %v1292_v49, %v1291_v47  ;;  %v1348_v52 = vadd.f32 %v1347_v51, %v1346_v48  ;;  %v1349_v53 = vpop.f32.mrb[2].mxu1 }
  0xfa   :  { %v1350_v55 = vpop.f32.mrb[3].mxu1 }
  0xfb   :  { %v816_v54 = vadd.f32 %v1293_v38, %v1995_v44  ;;  %v1999_v56 = vadd.f32 %v1348_v52, %v813_v50  ;;  %v1351_v57 = vadd.f32 %v1350_v55, %v1349_v53 }
  0xfd   :  { %v1294_v58 = vpop.f32.mrb[4].mxu0  ;;  %v2001_v59 = vadd.f32 %v1351_v57, %v816_v54 }
  0xfe   :  { %v1295_v60 = vpop.f32.mrb[5].mxu0 }
  0xff   :  { %v1296_v61 = vadd.f32 %v1295_v60, %v1294_v58  ;;  %v1297_v62 = vpop.f32.mrb[6].mxu0  ;;  %v1352_v63 = vpop.f32.mrb[4].mxu1 }
 0x100   :  { %v1298_v0 = vpop.f32.mrb[7].mxu0  ;;  %v1353_v3 = vpop.f32.mrb[5].mxu1 }
 0x101   :  { %v821_v1 = vadd.f32 %v1296_v61, %v1995_v44  ;;  %v1299_v2 = vadd.f32 %v1298_v0, %v1297_v62  ;;  %v1354_v4 = vadd.f32 %v1353_v3, %v1352_v63  ;;  %v1355_v5 = vpop.f32.mrb[6].mxu1 }
 0x102   :  { %v1356_v7 = vpop.f32.mrb[7].mxu1 }
 0x103   :  { %v824_v6 = vadd.f32 %v1299_v2, %v1995_v44  ;;  %v2005_v8 = vadd.f32 %v1354_v4, %v821_v1  ;;  %v1357_v9 = vadd.f32 %v1356_v7, %v1355_v5 }
 0x105   :  { %v1300_v10 = vpop.f32.mrb[8].mxu0  ;;  %v2007_v11 = vadd.f32 %v1357_v9, %v824_v6 }
 0x106   :  { %v1301_v12 = vpop.f32.mrb[9].mxu0 }
 0x107   :  { %v1302_v13 = vadd.f32 %v1301_v12, %v1300_v10  ;;  %v1303_v14 = vpop.f32.mrb[10].mxu0  ;;  %v1358_v15 = vpop.f32.mrb[8].mxu1 }
 0x108   :  { %v1304_v16 = vpop.f32.mrb[11].mxu0  ;;  %v1359_v19 = vpop.f32.mrb[9].mxu1 }
 0x109   :  { %v829_v17 = vadd.f32 %v1302_v13, %v1995_v44  ;;  %v1305_v18 = vadd.f32 %v1304_v16, %v1303_v14  ;;  %v1360_v20 = vadd.f32 %v1359_v19, %v1358_v15  ;;  %v1361_v21 = vpop.f32.mrb[10].mxu1 }
 0x10a   :  { %v1362_v23 = vpop.f32.mrb[11].mxu1 }
 0x10b   :  { %v832_v22 = vadd.f32 %v1305_v18, %v1995_v44  ;;  %v2011_v24 = vadd.f32 %v1360_v20, %v829_v17  ;;  %v1363_v25 = vadd.f32 %v1362_v23, %v1361_v21 }
 0x10d   :  { %v1306_v26 = vpop.f32.mrb[12].mxu0  ;;  %v2013_v27 = vadd.f32 %v1363_v25, %v832_v22 }
 0x10e   :  { %v1307_v28 = vpop.f32.mrb[13].mxu0 }
 0x10f   :  { %v1308_v29 = vadd.f32 %v1307_v28, %v1306_v26  ;;  %v1309_v30 = vpop.f32.mrb[14].mxu0  ;;  %v1364_v31 = vpop.f32.mrb[12].mxu1 }
 0x110   :  { %v1310_v32 = vpop.f32.mrb[15].mxu0  ;;  %v1365_v35 = vpop.f32.mrb[13].mxu1 }
 0x111   :  { %v837_v33 = vadd.f32 %v1308_v29, %v1995_v44  ;;  %v1311_v34 = vadd.f32 %v1310_v32, %v1309_v30  ;;  %v1366_v36 = vadd.f32 %v1365_v35, %v1364_v31  ;;  %v1367_v37 = vpop.f32.mrb[14].mxu1 }
 0x112   :  { %v1368_v40 = vpop.f32.mrb[15].mxu1 }
 0x113   :  { %v840_v39 = vadd.f32 %v1311_v34, %v1995_v44  ;;  %v2017_v41 = vadd.f32 %v1366_v36, %v837_v33  ;;  %v1369_v42 = vadd.f32 %v1368_v40, %v1367_v37 }
 0x115   :  { %v1312_v43 = vpop.f32.mrb[16].mxu0  ;;  %v2019_v45 = vadd.f32 %v1369_v42, %v840_v39 }
 0x116   :  { %v1313_v46 = vpop.f32.mrb[17].mxu0 }
 0x117   :  { %v1314_v47 = vadd.f32 %v1313_v46, %v1312_v43  ;;  %v1315_v48 = vpop.f32.mrb[18].mxu0  ;;  %v1370_v49 = vpop.f32.mrb[16].mxu1 }
 0x118   :  { %v1316_v50 = vpop.f32.mrb[19].mxu0  ;;  %v1371_v52 = vpop.f32.mrb[17].mxu1 }
 0x119   :  { %v845_v38 = vadd.f32 %v1314_v47, %v1995_v44  ;;  %v1317_v51 = vadd.f32 %v1316_v50, %v1315_v48  ;;  %v1372_v53 = vadd.f32 %v1371_v52, %v1370_v49  ;;  %v1373_v54 = vpop.f32.mrb[18].mxu1 }
 0x11a   :  { %v1374_v57 = vpop.f32.mrb[19].mxu1 }
 0x11b   :  { %v848_v55 = vadd.f32 %v1317_v51, %v1995_v44  ;;  %v2023_v58 = vadd.f32 %v1372_v53, %v845_v38  ;;  %v1375_v60 = vadd.f32 %v1374_v57, %v1373_v54 }
 0x11d   :  { %v1318_v61 = vpop.f32.mrb[20].mxu0  ;;  %v2025_v62 = vadd.f32 %v1375_v60, %v848_v55 }
 0x11e   :  { %v1319_v63 = vpop.f32.mrb[21].mxu0 }
 0x11f   :  { %v1320_v0 = vadd.f32 %v1319_v63, %v1318_v61  ;;  %v1321_v1 = vpop.f32.mrb[22].mxu0  ;;  %v1376_v2 = vpop.f32.mrb[20].mxu1 }
 0x120   :  { %v1322_v3 = vpop.f32.mrb[23].mxu0  ;;  %v1377_v6 = vpop.f32.mrb[21].mxu1 }
 0x121   :  { %v853_v4 = vadd.f32 %v1320_v0, %v1995_v44  ;;  %v1323_v5 = vadd.f32 %v1322_v3, %v1321_v1  ;;  %v1378_v7 = vadd.f32 %v1377_v6, %v1376_v2  ;;  %v1379_v9 = vpop.f32.mrb[22].mxu1 }
 0x122   :  { %v1380_v12 = vpop.f32.mrb[23].mxu1 }
 0x123   :  { %v856_v10 = vadd.f32 %v1323_v5, %v1995_v44  ;;  %v2029_v13 = vadd.f32 %v1378_v7, %v853_v4  ;;  %v1381_v14 = vadd.f32 %v1380_v12, %v1379_v9 }
 0x125   :  { %v1324_v15 = vpop.f32.mrb[24].mxu0  ;;  %v2031_v16 = vadd.f32 %v1381_v14, %v856_v10 }
 0x126   :  { %v1325_v17 = vpop.f32.mrb[25].mxu0 }
 0x127   :  { %v1326_v18 = vadd.f32 %v1325_v17, %v1324_v15  ;;  %v1327_v19 = vpop.f32.mrb[26].mxu0  ;;  %v1382_v20 = vpop.f32.mrb[24].mxu1 }
 0x128   :  { %v1328_v21 = vpop.f32.mrb[27].mxu0  ;;  %v1383_v25 = vpop.f32.mrb[25].mxu1 }
 0x129   :  { %v861_v22 = vadd.f32 %v1326_v18, %v1995_v44  ;;  %v1329_v23 = vadd.f32 %v1328_v21, %v1327_v19  ;;  %v1384_v26 = vadd.f32 %v1383_v25, %v1382_v20  ;;  %v1385_v28 = vpop.f32.mrb[26].mxu1 }
 0x12a   :  { %v1386_v30 = vpop.f32.mrb[27].mxu1 }
 0x12b   :  { %v864_v29 = vadd.f32 %v1329_v23, %v1995_v44  ;;  %v2035_v31 = vadd.f32 %v1384_v26, %v861_v22  ;;  %v1387_v32 = vadd.f32 %v1386_v30, %v1385_v28 }
 0x12d   :  { %v1404_v33 = vpop.f32.mrb[28].mxu0  ;;  %v2037_v34 = vadd.f32 %v1387_v32, %v864_v29 }
 0x12e   :  { %v1405_v35 = vpop.f32.mrb[29].mxu0 }
 0x12f   :  { %v1406_v36 = vadd.f32 %v1405_v35, %v1404_v33  ;;  %v1407_v37 = vpop.f32.mrb[30].mxu0  ;;  %v1079_v40 = vpop.f32.mrb[28].mxu1 }
 0x130   :  { %v1408_v39 = vpop.f32.mrb[31].mxu0  ;;  %v1479_v46 = vpop.f32.mrb[29].mxu1 }
 0x131   :  { %v1409_v42 = vadd.f32 %v1408_v39, %v1407_v37  ;;  %v991_v43 = vadd.f32 %v1406_v36, %v1999_v56  ;;  %v1082_v47 = vpop.f32.mrb[30].mxu1 }
 0x132   :  { %v1480_v49 = vpop.f32.mrb[31].mxu1 }
 0x133   :  { %v1080_v48 = vadd.f32 %v1079_v40, %v991_v43  ;;  %v994_v44 = vadd.f32 %v1409_v42, %v2001_v59 }
 0x135   :  { %v1134_v50 = vmax.f32 %v1080_v48, 0.0  ;;  %v1083_v38 = vadd.f32 %v1082_v47, %v994_v44  ;;  %v1410_v51 = vpop.f32.mrb[32].mxu0 }
 0x136   :  { %v1411_v52 = vpop.f32.mrb[33].mxu0 }
 0x137   :  { %1148 = vst [vmem:[%s2098_s3] sm:$0xff] %v1134_v50  ;;  %v1135_v53 = vmax.f32 %v1083_v38, 0.0  ;;  %v1412_v54 = vadd.f32 %v1411_v52, %v1410_v51  ;;  %v1413_v55 = vpop.f32.mrb[34].mxu0  ;;  %v1087_v60 = vpop.f32.mrb[32].mxu1 }
 0x138   :  { %v1414_v57 = vpop.f32.mrb[35].mxu0  ;;  %v1483_v61 = vpop.f32.mrb[33].mxu1 }
 0x139   :  { %1149 = vst [vmem:[%s2098_s3 + $0x8] sm:$0xff] %v1135_v53  ;;  %v1415_v56 = vadd.f32 %v1414_v57, %v1413_v55  ;;  %v999_v59 = vadd.f32 %v1412_v54, %v2005_v8  ;;  %v1090_v63 = vpop.f32.mrb[34].mxu1 }
 0x13a   :  { %v1484_v2 = vpop.f32.mrb[35].mxu1 }
 0x13b   :  { %v1088_v0 = vadd.f32 %v1087_v60, %v999_v59  ;;  %v1002_v1 = vadd.f32 %v1415_v56, %v2007_v11 }
 0x13d   :  { %v1136_v3 = vmax.f32 %v1088_v0, 0.0  ;;  %v1091_v4 = vadd.f32 %v1090_v63, %v1002_v1  ;;  %v1416_v5 = vpop.f32.mrb[36].mxu0 }
 0x13e   :  { %v1417_v6 = vpop.f32.mrb[37].mxu0 }
 0x13f   :  { %1150 = vst [vmem:[%s2098_s3 + $0x10] sm:$0xff] %v1136_v3  ;;  %v1137_v7 = vmax.f32 %v1091_v4, 0.0  ;;  %v1418_v9 = vadd.f32 %v1417_v6, %v1416_v5  ;;  %v1419_v10 = vpop.f32.mrb[38].mxu0  ;;  %v1095_v14 = vpop.f32.mrb[36].mxu1 }
 0x140   :  { %v1420_v12 = vpop.f32.mrb[39].mxu0  ;;  %v1487_v15 = vpop.f32.mrb[37].mxu1 }
 0x141   :  { %1151 = vst [vmem:[%s2098_s3 + $0x18] sm:$0xff] %v1137_v7  ;;  %v1421_v8 = vadd.f32 %v1420_v12, %v1419_v10  ;;  %v1007_v11 = vadd.f32 %v1418_v9, %v2011_v24  ;;  %v1098_v17 = vpop.f32.mrb[38].mxu1 }
 0x142   :  { %v1488_v20 = vpop.f32.mrb[39].mxu1 }
 0x143   :  { %v1096_v18 = vadd.f32 %v1095_v14, %v1007_v11  ;;  %v1010_v19 = vadd.f32 %v1421_v8, %v2013_v27 }
 0x145   :  { %v1138_v21 = vmax.f32 %v1096_v18, 0.0  ;;  %v1099_v22 = vadd.f32 %v1098_v17, %v1010_v19  ;;  %v1422_v23 = vpop.f32.mrb[40].mxu0 }
 0x146   :  { %v1423_v25 = vpop.f32.mrb[41].mxu0 }
 0x147   :  { %1152 = vst [vmem:[%s2098_s3 + $0x20] sm:$0xff] %v1138_v21  ;;  %v1139_v26 = vmax.f32 %v1099_v22, 0.0  ;;  %v1424_v28 = vadd.f32 %v1423_v25, %v1422_v23  ;;  %v1425_v29 = vpop.f32.mrb[42].mxu0  ;;  %v1103_v32 = vpop.f32.mrb[40].mxu1 }
 0x148   :  { %v1426_v30 = vpop.f32.mrb[43].mxu0  ;;  %v1491_v33 = vpop.f32.mrb[41].mxu1 }
 0x149   :  { %1153 = vst [vmem:[%s2098_s3 + $0x28] sm:$0xff] %v1139_v26  ;;  %v1427_v24 = vadd.f32 %v1426_v30, %v1425_v29  ;;  %v1015_v27 = vadd.f32 %v1424_v28, %v2017_v41  ;;  %v1106_v35 = vpop.f32.mrb[42].mxu1 }
 0x14a   :  { %v1492_v39 = vpop.f32.mrb[43].mxu1 }
 0x14b   :  { %v1104_v36 = vadd.f32 %v1103_v32, %v1015_v27  ;;  %v1018_v37 = vadd.f32 %v1427_v24, %v2019_v45 }
 0x14d   :  { %v1140_v40 = vmax.f32 %v1104_v36, 0.0  ;;  %v1107_v42 = vadd.f32 %v1106_v35, %v1018_v37  ;;  %v1428_v43 = vpop.f32.mrb[44].mxu0 }
 0x14e   :  { %v1429_v46 = vpop.f32.mrb[45].mxu0 }
 0x14f   :  { %1154 = vst [vmem:[%s2098_s3 + $0x30] sm:$0xff] %v1140_v40  ;;  %v1141_v47 = vmax.f32 %v1107_v42, 0.0  ;;  %v1430_v48 = vadd.f32 %v1429_v46, %v1428_v43  ;;  %v1431_v44 = vpop.f32.mrb[46].mxu0  ;;  %v1111_v50 = vpop.f32.mrb[44].mxu1 }
 0x150   :  { %v1432_v49 = vpop.f32.mrb[47].mxu0  ;;  %v1495_v38 = vpop.f32.mrb[45].mxu1 }
 0x151   :  { %1155 = vst [vmem:[%s2098_s3 + $0x38] sm:$0xff] %v1141_v47  ;;  %v1433_v41 = vadd.f32 %v1432_v49, %v1431_v44  ;;  %v1023_v45 = vadd.f32 %v1430_v48, %v2023_v58  ;;  %v1114_v51 = vpop.f32.mrb[46].mxu1 }
 0x152   :  { %v1496_v54 = vpop.f32.mrb[47].mxu1 }
 0x153   :  { %v1112_v52 = vadd.f32 %v1111_v50, %v1023_v45  ;;  %v1026_v53 = vadd.f32 %v1433_v41, %v2025_v62 }
 0x155   :  { %v1142_v55 = vmax.f32 %v1112_v52, 0.0  ;;  %v1115_v57 = vadd.f32 %v1114_v51, %v1026_v53  ;;  %v1434_v60 = vpop.f32.mrb[48].mxu0 }
 0x156   :  { %v1435_v56 = vpop.f32.mrb[49].mxu0 }
 0x157   :  { %1156 = vst [vmem:[%s2098_s3 + $0x40] sm:$0xff] %v1142_v55  ;;  %v1143_v59 = vmax.f32 %v1115_v57, 0.0  ;;  %v1436_v61 = vadd.f32 %v1435_v56, %v1434_v60  ;;  %v1437_v63 = vpop.f32.mrb[50].mxu0  ;;  %v1119_v1 = vpop.f32.mrb[48].mxu1 }
 0x158   :  { %v1438_v0 = vpop.f32.mrb[51].mxu0  ;;  %v1499_v2 = vpop.f32.mrb[49].mxu1 }
 0x159   :  { %1157 = vst [vmem:[%s2098_s3 + $0x48] sm:$0xff] %v1143_v59  ;;  %v1439_v58 = vadd.f32 %v1438_v0, %v1437_v63  ;;  %v1031_v62 = vadd.f32 %v1436_v61, %v2029_v13  ;;  %v1122_v3 = vpop.f32.mrb[50].mxu1 }
 0x15a   :  { %v1500_v6 = vpop.f32.mrb[51].mxu1 }
 0x15b   :  { %v1120_v4 = vadd.f32 %v1119_v1, %v1031_v62  ;;  %v1034_v5 = vadd.f32 %v1439_v58, %v2031_v16 }
 0x15d   :  { %v1144_v7 = vmax.f32 %v1120_v4, 0.0  ;;  %v1123_v9 = vadd.f32 %v1122_v3, %v1034_v5  ;;  %v1440_v10 = vpop.f32.mrb[52].mxu0 }
 0x15e   :  { %v1441_v12 = vpop.f32.mrb[53].mxu0 }
 0x15f   :  { %1158 = vst [vmem:[%s2098_s3 + $0x50] sm:$0xff] %v1144_v7  ;;  %v1145_v14 = vmax.f32 %v1123_v9, 0.0  ;;  %v1442_v8 = vadd.f32 %v1441_v12, %v1440_v10  ;;  %v1443_v11 = vpop.f32.mrb[54].mxu0  ;;  %v1127_v17 = vpop.f32.mrb[52].mxu1 }
 0x160   :  { %v1444_v15 = vpop.f32.mrb[55].mxu0  ;;  %v1503_v18 = vpop.f32.mrb[53].mxu1 }
 0x161   :  { %1159 = vst [vmem:[%s2098_s3 + $0x58] sm:$0xff] %v1145_v14  ;;  %v1445_v13 = vadd.f32 %v1444_v15, %v1443_v11  ;;  %v1039_v16 = vadd.f32 %v1442_v8, %v2035_v31  ;;  %v1130_v19 = vpop.f32.mrb[54].mxu1 }
 0x162   :  { %v1504_v22 = vpop.f32.mrb[55].mxu1 }
 0x163   :  { %v1128_v20 = vadd.f32 %v1127_v17, %v1039_v16  ;;  %v1042_v21 = vadd.f32 %v1445_v13, %v2037_v34 }
 0x165   :  { %v1146_v23 = vmax.f32 %v1128_v20, 0.0  ;;  %v1131_v25 = vadd.f32 %v1130_v19, %v1042_v21 }
 0x167   :  { %1160 = vst [vmem:[%s2098_s3 + $0x60] sm:$0xff] %v1146_v23  ;;  %v1147_v26 = vmax.f32 %v1131_v25, 0.0 }
 0x169   :  { %1161 = vst [vmem:[%s2098_s3 + $0x68] sm:$0xff] %v1147_v26 }

// kernel: inception_b_forward.5
= control target key start
LH: loop header
LB: loop body
LE: loop exit
PB: predicated region body
PF: predicated region fallthrough
CT: control target
= control target key end

     0   :  { %v660_v0 = vmov 0.0   ;;  %vm661_vm0 = vmmov 0   ;;  %v662_v3 = vmov 0   ;;  %v63_v33 = vlaneseq  ;;  %s982_s1 = inlined_call_operand.vmem [shape: bf16[128,384], index: 1, kind: input, shape index: {}]   ;;  %s983_s0 = inlined_call_operand.vmem [shape: bf16[112,128], index: 0, kind: input, shape index: {}]   ;;  %s984_s2 = inlined_call_operand.vmem [shape: f32[1,384], index: 2, kind: input, shape index: {}]   ;;  %s985_s3 = inlined_call_operand.vmem [shape: f32[112,384], index: 3, kind: output, shape index: {}]  }
   0x1   :  { %574 = vmatprep.subr.bf16.mxu1 %v660_v0  ;;  %v621_v1 = vld [vmem:[%s982_s1 + $0x4] ss:$12 sps:$4 sm:$0xff]   ;;  %590 = vmatprep.mubr.msk.bf16.mxu1 %vm661_vm0, %v660_v0  ;;  %v623_v2 = vld [vmem:[%s982_s1 + $0x8] ss:$12 sps:$4 sm:$0xff]   ;;  %v624_v4 = vld [vmem:[%s982_s1] ss:$12 sps:$4 sm:$0xff]  }
   0x2   :  { %280 = vmatprep.mubr.bf16.mxu0 %v662_v3  ;;  %248 = vmatprep.subr.bf16.mxu0 %v621_v1  ;;  %v625_v5 = vld [vmem:[%s982_s1 + $0x1c] ss:$12 sps:$4 sm:$0xff]   ;;  %v627_v6 = vld [vmem:[%s982_s1 + $0x20] ss:$12 sps:$4 sm:$0xff]   ;;  %v628_v7 = vld [vmem:[%s982_s1 + $0x18] ss:$12 sps:$4 sm:$0xff]  }
   0x3   :  { %575 = vmatpush3.bf16.msra.mxu1 %v623_v2  ;;  %249 = vmatpush1.bf16.msra.mxu0 %v624_v4  ;;  %v629_v8 = vld [vmem:[%s982_s1 + $0x34] ss:$12 sps:$4 sm:$0xff]   ;;  %v631_v9 = vld [vmem:[%s982_s1 + $0x38] ss:$12 sps:$4 sm:$0xff]   ;;  %v632_v10 = vld [vmem:[%s982_s1 + $0x30] ss:$12 sps:$4 sm:$0xff]  }
   0x4   :  { %576 = vmatprep.subr.bf16.mxu1 %v660_v0  ;;  %250 = vmatprep.subr.bf16.mxu0 %v625_v5  ;;  %v633_v11 = vld [vmem:[%s982_s1 + $0x4c] ss:$12 sps:$4 sm:$0xff]   ;;  %v635_v12 = vld [vmem:[%s982_s1 + $0x50] ss:$12 sps:$4 sm:$0xff]   ;;  %v636_v13 = vld [vmem:[%s982_s1 + $0x48] ss:$12 sps:$4 sm:$0xff]  }
   0x5   :  { %v637_v14 = vld [vmem:[%s982_s1 + $0x64] ss:$12 sps:$4 sm:$0xff]   ;;  %v639_v15 = vld [vmem:[%s982_s1 + $0x68] ss:$12 sps:$4 sm:$0xff]   ;;  %v640_v16 = vld [vmem:[%s982_s1 + $0x60] ss:$12 sps:$4 sm:$0xff]  }
   0x6   :  { %v641_v17 = vld [vmem:[%s982_s1 + $0x7c] ss:$12 sps:$4 sm:$0xff]   ;;  %v643_v18 = vld [vmem:[%s982_s1 + $0x80] ss:$12 sps:$4 sm:$0xff]   ;;  %v644_v19 = vld [vmem:[%s982_s1 + $0x78] ss:$12 sps:$4 sm:$0xff]  }
   0x7   :  { %577 = vmatpush3.bf16.msra.mxu1 %v627_v6  ;;  %251 = vmatpush1.bf16.msra.mxu0 %v628_v7  ;;  %v645_v20 = vld [vmem:[%s982_s1 + $0x94] ss:$12 sps:$4 sm:$0xff]   ;;  %v647_v21 = vld [vmem:[%s982_s1 + $0x98] ss:$12 sps:$4 sm:$0xff]   ;;  %v648_v22 = vld [vmem:[%s982_s1 + $0x90] ss:$12 sps:$4 sm:$0xff]  }
   0x8   :  { %578 = vmatprep.subr.bf16.mxu1 %v660_v0  ;;  %252 = vmatprep.subr.bf16.mxu0 %v629_v8  ;;  %v649_v23 = vld [vmem:[%s982_s1 + $0xac] ss:$12 sps:$4 sm:$0xff]   ;;  %v651_v24 = vld [vmem:[%s982_s1 + $0xb0] ss:$12 sps:$4 sm:$0xff]   ;;  %v652_v25 = vld [vmem:[%s982_s1 + $0xa8] ss:$12 sps:$4 sm:$0xff]  }
   0x9   :  { %v653_v26 = vld [vmem:[%s983_s0] sm:$0xff]   ;;  %v654_v27 = vld [vmem:[%s983_s0 + $0x8] sm:$0xff]   ;;  %v655_v28 = vld [vmem:[%s983_s0 + $0x10] sm:$0xff]   ;;  %v64_v34 = vshrl.u32 %v63_v33, 7 }
   0xa   :  { %v656_v29 = vld [vmem:[%s983_s0 + $0x18] sm:$0xff]   ;;  %v657_v30 = vld [vmem:[%s983_s0 + $0x20] sm:$0xff]   ;;  %v658_v31 = vld [vmem:[%s983_s0 + $0x28] sm:$0xff]  }
   0xb   :  { %579 = vmatpush3.bf16.msra.mxu1 %v631_v9  ;;  %253 = vmatpush1.bf16.msra.mxu0 %v632_v10  ;;  %v659_v32 = vld [vmem:[%s983_s0 + $0x30] sm:$0xff]   ;;  %v73_v35 = vsub.s32 2, %v64_v34  ;;  %v61_v36 = vld [vmem:[%s984_s2] sm:$0x7]  ;;  %v65_v37 = vsub.s32 0, %v64_v34  ;;  %v69_v38 = vsub.s32 1, %v64_v34 }
   0xc   :  { %580 = vmatprep.subr.bf16.mxu1 %v660_v0  ;;  %254 = vmatprep.subr.bf16.mxu0 %v633_v11 }
   0xd   :  { %v808_v39 = vrot.slane %v61_v36, %v73_v35  ;;  %v810_v40 = vrot.slane %v61_v36, %v65_v37  ;;  %v812_v41 = vrot.slane %v61_v36, %v69_v38 }
   0xf   :  { %581 = vmatpush3.bf16.msra.mxu1 %v635_v12  ;;  %255 = vmatpush1.bf16.msra.mxu0 %v636_v13 }
  0x10   :  { %582 = vmatprep.subr.bf16.mxu1 %v660_v0  ;;  %256 = vmatprep.subr.bf16.mxu0 %v637_v14 }
  0x13   :  { %583 = vmatpush3.bf16.msra.mxu1 %v639_v15  ;;  %257 = vmatpush1.bf16.msra.mxu0 %v640_v16 }
  0x14   :  { %584 = vmatprep.subr.bf16.mxu1 %v660_v0  ;;  %258 = vmatprep.subr.bf16.mxu0 %v641_v17 }
  0x17   :  { %585 = vmatpush3.bf16.msra.mxu1 %v643_v18  ;;  %259 = vmatpush1.bf16.msra.mxu0 %v644_v19 }
  0x18   :  { %586 = vmatprep.subr.bf16.mxu1 %v660_v0  ;;  %260 = vmatprep.subr.bf16.mxu0 %v645_v20 }
  0x1b   :  { %587 = vmatpush3.bf16.msra.mxu1 %v647_v21  ;;  %261 = vmatpush1.bf16.msra.mxu0 %v648_v22 }
  0x1c   :  { %588 = vmatprep.subr.bf16.mxu1 %v660_v0  ;;  %262 = vmatprep.subr.bf16.mxu0 %v649_v23 }
  0x1f   :  { %589 = vmatpush3.bf16.msra.mxu1 %v651_v24  ;;  %263 = vmatpush1.bf16.msra.mxu0 %v652_v25 }
  0x22   :  { %591 = vmatmul.mubr.bf16.vlgmr.msra.gmra.mrb[0].mxu1 %v653_v26  ;;  %281 = vmatmul.mubr.bf16.vlgmr.msra.gmra.mrb[0].mxu0 %v653_v26 }
  0x23   :  { %594 = vmatprep.mubr.msk.bf16.mxu1 %vm661_vm0, %v660_v0  ;;  %290 = vmatprep.mubr.bf16.mxu0 %v662_v3 }
  0x2a   :  { %595 = vmatmul.mubr.bf16.gmra.mrb[4].mxu1 %v654_v27  ;;  %291 = vmatmul.mubr.bf16.gmra.mrb[4].mxu0 %v654_v27 }
  0x2b   :  { %598 = vmatprep.mubr.msk.bf16.mxu1 %vm661_vm0, %v660_v0  ;;  %300 = vmatprep.mubr.bf16.mxu0 %v662_v3 }
  0x32   :  { %599 = vmatmul.mubr.bf16.gmra.mrb[8].mxu1 %v655_v28  ;;  %301 = vmatmul.mubr.bf16.gmra.mrb[8].mxu0 %v655_v28 }
  0x33   :  { %602 = vmatprep.mubr.msk.bf16.mxu1 %vm661_vm0, %v660_v0  ;;  %310 = vmatprep.mubr.bf16.mxu0 %v662_v3 }
  0x3a   :  { %603 = vmatmul.mubr.bf16.gmra.mrb[12].mxu1 %v656_v29  ;;  %311 = vmatmul.mubr.bf16.gmra.mrb[12].mxu0 %v656_v29 }
  0x3b   :  { %606 = vmatprep.mubr.msk.bf16.mxu1 %vm661_vm0, %v660_v0  ;;  %320 = vmatprep.mubr.bf16.mxu0 %v662_v3 }
  0x42   :  { %607 = vmatmul.mubr.bf16.gmra.mrb[16].mxu1 %v657_v30  ;;  %321 = vmatmul.mubr.bf16.gmra.mrb[16].mxu0 %v657_v30 }
  0x43   :  { %610 = vmatprep.mubr.msk.bf16.mxu1 %vm661_vm0, %v660_v0  ;;  %330 = vmatprep.mubr.bf16.mxu0 %v662_v3 }
  0x4a   :  { %611 = vmatmul.mubr.bf16.gmra.mrb[20].mxu1 %v658_v31  ;;  %331 = vmatmul.mubr.bf16.gmra.mrb[20].mxu0 %v658_v31 }
  0x4b   :  { %614 = vmatprep.mubr.msk.bf16.mxu1 %vm661_vm0, %v660_v0  ;;  %340 = vmatprep.mubr.bf16.mxu0 %v662_v3 }
  0x52   :  { %615 = vmatmul.mubr.bf16.gmra.mrb[24].mxu1 %v659_v32  ;;  %341 = vmatmul.mubr.bf16.gmra.mrb[24].mxu0 %v659_v32 }
  0xf5   :  { %v385_v42 = vpop.f32.mrb[0].mxu1  ;;  %v282_v44 = vpop.f32.mrb[0].mxu0 }
  0xf6   :  { %v386_v43 = vadd.f32 %v385_v42, %v808_v39  ;;  %v592_v45 = vpop.f32.mrb[1].mxu1  ;;  %v283_v46 = vadd.f32 %v282_v44, %v810_v40  ;;  %v284_v47 = vpop.f32.mrb[1].mxu0 }
  0xf7   :  { %v388_v48 = vpop.f32.mrb[2].mxu1  ;;  %v285_v50 = vadd.f32 %v284_v47, %v812_v41  ;;  %v286_v52 = vpop.f32.mrb[2].mxu0 }
  0xf8   :  { %v442_v49 = vmax.f32 %v386_v43, 0.0  ;;  %v389_v51 = vadd.f32 %v388_v48, %v808_v39  ;;  %v593_v53 = vpop.f32.mrb[3].mxu1  ;;  %v440_v54 = vmax.f32 %v283_v46, 0.0  ;;  %v287_v55 = vadd.f32 %v286_v52, %v810_v40  ;;  %v288_v56 = vpop.f32.mrb[3].mxu0 }
  0xf9   :  { %v441_v57 = vmax.f32 %v285_v50, 0.0  ;;  %v289_v59 = vadd.f32 %v288_v56, %v812_v41 }
  0xfa   :  { %484 = vst [vmem:[%s985_s3 + $0x10] sm:$0xff] %v442_v49  ;;  %v445_v58 = vmax.f32 %v389_v51, 0.0  ;;  %482 = vst [vmem:[%s985_s3] sm:$0xff] %v440_v54  ;;  %v443_v60 = vmax.f32 %v287_v55, 0.0 }
  0xfb   :  { %483 = vst [vmem:[%s985_s3 + $0x8] sm:$0xff] %v441_v57  ;;  %v444_v61 = vmax.f32 %v289_v59, 0.0 }
  0xfc   :  { %487 = vst [vmem:[%s985_s3 + $0x28] sm:$0xff] %v445_v58  ;;  %485 = vst [vmem:[%s985_s3 + $0x18] sm:$0xff] %v443_v60 }
  0xfd   :  { %v393_v62 = vpop.f32.mrb[4].mxu1  ;;  %486 = vst [vmem:[%s985_s3 + $0x20] sm:$0xff] %v444_v61  ;;  %v292_v0 = vpop.f32.mrb[4].mxu0 }
  0xfe   :  { %v394_v63 = vadd.f32 %v393_v62, %v808_v39  ;;  %v596_v1 = vpop.f32.mrb[5].mxu1  ;;  %v293_v2 = vadd.f32 %v292_v0, %v810_v40  ;;  %v294_v3 = vpop.f32.mrb[5].mxu0 }
  0xff   :  { %v396_v4 = vpop.f32.mrb[6].mxu1  ;;  %v295_v6 = vadd.f32 %v294_v3, %v812_v41  ;;  %v296_v8 = vpop.f32.mrb[6].mxu0 }
 0x100   :  { %v448_v5 = vmax.f32 %v394_v63, 0.0  ;;  %v397_v7 = vadd.f32 %v396_v4, %v808_v39  ;;  %v597_v9 = vpop.f32.mrb[7].mxu1  ;;  %v446_v10 = vmax.f32 %v293_v2, 0.0  ;;  %v297_v11 = vadd.f32 %v296_v8, %v810_v40  ;;  %v298_v12 = vpop.f32.mrb[7].mxu0 }
 0x101   :  { %v447_v13 = vmax.f32 %v295_v6, 0.0  ;;  %v299_v15 = vadd.f32 %v298_v12, %v812_v41 }
 0x102   :  { %490 = vst [vmem:[%s985_s3 + $0x40] sm:$0xff] %v448_v5  ;;  %v451_v14 = vmax.f32 %v397_v7, 0.0  ;;  %488 = vst [vmem:[%s985_s3 + $0x30] sm:$0xff] %v446_v10  ;;  %v449_v16 = vmax.f32 %v297_v11, 0.0 }
 0x103   :  { %489 = vst [vmem:[%s985_s3 + $0x38] sm:$0xff] %v447_v13  ;;  %v450_v17 = vmax.f32 %v299_v15, 0.0 }
 0x104   :  { %493 = vst [vmem:[%s985_s3 + $0x58] sm:$0xff] %v451_v14  ;;  %491 = vst [vmem:[%s985_s3 + $0x48] sm:$0xff] %v449_v16 }
 0x105   :  { %v401_v18 = vpop.f32.mrb[8].mxu1  ;;  %492 = vst [vmem:[%s985_s3 + $0x50] sm:$0xff] %v450_v17  ;;  %v302_v20 = vpop.f32.mrb[8].mxu0 }
 0x106   :  { %v402_v19 = vadd.f32 %v401_v18, %v808_v39  ;;  %v600_v21 = vpop.f32.mrb[9].mxu1  ;;  %v303_v22 = vadd.f32 %v302_v20, %v810_v40  ;;  %v304_v23 = vpop.f32.mrb[9].mxu0 }
 0x107   :  { %v404_v24 = vpop.f32.mrb[10].mxu1  ;;  %v305_v26 = vadd.f32 %v304_v23, %v812_v41  ;;  %v306_v28 = vpop.f32.mrb[10].mxu0 }
 0x108   :  { %v454_v25 = vmax.f32 %v402_v19, 0.0  ;;  %v405_v27 = vadd.f32 %v404_v24, %v808_v39  ;;  %v601_v29 = vpop.f32.mrb[11].mxu1  ;;  %v452_v30 = vmax.f32 %v303_v22, 0.0  ;;  %v307_v31 = vadd.f32 %v306_v28, %v810_v40  ;;  %v308_v32 = vpop.f32.mrb[11].mxu0 }
 0x109   :  { %v453_v33 = vmax.f32 %v305_v26, 0.0  ;;  %v309_v35 = vadd.f32 %v308_v32, %v812_v41 }
 0x10a   :  { %496 = vst [vmem:[%s985_s3 + $0x70] sm:$0xff] %v454_v25  ;;  %v457_v34 = vmax.f32 %v405_v27, 0.0  ;;  %494 = vst [vmem:[%s985_s3 + $0x60] sm:$0xff] %v452_v30  ;;  %v455_v36 = vmax.f32 %v307_v31, 0.0 }
 0x10b   :  { %495 = vst [vmem:[%s985_s3 + $0x68] sm:$0xff] %v453_v33  ;;  %v456_v37 = vmax.f32 %v309_v35, 0.0 }
 0x10c   :  { %499 = vst [vmem:[%s985_s3 + $0x88] sm:$0xff] %v457_v34  ;;  %497 = vst [vmem:[%s985_s3 + $0x78] sm:$0xff] %v455_v36 }
 0x10d   :  { %v409_v38 = vpop.f32.mrb[12].mxu1  ;;  %498 = vst [vmem:[%s985_s3 + $0x80] sm:$0xff] %v456_v37  ;;  %v312_v43 = vpop.f32.mrb[12].mxu0 }
 0x10e   :  { %v410_v42 = vadd.f32 %v409_v38, %v808_v39  ;;  %v604_v44 = vpop.f32.mrb[13].mxu1  ;;  %v313_v45 = vadd.f32 %v312_v43, %v810_v40  ;;  %v314_v46 = vpop.f32.mrb[13].mxu0 }
 0x10f   :  { %v412_v47 = vpop.f32.mrb[14].mxu1  ;;  %v315_v49 = vadd.f32 %v314_v46, %v812_v41  ;;  %v316_v51 = vpop.f32.mrb[14].mxu0 }
 0x110   :  { %v460_v48 = vmax.f32 %v410_v42, 0.0  ;;  %v413_v50 = vadd.f32 %v412_v47, %v808_v39  ;;  %v605_v52 = vpop.f32.mrb[15].mxu1  ;;  %v458_v53 = vmax.f32 %v313_v45, 0.0  ;;  %v317_v54 = vadd.f32 %v316_v51, %v810_v40  ;;  %v318_v55 = vpop.f32.mrb[15].mxu0 }
 0x111   :  { %v459_v56 = vmax.f32 %v315_v49, 0.0  ;;  %v319_v58 = vadd.f32 %v318_v55, %v812_v41 }
 0x112   :  { %502 = vst [vmem:[%s985_s3 + $0xa0] sm:$0xff] %v460_v48  ;;  %v463_v57 = vmax.f32 %v413_v50, 0.0  ;;  %500 = vst [vmem:[%s985_s3 + $0x90] sm:$0xff] %v458_v53  ;;  %v461_v59 = vmax.f32 %v317_v54, 0.0 }
 0x113   :  { %501 = vst [vmem:[%s985_s3 + $0x98] sm:$0xff] %v459_v56  ;;  %v462_v60 = vmax.f32 %v319_v58, 0.0 }
 0x114   :  { %505 = vst [vmem:[%s985_s3 + $0xb8] sm:$0xff] %v463_v57  ;;  %503 = vst [vmem:[%s985_s3 + $0xa8] sm:$0xff] %v461_v59 }
 0x115   :  { %v417_v61 = vpop.f32.mrb[16].mxu1  ;;  %504 = vst [vmem:[%s985_s3 + $0xb0] sm:$0xff] %v462_v60  ;;  %v322_v63 = vpop.f32.mrb[16].mxu0 }
 0x116   :  { %v418_v62 = vadd.f32 %v417_v61, %v808_v39  ;;  %v608_v0 = vpop.f32.mrb[17].mxu1  ;;  %v323_v1 = vadd.f32 %v322_v63, %v810_v40  ;;  %v324_v2 = vpop.f32.mrb[17].mxu0 }
 0x117   :  { %v420_v3 = vpop.f32.mrb[18].mxu1  ;;  %v325_v5 = vadd.f32 %v324_v2, %v812_v41  ;;  %v326_v7 = vpop.f32.mrb[18].mxu0 }
 0x118   :  { %v466_v4 = vmax.f32 %v418_v62, 0.0  ;;  %v421_v6 = vadd.f32 %v420_v3, %v808_v39  ;;  %v609_v8 = vpop.f32.mrb[19].mxu1  ;;  %v464_v9 = vmax.f32 %v323_v1, 0.0  ;;  %v327_v10 = vadd.f32 %v326_v7, %v810_v40  ;;  %v328_v11 = vpop.f32.mrb[19].mxu0 }
 0x119   :  { %v465_v12 = vmax.f32 %v325_v5, 0.0  ;;  %v329_v14 = vadd.f32 %v328_v11, %v812_v41 }
 0x11a   :  { %508 = vst [vmem:[%s985_s3 + $0xd0] sm:$0xff] %v466_v4  ;;  %v469_v13 = vmax.f32 %v421_v6, 0.0  ;;  %506 = vst [vmem:[%s985_s3 + $0xc0] sm:$0xff] %v464_v9  ;;  %v467_v15 = vmax.f32 %v327_v10, 0.0 }
 0x11b   :  { %507 = vst [vmem:[%s985_s3 + $0xc8] sm:$0xff] %v465_v12  ;;  %v468_v16 = vmax.f32 %v329_v14, 0.0 }
 0x11c   :  { %511 = vst [vmem:[%s985_s3 + $0xe8] sm:$0xff] %v469_v13  ;;  %509 = vst [vmem:[%s985_s3 + $0xd8] sm:$0xff] %v467_v15 }
 0x11d   :  { %v425_v17 = vpop.f32.mrb[20].mxu1  ;;  %510 = vst [vmem:[%s985_s3 + $0xe0] sm:$0xff] %v468_v16  ;;  %v332_v19 = vpop.f32.mrb[20].mxu0 }
 0x11e   :  { %v426_v18 = vadd.f32 %v425_v17, %v808_v39  ;;  %v612_v20 = vpop.f32.mrb[21].mxu1  ;;  %v333_v21 = vadd.f32 %v332_v19, %v810_v40  ;;  %v334_v22 = vpop.f32.mrb[21].mxu0 }
 0x11f   :  { %v428_v23 = vpop.f32.mrb[22].mxu1  ;;  %v335_v25 = vadd.f32 %v334_v22, %v812_v41  ;;  %v336_v27 = vpop.f32.mrb[22].mxu0 }
 0x120   :  { %v472_v24 = vmax.f32 %v426_v18, 0.0  ;;  %v429_v26 = vadd.f32 %v428_v23, %v808_v39  ;;  %v613_v28 = vpop.f32.mrb[23].mxu1  ;;  %v470_v29 = vmax.f32 %v333_v21, 0.0  ;;  %v337_v30 = vadd.f32 %v336_v27, %v810_v40  ;;  %v338_v31 = vpop.f32.mrb[23].mxu0 }
 0x121   :  { %v471_v32 = vmax.f32 %v335_v25, 0.0  ;;  %v339_v34 = vadd.f32 %v338_v31, %v812_v41 }
 0x122   :  { %514 = vst [vmem:[%s985_s3 + $0x100] sm:$0xff] %v472_v24  ;;  %v475_v33 = vmax.f32 %v429_v26, 0.0  ;;  %512 = vst [vmem:[%s985_s3 + $0xf0] sm:$0xff] %v470_v29  ;;  %v473_v35 = vmax.f32 %v337_v30, 0.0 }
 0x123   :  { %513 = vst [vmem:[%s985_s3 + $0xf8] sm:$0xff] %v471_v32  ;;  %v474_v36 = vmax.f32 %v339_v34, 0.0 }
 0x124   :  { %517 = vst [vmem:[%s985_s3 + $0x118] sm:$0xff] %v475_v33  ;;  %515 = vst [vmem:[%s985_s3 + $0x108] sm:$0xff] %v473_v35 }
 0x125   :  { %v433_v37 = vpop.f32.mrb[24].mxu1  ;;  %516 = vst [vmem:[%s985_s3 + $0x110] sm:$0xff] %v474_v36  ;;  %v342_v42 = vpop.f32.mrb[24].mxu0 }
 0x126   :  { %v434_v38 = vadd.f32 %v433_v37, %v808_v39  ;;  %v616_v43 = vpop.f32.mrb[25].mxu1  ;;  %v343_v44 = vadd.f32 %v342_v42, %v810_v40  ;;  %v344_v45 = vpop.f32.mrb[25].mxu0 }
 0x127   :  { %v436_v46 = vpop.f32.mrb[26].mxu1  ;;  %v345_v48 = vadd.f32 %v344_v45, %v812_v41  ;;  %v346_v50 = vpop.f32.mrb[26].mxu0 }
 0x128   :  { %v478_v47 = vmax.f32 %v434_v38, 0.0  ;;  %v437_v49 = vadd.f32 %v436_v46, %v808_v39  ;;  %v617_v51 = vpop.f32.mrb[27].mxu1  ;;  %v476_v52 = vmax.f32 %v343_v44, 0.0  ;;  %v347_v53 = vadd.f32 %v346_v50, %v810_v40  ;;  %v348_v54 = vpop.f32.mrb[27].mxu0 }
 0x129   :  { %v477_v55 = vmax.f32 %v345_v48, 0.0  ;;  %v349_v57 = vadd.f32 %v348_v54, %v812_v41 }
 0x12a   :  { %520 = vst [vmem:[%s985_s3 + $0x130] sm:$0xff] %v478_v47  ;;  %v481_v56 = vmax.f32 %v437_v49, 0.0  ;;  %518 = vst [vmem:[%s985_s3 + $0x120] sm:$0xff] %v476_v52  ;;  %v479_v58 = vmax.f32 %v347_v53, 0.0 }
 0x12b   :  { %519 = vst [vmem:[%s985_s3 + $0x128] sm:$0xff] %v477_v55  ;;  %v480_v39 = vmax.f32 %v349_v57, 0.0 }
 0x12c   :  { %523 = vst [vmem:[%s985_s3 + $0x148] sm:$0xff] %v481_v56  ;;  %521 = vst [vmem:[%s985_s3 + $0x138] sm:$0xff] %v479_v58 }
 0x12d   :  { %522 = vst [vmem:[%s985_s3 + $0x140] sm:$0xff] %v480_v39 }

</bundles_post_ra>
